<compile_context>
chip_gen: v7x
topology: tpu7x:2x2x1
jax: 0.10.0
libtpu: 0.0.40
codegen_flags: <defaults>
</compile_context>

<pallas_src>
import numpy as np

import jax
import jax.numpy as jnp
from jax.experimental import pallas as pl
from jax.experimental.pallas import tpu as pltpu


# ------------------------------ Pallas kernel --------------------------------
def _fused_disc_kernel(cols1_ref, w1_ref, b1_ref,
                       s2_ref, w2_ref, b2_ref,
                       s3_ref, w3_ref, b3_ref,
                       out_ref):
    """One batch element: conv1+lrelu -> conv2+lrelu -> conv3+sigmoid, all in VMEM."""
    f32, bf16 = jnp.float32, jnp.bfloat16

    # ---- layer 1: Conv(1->64, k4 s2 p1) + LeakyReLU(0.2) ---------------------
    a1 = jnp.dot(cols1_ref[0], w1_ref[...], preferred_element_type=f32)
    a1 = a1 + b1_ref[...]                             # (P1, 64) + (1, 64)
    a1 = jnp.where(a1 > 0, a1, 0.2 * a1)
    a1b = a1.astype(bf16)

    # ---- layer 2: Conv(64->128, k4 s2 p1) + LeakyReLU(0.2) -------------------
    acc2 = jnp.zeros((s2_ref.shape[1], w2_ref.shape[2]), f32)
    for b in range(s2_ref.shape[0]):                  # 16 taps, static unroll
        # gather (with implicit zero padding) via constant 0/1 selection matmul
        g = jnp.dot(s2_ref[b], a1b, preferred_element_type=f32).astype(bf16)
        acc2 = acc2 + jnp.dot(g, w2_ref[b], preferred_element_type=f32)
    a2 = acc2 + b2_ref[...]
    a2 = jnp.where(a2 > 0, a2, 0.2 * a2)
    a2b = a2.astype(bf16)

    # ---- layer 3: Conv(128->1, lane-padded to 128, k4 s1 p1) + Sigmoid -------
    acc3 = jnp.zeros((s3_ref.shape[1], w3_ref.shape[2]), f32)
    for b in range(s3_ref.shape[0]):
        g = jnp.dot(s3_ref[b], a2b, preferred_element_type=f32).astype(bf16)
        acc3 = acc3 + jnp.dot(g, w3_ref[b], preferred_element_type=f32)
    y = acc3 + b3_ref[...]
    # sigmoid: exp + reciprocal both on the EUP slot
    out_ref[0] = pl.reciprocal(1.0 + jnp.exp(-y), approx=True)


# ------------------------------ host-side glue --------------------------------
def _conv_out(n, k, stride, pad):
    return (n + 2 * pad - k) // stride + 1


def _build_selection(oh, ow, ih, iw, k, stride, pad):
    """S[b, p, r] = 1 selects input spatial row r for output position p, tap b=kh*k+kw.
    Out-of-bounds taps get an all-zero row == zero padding."""
    s = np.zeros((k * k, oh * ow, ih * iw), dtype=np.float32)
    for kh in range(k):
        for kw in range(k):
            b = kh * k + kw
            for oi in range(oh):
                ii = stride * oi + kh - pad
                if not (0 <= ii < ih):
                    continue
                for oj in range(ow):
                    jj = stride * oj + kw - pad
                    if 0 <= jj < iw:
                        s[b, oi * ow + oj, ii * iw + jj] = 1.0
    return s


def boundary_discriminator(x_nchw, params):
    """Forward pass. x: (N,1,H,W) f32 -> (N,1,H',W') f32 (matches nn.Sequential above)."""
    (wc1, bc1), (wc2, bc2), (wc3, bc3) = params
    n, cin, h, w = x_nchw.shape
    assert cin == 1
    k = 4
    lane = 128
    cout1, cout2, cout3 = wc1.shape[0], wc2.shape[0], wc3.shape[0]

    oh1, ow1 = _conv_out(h, k, 2, 1), _conv_out(w, k, 2, 1)
    oh2, ow2 = _conv_out(oh1, k, 2, 1), _conv_out(ow1, k, 2, 1)
    oh3, ow3 = _conv_out(oh2, k, 1, 1), _conv_out(ow2, k, 1, 1)
    p1, p2, p3 = oh1 * ow1, oh2 * ow2, oh3 * ow3

    # layer-1 im2col of the raw single-channel input (tiny: p1 x 16 per image)
    xp = jnp.pad(x_nchw[:, 0], ((0, 0), (1, 1), (1, 1)))
    patches = []
    for kh in range(k):
        for kw in range(k):
            patches.append(
                xp[:, kh:kh + 2 * oh1:2, kw:kw + 2 * ow1:2].reshape(n, p1))
    cols1 = jnp.stack(patches, axis=-1).astype(jnp.bfloat16)          # (N, P1, 16)

    # weights in [kh, kw, cin] order matching the gathers; bf16 for the MXU
    w1m = jnp.transpose(wc1, (2, 3, 1, 0)).reshape(k * k, cout1).astype(jnp.bfloat16)
    w2m = jnp.transpose(wc2, (2, 3, 1, 0)).reshape(k * k, cout1, cout2).astype(jnp.bfloat16)
    w3m = jnp.transpose(wc3, (2, 3, 1, 0)).reshape(k * k, cout2, cout3)
    w3m = jnp.pad(w3m, ((0, 0), (0, 0), (0, lane - cout3))).astype(jnp.bfloat16)
    b1r = bc1.reshape(1, cout1).astype(jnp.float32)
    b2r = bc2.reshape(1, cout2).astype(jnp.float32)
    b3r = jnp.pad(bc3, (0, lane - cout3)).reshape(1, lane).astype(jnp.float32)

    # constant selection matrices (gather + zero-pad folded together)
    s2 = jnp.asarray(_build_selection(oh2, ow2, oh1, ow1, k, 2, 1), dtype=jnp.bfloat16)
    s3 = jnp.asarray(_build_selection(oh3, ow3, oh2, ow2, k, 1, 1), dtype=jnp.bfloat16)

    flops = 2 * n * (p1 * k * k * cout1
                     + k * k * (p2 * p1 * cout1 + p2 * cout1 * cout2)
                     + k * k * (p3 * p2 * cout2 + p3 * cout2 * lane))
    bytes_accessed = (2 * (cols1.size + w1m.size + w2m.size + w3m.size + s2.size + s3.size)
                      + 4 * (b1r.size + b2r.size + b3r.size)
                      + 4 * n * p3 * lane)

    out_padded = pl.pallas_call(
        _fused_disc_kernel,
        out_shape=jax.ShapeDtypeStruct((n, p3, lane), jnp.float32),
        grid=(n,),
        in_specs=[
            pl.BlockSpec((1, p1, k * k), lambda i: (i, 0, 0)),
            pl.BlockSpec((k * k, cout1), lambda i: (0, 0)),
            pl.BlockSpec((1, cout1), lambda i: (0, 0)),
            pl.BlockSpec(s2.shape, lambda i: (0, 0, 0)),
            pl.BlockSpec(w2m.shape, lambda i: (0, 0, 0)),
            pl.BlockSpec((1, cout2), lambda i: (0, 0)),
            pl.BlockSpec(s3.shape, lambda i: (0, 0, 0)),
            pl.BlockSpec(w3m.shape, lambda i: (0, 0, 0)),
            pl.BlockSpec((1, lane), lambda i: (0, 0)),
        ],
        out_specs=pl.BlockSpec((1, p3, lane), lambda i: (i, 0, 0)),
        compiler_params=pltpu.CompilerParams(
            dimension_semantics=("parallel",)),
        cost_estimate=pl.CostEstimate(
            flops=int(flops),
            transcendentals=int(2 * n * p3 * lane),
            bytes_accessed=int(bytes_accessed)),
    )(cols1, w1m, b1r, s2, w2m, b2r, s3, w3m, b3r)

    return out_padded[:, :, 0].reshape(n, 1, oh3, ow3)


# ------------------------------ params & reference ----------------------------
def init_params(key):
    """Deterministic synthetic params with PyTorch Conv2d shapes/init."""
    ks = jax.random.split(key, 6)

    def conv_init(kw_, kb_, cout, cin, k):
        fan_in = cin * k * k
        bound = 1.0 / jnp.sqrt(fan_in)
        wgt = jax.random.uniform(kw_, (cout, cin, k, k), jnp.float32, -bound, bound)
        b = jax.random.uniform(kb_, (cout,), jnp.float32, -bound, bound)
        return wgt, b

    w1, b1 = conv_init(ks[0], ks[1], 64, 1, 4)
    w2, b2 = conv_init(ks[2], ks[3], 128, 64, 4)
    w3, b3 = conv_init(ks[4], ks[5], 1, 128, 4)
    return (w1, b1), (w2, b2), (w3, b3)


def reference_forward(x_nchw, params):
    """Plain-XLA reference (f32) for a loose correctness check."""
    (w1, b1), (w2, b2), (w3, b3) = params

    def conv(x, wgt, b, stride, pad):
        y = jax.lax.conv_general_dilated(
            x, wgt, window_strides=(stride, stride),
            padding=((pad, pad), (pad, pad)),
            dimension_numbers=("NCHW", "OIHW", "NCHW"))
        return y + b.reshape(1, -1, 1, 1)

    y = conv(x_nchw, w1, b1, 2, 1)
    y = jnp.where(y > 0, y, 0.2 * y)
    y = conv(y, w2, b2, 2, 1)
    y = jnp.where(y > 0, y, 0.2 * y)
    y = conv(y, w3, b3, 1, 1)
    return jax.nn.sigmoid(y)


if __name__ == "__main__":
    key = jax.random.PRNGKey(0)
    kx, kp = jax.random.split(key)
    x = jax.random.normal(kx, (2, 1, 16, 16), dtype=jnp.float32)
    params = init_params(kp)

    fwd = jax.jit(boundary_discriminator)
    out = jax.block_until_ready(fwd(x, params))

    assert out.shape == (2, 1, 3, 3), out.shape
    assert out.dtype == jnp.float32
    assert bool(jnp.all((out >= 0.0) & (out <= 1.0)))        # sigmoid range

    ref = jax.block_until_ready(reference_forward(x, params))
    err = float(jnp.max(jnp.abs(out - ref)))
    assert err < 5e-2, f"max abs error vs XLA reference: {err}"
    print("KERNEL_OK")
</pallas_src>

<mosaic_0001>
module attributes {stable_mosaic.version = 11 : i64} {
  func.func @_fused_disc_kernel(%arg0: i32, %arg1: memref<1x64x16xbf16, #tpu.memory_space<vmem>>, %arg2: memref<16x64xbf16, #tpu.memory_space<vmem>>, %arg3: memref<1x64xf32, #tpu.memory_space<vmem>>, %arg4: memref<16x16x64xbf16, #tpu.memory_space<vmem>>, %arg5: memref<16x64x128xbf16, #tpu.memory_space<vmem>>, %arg6: memref<1x128xf32, #tpu.memory_space<vmem>>, %arg7: memref<16x9x16xbf16, #tpu.memory_space<vmem>>, %arg8: memref<16x128x128xbf16, #tpu.memory_space<vmem>>, %arg9: memref<1x128xf32, #tpu.memory_space<vmem>>, %arg10: memref<1x9x128xf32, #tpu.memory_space<vmem>>) attributes {dimension_semantics = [#tpu.dimension_semantics<parallel>], iteration_bounds = array<i64: 2>, scalar_prefetch = 0 : i64, scratch_operands = 0 : i64, tpu.core_type = #tpu.core_type<tc>, window_params = [{transform_indices = @transform_0, window_bounds = array<i64: 1, 64, 16>}, {pipeline_mode = #tpu.pipeline_mode<synchronous>, transform_indices = @transform_1, window_bounds = array<i64: 16, 64>}, {pipeline_mode = #tpu.pipeline_mode<synchronous>, transform_indices = @transform_2, window_bounds = array<i64: 1, 64>}, {pipeline_mode = #tpu.pipeline_mode<synchronous>, transform_indices = @transform_3, window_bounds = array<i64: 16, 16, 64>}, {pipeline_mode = #tpu.pipeline_mode<synchronous>, transform_indices = @transform_4, window_bounds = array<i64: 16, 64, 128>}, {pipeline_mode = #tpu.pipeline_mode<synchronous>, transform_indices = @transform_5, window_bounds = array<i64: 1, 128>}, {pipeline_mode = #tpu.pipeline_mode<synchronous>, transform_indices = @transform_6, window_bounds = array<i64: 16, 9, 16>}, {pipeline_mode = #tpu.pipeline_mode<synchronous>, transform_indices = @transform_7, window_bounds = array<i64: 16, 128, 128>}, {pipeline_mode = #tpu.pipeline_mode<synchronous>, transform_indices = @transform_8, window_bounds = array<i64: 1, 128>}, {transform_indices = @transform_9, window_bounds = array<i64: 1, 9, 128>}]} {
    %c0 = arith.constant 0 : index
    %c0_0 = arith.constant 0 : index
    %c0_1 = arith.constant 0 : index
    %0 = vector.load %arg1[%c0, %c0_0, %c0_1] : memref<1x64x16xbf16, #tpu.memory_space<vmem>>, vector<1x64x16xbf16>
    %1 = vector.shape_cast %0 : vector<1x64x16xbf16> to vector<64x16xbf16>
    %c0_2 = arith.constant 0 : index
    %c0_3 = arith.constant 0 : index
    %2 = vector.load %arg2[%c0_2, %c0_3] : memref<16x64xbf16, #tpu.memory_space<vmem>>, vector<16x64xbf16>
    %cst = arith.constant dense<0.000000e+00> : vector<64x64xf32>
    %3 = tpu.matmul %1, %2, %cst {dimension_numbers = #tpu.dot_dimension_numbers<[1], [0], [0], [1], [0, 0, 1, 1], [], []>} : vector<64x16xbf16>, vector<16x64xbf16>, vector<64x64xf32> -> vector<64x64xf32>
    %c0_4 = arith.constant 0 : index
    %c0_5 = arith.constant 0 : index
    %4 = vector.load %arg3[%c0_4, %c0_5] : memref<1x64xf32, #tpu.memory_space<vmem>>, vector<1x64xf32>
    %5 = vector.broadcast %4 : vector<1x64xf32> to vector<64x64xf32>
    %6 = arith.addf %3, %5 : vector<64x64xf32>
    %cst_6 = arith.constant 0.000000e+00 : f32
    %7 = vector.broadcast %cst_6 : f32 to vector<64x64xf32>
    %8 = arith.cmpf ogt, %6, %7 : vector<64x64xf32>
    %cst_7 = arith.constant 2.000000e-01 : f32
    %9 = vector.broadcast %cst_7 : f32 to vector<64x64xf32>
    %10 = arith.mulf %9, %6 : vector<64x64xf32>
    %11 = arith.select %8, %6, %10 : vector<64x64xi1>, vector<64x64xf32>
    %12 = arith.truncf %11 : vector<64x64xf32> to vector<64x64xbf16>
    %cst_8 = arith.constant 0.000000e+00 : f32
    %13 = vector.broadcast %cst_8 : f32 to vector<16x128xf32>
    %c0_9 = arith.constant 0 : index
    %c0_10 = arith.constant 0 : index
    %c0_11 = arith.constant 0 : index
    %14 = vector.load %arg4[%c0_9, %c0_10, %c0_11] : memref<16x16x64xbf16, #tpu.memory_space<vmem>>, vector<1x16x64xbf16>
    %15 = vector.shape_cast %14 : vector<1x16x64xbf16> to vector<16x64xbf16>
    %cst_12 = arith.constant dense<0.000000e+00> : vector<16x64xf32>
    %16 = tpu.matmul %15, %12, %cst_12 {dimension_numbers = #tpu.dot_dimension_numbers<[1], [0], [0], [1], [0, 0, 1, 1], [], []>} : vector<16x64xbf16>, vector<64x64xbf16>, vector<16x64xf32> -> vector<16x64xf32>
    %17 = arith.truncf %16 : vector<16x64xf32> to vector<16x64xbf16>
    %c0_13 = arith.constant 0 : index
    %c0_14 = arith.constant 0 : index
    %c0_15 = arith.constant 0 : index
    %18 = vector.load %arg5[%c0_13, %c0_14, %c0_15] : memref<16x64x128xbf16, #tpu.memory_space<vmem>>, vector<1x64x128xbf16>
    %19 = vector.shape_cast %18 : vector<1x64x128xbf16> to vector<64x128xbf16>
    %cst_16 = arith.constant dense<0.000000e+00> : vector<16x128xf32>
    %20 = tpu.matmul %17, %19, %cst_16 {dimension_numbers = #tpu.dot_dimension_numbers<[1], [0], [0], [1], [0, 0, 1, 1], [], []>} : vector<16x64xbf16>, vector<64x128xbf16>, vector<16x128xf32> -> vector<16x128xf32>
    %21 = arith.addf %13, %20 : vector<16x128xf32>
    %c1 = arith.constant 1 : index
    %c0_17 = arith.constant 0 : index
    %c0_18 = arith.constant 0 : index
    %22 = vector.load %arg4[%c1, %c0_17, %c0_18] : memref<16x16x64xbf16, #tpu.memory_space<vmem>>, vector<1x16x64xbf16>
    %23 = vector.shape_cast %22 : vector<1x16x64xbf16> to vector<16x64xbf16>
    %cst_19 = arith.constant dense<0.000000e+00> : vector<16x64xf32>
    %24 = tpu.matmul %23, %12, %cst_19 {dimension_numbers = #tpu.dot_dimension_numbers<[1], [0], [0], [1], [0, 0, 1, 1], [], []>} : vector<16x64xbf16>, vector<64x64xbf16>, vector<16x64xf32> -> vector<16x64xf32>
    %25 = arith.truncf %24 : vector<16x64xf32> to vector<16x64xbf16>
    %c1_20 = arith.constant 1 : index
    %c0_21 = arith.constant 0 : index
    %c0_22 = arith.constant 0 : index
    %26 = vector.load %arg5[%c1_20, %c0_21, %c0_22] : memref<16x64x128xbf16, #tpu.memory_space<vmem>>, vector<1x64x128xbf16>
    %27 = vector.shape_cast %26 : vector<1x64x128xbf16> to vector<64x128xbf16>
    %cst_23 = arith.constant dense<0.000000e+00> : vector<16x128xf32>
    %28 = tpu.matmul %25, %27, %cst_23 {dimension_numbers = #tpu.dot_dimension_numbers<[1], [0], [0], [1], [0, 0, 1, 1], [], []>} : vector<16x64xbf16>, vector<64x128xbf16>, vector<16x128xf32> -> vector<16x128xf32>
    %29 = arith.addf %21, %28 : vector<16x128xf32>
    %c2 = arith.constant 2 : index
    %c0_24 = arith.constant 0 : index
    %c0_25 = arith.constant 0 : index
    %30 = vector.load %arg4[%c2, %c0_24, %c0_25] : memref<16x16x64xbf16, #tpu.memory_space<vmem>>, vector<1x16x64xbf16>
    %31 = vector.shape_cast %30 : vector<1x16x64xbf16> to vector<16x64xbf16>
    %cst_26 = arith.constant dense<0.000000e+00> : vector<16x64xf32>
    %32 = tpu.matmul %31, %12, %cst_26 {dimension_numbers = #tpu.dot_dimension_numbers<[1], [0], [0], [1], [0, 0, 1, 1], [], []>} : vector<16x64xbf16>, vector<64x64xbf16>, vector<16x64xf32> -> vector<16x64xf32>
    %33 = arith.truncf %32 : vector<16x64xf32> to vector<16x64xbf16>
    %c2_27 = arith.constant 2 : index
    %c0_28 = arith.constant 0 : index
    %c0_29 = arith.constant 0 : index
    %34 = vector.load %arg5[%c2_27, %c0_28, %c0_29] : memref<16x64x128xbf16, #tpu.memory_space<vmem>>, vector<1x64x128xbf16>
    %35 = vector.shape_cast %34 : vector<1x64x128xbf16> to vector<64x128xbf16>
    %cst_30 = arith.constant dense<0.000000e+00> : vector<16x128xf32>
    %36 = tpu.matmul %33, %35, %cst_30 {dimension_numbers = #tpu.dot_dimension_numbers<[1], [0], [0], [1], [0, 0, 1, 1], [], []>} : vector<16x64xbf16>, vector<64x128xbf16>, vector<16x128xf32> -> vector<16x128xf32>
    %37 = arith.addf %29, %36 : vector<16x128xf32>
    %c3 = arith.constant 3 : index
    %c0_31 = arith.constant 0 : index
    %c0_32 = arith.constant 0 : index
    %38 = vector.load %arg4[%c3, %c0_31, %c0_32] : memref<16x16x64xbf16, #tpu.memory_space<vmem>>, vector<1x16x64xbf16>
    %39 = vector.shape_cast %38 : vector<1x16x64xbf16> to vector<16x64xbf16>
    %cst_33 = arith.constant dense<0.000000e+00> : vector<16x64xf32>
    %40 = tpu.matmul %39, %12, %cst_33 {dimension_numbers = #tpu.dot_dimension_numbers<[1], [0], [0], [1], [0, 0, 1, 1], [], []>} : vector<16x64xbf16>, vector<64x64xbf16>, vector<16x64xf32> -> vector<16x64xf32>
    %41 = arith.truncf %40 : vector<16x64xf32> to vector<16x64xbf16>
    %c3_34 = arith.constant 3 : index
    %c0_35 = arith.constant 0 : index
    %c0_36 = arith.constant 0 : index
    %42 = vector.load %arg5[%c3_34, %c0_35, %c0_36] : memref<16x64x128xbf16, #tpu.memory_space<vmem>>, vector<1x64x128xbf16>
    %43 = vector.shape_cast %42 : vector<1x64x128xbf16> to vector<64x128xbf16>
    %cst_37 = arith.constant dense<0.000000e+00> : vector<16x128xf32>
    %44 = tpu.matmul %41, %43, %cst_37 {dimension_numbers = #tpu.dot_dimension_numbers<[1], [0], [0], [1], [0, 0, 1, 1], [], []>} : vector<16x64xbf16>, vector<64x128xbf16>, vector<16x128xf32> -> vector<16x128xf32>
    %45 = arith.addf %37, %44 : vector<16x128xf32>
    %c4 = arith.constant 4 : index
    %c0_38 = arith.constant 0 : index
    %c0_39 = arith.constant 0 : index
    %46 = vector.load %arg4[%c4, %c0_38, %c0_39] : memref<16x16x64xbf16, #tpu.memory_space<vmem>>, vector<1x16x64xbf16>
    %47 = vector.shape_cast %46 : vector<1x16x64xbf16> to vector<16x64xbf16>
    %cst_40 = arith.constant dense<0.000000e+00> : vector<16x64xf32>
    %48 = tpu.matmul %47, %12, %cst_40 {dimension_numbers = #tpu.dot_dimension_numbers<[1], [0], [0], [1], [0, 0, 1, 1], [], []>} : vector<16x64xbf16>, vector<64x64xbf16>, vector<16x64xf32> -> vector<16x64xf32>
    %49 = arith.truncf %48 : vector<16x64xf32> to vector<16x64xbf16>
    %c4_41 = arith.constant 4 : index
    %c0_42 = arith.constant 0 : index
    %c0_43 = arith.constant 0 : index
    %50 = vector.load %arg5[%c4_41, %c0_42, %c0_43] : memref<16x64x128xbf16, #tpu.memory_space<vmem>>, vector<1x64x128xbf16>
    %51 = vector.shape_cast %50 : vector<1x64x128xbf16> to vector<64x128xbf16>
    %cst_44 = arith.constant dense<0.000000e+00> : vector<16x128xf32>
    %52 = tpu.matmul %49, %51, %cst_44 {dimension_numbers = #tpu.dot_dimension_numbers<[1], [0], [0], [1], [0, 0, 1, 1], [], []>} : vector<16x64xbf16>, vector<64x128xbf16>, vector<16x128xf32> -> vector<16x128xf32>
    %53 = arith.addf %45, %52 : vector<16x128xf32>
    %c5 = arith.constant 5 : index
    %c0_45 = arith.constant 0 : index
    %c0_46 = arith.constant 0 : index
    %54 = vector.load %arg4[%c5, %c0_45, %c0_46] : memref<16x16x64xbf16, #tpu.memory_space<vmem>>, vector<1x16x64xbf16>
    %55 = vector.shape_cast %54 : vector<1x16x64xbf16> to vector<16x64xbf16>
    %cst_47 = arith.constant dense<0.000000e+00> : vector<16x64xf32>
    %56 = tpu.matmul %55, %12, %cst_47 {dimension_numbers = #tpu.dot_dimension_numbers<[1], [0], [0], [1], [0, 0, 1, 1], [], []>} : vector<16x64xbf16>, vector<64x64xbf16>, vector<16x64xf32> -> vector<16x64xf32>
    %57 = arith.truncf %56 : vector<16x64xf32> to vector<16x64xbf16>
    %c5_48 = arith.constant 5 : index
    %c0_49 = arith.constant 0 : index
    %c0_50 = arith.constant 0 : index
    %58 = vector.load %arg5[%c5_48, %c0_49, %c0_50] : memref<16x64x128xbf16, #tpu.memory_space<vmem>>, vector<1x64x128xbf16>
    %59 = vector.shape_cast %58 : vector<1x64x128xbf16> to vector<64x128xbf16>
    %cst_51 = arith.constant dense<0.000000e+00> : vector<16x128xf32>
    %60 = tpu.matmul %57, %59, %cst_51 {dimension_numbers = #tpu.dot_dimension_numbers<[1], [0], [0], [1], [0, 0, 1, 1], [], []>} : vector<16x64xbf16>, vector<64x128xbf16>, vector<16x128xf32> -> vector<16x128xf32>
    %61 = arith.addf %53, %60 : vector<16x128xf32>
    %c6 = arith.constant 6 : index
    %c0_52 = arith.constant 0 : index
    %c0_53 = arith.constant 0 : index
    %62 = vector.load %arg4[%c6, %c0_52, %c0_53] : memref<16x16x64xbf16, #tpu.memory_space<vmem>>, vector<1x16x64xbf16>
    %63 = vector.shape_cast %62 : vector<1x16x64xbf16> to vector<16x64xbf16>
    %cst_54 = arith.constant dense<0.000000e+00> : vector<16x64xf32>
    %64 = tpu.matmul %63, %12, %cst_54 {dimension_numbers = #tpu.dot_dimension_numbers<[1], [0], [0], [1], [0, 0, 1, 1], [], []>} : vector<16x64xbf16>, vector<64x64xbf16>, vector<16x64xf32> -> vector<16x64xf32>
    %65 = arith.truncf %64 : vector<16x64xf32> to vector<16x64xbf16>
    %c6_55 = arith.constant 6 : index
    %c0_56 = arith.constant 0 : index
    %c0_57 = arith.constant 0 : index
    %66 = vector.load %arg5[%c6_55, %c0_56, %c0_57] : memref<16x64x128xbf16, #tpu.memory_space<vmem>>, vector<1x64x128xbf16>
    %67 = vector.shape_cast %66 : vector<1x64x128xbf16> to vector<64x128xbf16>
    %cst_58 = arith.constant dense<0.000000e+00> : vector<16x128xf32>
    %68 = tpu.matmul %65, %67, %cst_58 {dimension_numbers = #tpu.dot_dimension_numbers<[1], [0], [0], [1], [0, 0, 1, 1], [], []>} : vector<16x64xbf16>, vector<64x128xbf16>, vector<16x128xf32> -> vector<16x128xf32>
    %69 = arith.addf %61, %68 : vector<16x128xf32>
    %c7 = arith.constant 7 : index
    %c0_59 = arith.constant 0 : index
    %c0_60 = arith.constant 0 : index
    %70 = vector.load %arg4[%c7, %c0_59, %c0_60] : memref<16x16x64xbf16, #tpu.memory_space<vmem>>, vector<1x16x64xbf16>
    %71 = vector.shape_cast %70 : vector<1x16x64xbf16> to vector<16x64xbf16>
    %cst_61 = arith.constant dense<0.000000e+00> : vector<16x64xf32>
    %72 = tpu.matmul %71, %12, %cst_61 {dimension_numbers = #tpu.dot_dimension_numbers<[1], [0], [0], [1], [0, 0, 1, 1], [], []>} : vector<16x64xbf16>, vector<64x64xbf16>, vector<16x64xf32> -> vector<16x64xf32>
    %73 = arith.truncf %72 : vector<16x64xf32> to vector<16x64xbf16>
    %c7_62 = arith.constant 7 : index
    %c0_63 = arith.constant 0 : index
    %c0_64 = arith.constant 0 : index
    %74 = vector.load %arg5[%c7_62, %c0_63, %c0_64] : memref<16x64x128xbf16, #tpu.memory_space<vmem>>, vector<1x64x128xbf16>
    %75 = vector.shape_cast %74 : vector<1x64x128xbf16> to vector<64x128xbf16>
    %cst_65 = arith.constant dense<0.000000e+00> : vector<16x128xf32>
    %76 = tpu.matmul %73, %75, %cst_65 {dimension_numbers = #tpu.dot_dimension_numbers<[1], [0], [0], [1], [0, 0, 1, 1], [], []>} : vector<16x64xbf16>, vector<64x128xbf16>, vector<16x128xf32> -> vector<16x128xf32>
    %77 = arith.addf %69, %76 : vector<16x128xf32>
    %c8 = arith.constant 8 : index
    %c0_66 = arith.constant 0 : index
    %c0_67 = arith.constant 0 : index
    %78 = vector.load %arg4[%c8, %c0_66, %c0_67] : memref<16x16x64xbf16, #tpu.memory_space<vmem>>, vector<1x16x64xbf16>
    %79 = vector.shape_cast %78 : vector<1x16x64xbf16> to vector<16x64xbf16>
    %cst_68 = arith.constant dense<0.000000e+00> : vector<16x64xf32>
    %80 = tpu.matmul %79, %12, %cst_68 {dimension_numbers = #tpu.dot_dimension_numbers<[1], [0], [0], [1], [0, 0, 1, 1], [], []>} : vector<16x64xbf16>, vector<64x64xbf16>, vector<16x64xf32> -> vector<16x64xf32>
    %81 = arith.truncf %80 : vector<16x64xf32> to vector<16x64xbf16>
    %c8_69 = arith.constant 8 : index
    %c0_70 = arith.constant 0 : index
    %c0_71 = arith.constant 0 : index
    %82 = vector.load %arg5[%c8_69, %c0_70, %c0_71] : memref<16x64x128xbf16, #tpu.memory_space<vmem>>, vector<1x64x128xbf16>
    %83 = vector.shape_cast %82 : vector<1x64x128xbf16> to vector<64x128xbf16>
    %cst_72 = arith.constant dense<0.000000e+00> : vector<16x128xf32>
    %84 = tpu.matmul %81, %83, %cst_72 {dimension_numbers = #tpu.dot_dimension_numbers<[1], [0], [0], [1], [0, 0, 1, 1], [], []>} : vector<16x64xbf16>, vector<64x128xbf16>, vector<16x128xf32> -> vector<16x128xf32>
    %85 = arith.addf %77, %84 : vector<16x128xf32>
    %c9 = arith.constant 9 : index
    %c0_73 = arith.constant 0 : index
    %c0_74 = arith.constant 0 : index
    %86 = vector.load %arg4[%c9, %c0_73, %c0_74] : memref<16x16x64xbf16, #tpu.memory_space<vmem>>, vector<1x16x64xbf16>
    %87 = vector.shape_cast %86 : vector<1x16x64xbf16> to vector<16x64xbf16>
    %cst_75 = arith.constant dense<0.000000e+00> : vector<16x64xf32>
    %88 = tpu.matmul %87, %12, %cst_75 {dimension_numbers = #tpu.dot_dimension_numbers<[1], [0], [0], [1], [0, 0, 1, 1], [], []>} : vector<16x64xbf16>, vector<64x64xbf16>, vector<16x64xf32> -> vector<16x64xf32>
    %89 = arith.truncf %88 : vector<16x64xf32> to vector<16x64xbf16>
    %c9_76 = arith.constant 9 : index
    %c0_77 = arith.constant 0 : index
    %c0_78 = arith.constant 0 : index
    %90 = vector.load %arg5[%c9_76, %c0_77, %c0_78] : memref<16x64x128xbf16, #tpu.memory_space<vmem>>, vector<1x64x128xbf16>
    %91 = vector.shape_cast %90 : vector<1x64x128xbf16> to vector<64x128xbf16>
    %cst_79 = arith.constant dense<0.000000e+00> : vector<16x128xf32>
    %92 = tpu.matmul %89, %91, %cst_79 {dimension_numbers = #tpu.dot_dimension_numbers<[1], [0], [0], [1], [0, 0, 1, 1], [], []>} : vector<16x64xbf16>, vector<64x128xbf16>, vector<16x128xf32> -> vector<16x128xf32>
    %93 = arith.addf %85, %92 : vector<16x128xf32>
    %c10 = arith.constant 10 : index
    %c0_80 = arith.constant 0 : index
    %c0_81 = arith.constant 0 : index
    %94 = vector.load %arg4[%c10, %c0_80, %c0_81] : memref<16x16x64xbf16, #tpu.memory_space<vmem>>, vector<1x16x64xbf16>
    %95 = vector.shape_cast %94 : vector<1x16x64xbf16> to vector<16x64xbf16>
    %cst_82 = arith.constant dense<0.000000e+00> : vector<16x64xf32>
    %96 = tpu.matmul %95, %12, %cst_82 {dimension_numbers = #tpu.dot_dimension_numbers<[1], [0], [0], [1], [0, 0, 1, 1], [], []>} : vector<16x64xbf16>, vector<64x64xbf16>, vector<16x64xf32> -> vector<16x64xf32>
    %97 = arith.truncf %96 : vector<16x64xf32> to vector<16x64xbf16>
    %c10_83 = arith.constant 10 : index
    %c0_84 = arith.constant 0 : index
    %c0_85 = arith.constant 0 : index
    %98 = vector.load %arg5[%c10_83, %c0_84, %c0_85] : memref<16x64x128xbf16, #tpu.memory_space<vmem>>, vector<1x64x128xbf16>
    %99 = vector.shape_cast %98 : vector<1x64x128xbf16> to vector<64x128xbf16>
    %cst_86 = arith.constant dense<0.000000e+00> : vector<16x128xf32>
    %100 = tpu.matmul %97, %99, %cst_86 {dimension_numbers = #tpu.dot_dimension_numbers<[1], [0], [0], [1], [0, 0, 1, 1], [], []>} : vector<16x64xbf16>, vector<64x128xbf16>, vector<16x128xf32> -> vector<16x128xf32>
    %101 = arith.addf %93, %100 : vector<16x128xf32>
    %c11 = arith.constant 11 : index
    %c0_87 = arith.constant 0 : index
    %c0_88 = arith.constant 0 : index
    %102 = vector.load %arg4[%c11, %c0_87, %c0_88] : memref<16x16x64xbf16, #tpu.memory_space<vmem>>, vector<1x16x64xbf16>
    %103 = vector.shape_cast %102 : vector<1x16x64xbf16> to vector<16x64xbf16>
    %cst_89 = arith.constant dense<0.000000e+00> : vector<16x64xf32>
    %104 = tpu.matmul %103, %12, %cst_89 {dimension_numbers = #tpu.dot_dimension_numbers<[1], [0], [0], [1], [0, 0, 1, 1], [], []>} : vector<16x64xbf16>, vector<64x64xbf16>, vector<16x64xf32> -> vector<16x64xf32>
    %105 = arith.truncf %104 : vector<16x64xf32> to vector<16x64xbf16>
    %c11_90 = arith.constant 11 : index
    %c0_91 = arith.constant 0 : index
    %c0_92 = arith.constant 0 : index
    %106 = vector.load %arg5[%c11_90, %c0_91, %c0_92] : memref<16x64x128xbf16, #tpu.memory_space<vmem>>, vector<1x64x128xbf16>
    %107 = vector.shape_cast %106 : vector<1x64x128xbf16> to vector<64x128xbf16>
    %cst_93 = arith.constant dense<0.000000e+00> : vector<16x128xf32>
    %108 = tpu.matmul %105, %107, %cst_93 {dimension_numbers = #tpu.dot_dimension_numbers<[1], [0], [0], [1], [0, 0, 1, 1], [], []>} : vector<16x64xbf16>, vector<64x128xbf16>, vector<16x128xf32> -> vector<16x128xf32>
    %109 = arith.addf %101, %108 : vector<16x128xf32>
    %c12 = arith.constant 12 : index
    %c0_94 = arith.constant 0 : index
    %c0_95 = arith.constant 0 : index
    %110 = vector.load %arg4[%c12, %c0_94, %c0_95] : memref<16x16x64xbf16, #tpu.memory_space<vmem>>, vector<1x16x64xbf16>
    %111 = vector.shape_cast %110 : vector<1x16x64xbf16> to vector<16x64xbf16>
    %cst_96 = arith.constant dense<0.000000e+00> : vector<16x64xf32>
    %112 = tpu.matmul %111, %12, %cst_96 {dimension_numbers = #tpu.dot_dimension_numbers<[1], [0], [0], [1], [0, 0, 1, 1], [], []>} : vector<16x64xbf16>, vector<64x64xbf16>, vector<16x64xf32> -> vector<16x64xf32>
    %113 = arith.truncf %112 : vector<16x64xf32> to vector<16x64xbf16>
    %c12_97 = arith.constant 12 : index
    %c0_98 = arith.constant 0 : index
    %c0_99 = arith.constant 0 : index
    %114 = vector.load %arg5[%c12_97, %c0_98, %c0_99] : memref<16x64x128xbf16, #tpu.memory_space<vmem>>, vector<1x64x128xbf16>
    %115 = vector.shape_cast %114 : vector<1x64x128xbf16> to vector<64x128xbf16>
    %cst_100 = arith.constant dense<0.000000e+00> : vector<16x128xf32>
    %116 = tpu.matmul %113, %115, %cst_100 {dimension_numbers = #tpu.dot_dimension_numbers<[1], [0], [0], [1], [0, 0, 1, 1], [], []>} : vector<16x64xbf16>, vector<64x128xbf16>, vector<16x128xf32> -> vector<16x128xf32>
    %117 = arith.addf %109, %116 : vector<16x128xf32>
    %c13 = arith.constant 13 : index
    %c0_101 = arith.constant 0 : index
    %c0_102 = arith.constant 0 : index
    %118 = vector.load %arg4[%c13, %c0_101, %c0_102] : memref<16x16x64xbf16, #tpu.memory_space<vmem>>, vector<1x16x64xbf16>
    %119 = vector.shape_cast %118 : vector<1x16x64xbf16> to vector<16x64xbf16>
    %cst_103 = arith.constant dense<0.000000e+00> : vector<16x64xf32>
    %120 = tpu.matmul %119, %12, %cst_103 {dimension_numbers = #tpu.dot_dimension_numbers<[1], [0], [0], [1], [0, 0, 1, 1], [], []>} : vector<16x64xbf16>, vector<64x64xbf16>, vector<16x64xf32> -> vector<16x64xf32>
    %121 = arith.truncf %120 : vector<16x64xf32> to vector<16x64xbf16>
    %c13_104 = arith.constant 13 : index
    %c0_105 = arith.constant 0 : index
    %c0_106 = arith.constant 0 : index
    %122 = vector.load %arg5[%c13_104, %c0_105, %c0_106] : memref<16x64x128xbf16, #tpu.memory_space<vmem>>, vector<1x64x128xbf16>
    %123 = vector.shape_cast %122 : vector<1x64x128xbf16> to vector<64x128xbf16>
    %cst_107 = arith.constant dense<0.000000e+00> : vector<16x128xf32>
    %124 = tpu.matmul %121, %123, %cst_107 {dimension_numbers = #tpu.dot_dimension_numbers<[1], [0], [0], [1], [0, 0, 1, 1], [], []>} : vector<16x64xbf16>, vector<64x128xbf16>, vector<16x128xf32> -> vector<16x128xf32>
    %125 = arith.addf %117, %124 : vector<16x128xf32>
    %c14 = arith.constant 14 : index
    %c0_108 = arith.constant 0 : index
    %c0_109 = arith.constant 0 : index
    %126 = vector.load %arg4[%c14, %c0_108, %c0_109] : memref<16x16x64xbf16, #tpu.memory_space<vmem>>, vector<1x16x64xbf16>
    %127 = vector.shape_cast %126 : vector<1x16x64xbf16> to vector<16x64xbf16>
    %cst_110 = arith.constant dense<0.000000e+00> : vector<16x64xf32>
    %128 = tpu.matmul %127, %12, %cst_110 {dimension_numbers = #tpu.dot_dimension_numbers<[1], [0], [0], [1], [0, 0, 1, 1], [], []>} : vector<16x64xbf16>, vector<64x64xbf16>, vector<16x64xf32> -> vector<16x64xf32>
    %129 = arith.truncf %128 : vector<16x64xf32> to vector<16x64xbf16>
    %c14_111 = arith.constant 14 : index
    %c0_112 = arith.constant 0 : index
    %c0_113 = arith.constant 0 : index
    %130 = vector.load %arg5[%c14_111, %c0_112, %c0_113] : memref<16x64x128xbf16, #tpu.memory_space<vmem>>, vector<1x64x128xbf16>
    %131 = vector.shape_cast %130 : vector<1x64x128xbf16> to vector<64x128xbf16>
    %cst_114 = arith.constant dense<0.000000e+00> : vector<16x128xf32>
    %132 = tpu.matmul %129, %131, %cst_114 {dimension_numbers = #tpu.dot_dimension_numbers<[1], [0], [0], [1], [0, 0, 1, 1], [], []>} : vector<16x64xbf16>, vector<64x128xbf16>, vector<16x128xf32> -> vector<16x128xf32>
    %133 = arith.addf %125, %132 : vector<16x128xf32>
    %c15 = arith.constant 15 : index
    %c0_115 = arith.constant 0 : index
    %c0_116 = arith.constant 0 : index
    %134 = vector.load %arg4[%c15, %c0_115, %c0_116] : memref<16x16x64xbf16, #tpu.memory_space<vmem>>, vector<1x16x64xbf16>
    %135 = vector.shape_cast %134 : vector<1x16x64xbf16> to vector<16x64xbf16>
    %cst_117 = arith.constant dense<0.000000e+00> : vector<16x64xf32>
    %136 = tpu.matmul %135, %12, %cst_117 {dimension_numbers = #tpu.dot_dimension_numbers<[1], [0], [0], [1], [0, 0, 1, 1], [], []>} : vector<16x64xbf16>, vector<64x64xbf16>, vector<16x64xf32> -> vector<16x64xf32>
    %137 = arith.truncf %136 : vector<16x64xf32> to vector<16x64xbf16>
    %c15_118 = arith.constant 15 : index
    %c0_119 = arith.constant 0 : index
    %c0_120 = arith.constant 0 : index
    %138 = vector.load %arg5[%c15_118, %c0_119, %c0_120] : memref<16x64x128xbf16, #tpu.memory_space<vmem>>, vector<1x64x128xbf16>
    %139 = vector.shape_cast %138 : vector<1x64x128xbf16> to vector<64x128xbf16>
    %cst_121 = arith.constant dense<0.000000e+00> : vector<16x128xf32>
    %140 = tpu.matmul %137, %139, %cst_121 {dimension_numbers = #tpu.dot_dimension_numbers<[1], [0], [0], [1], [0, 0, 1, 1], [], []>} : vector<16x64xbf16>, vector<64x128xbf16>, vector<16x128xf32> -> vector<16x128xf32>
    %141 = arith.addf %133, %140 : vector<16x128xf32>
    %c0_122 = arith.constant 0 : index
    %c0_123 = arith.constant 0 : index
    %142 = vector.load %arg6[%c0_122, %c0_123] : memref<1x128xf32, #tpu.memory_space<vmem>>, vector<1x128xf32>
    %143 = vector.broadcast %142 : vector<1x128xf32> to vector<16x128xf32>
    %144 = arith.addf %141, %143 : vector<16x128xf32>
    %cst_124 = arith.constant 0.000000e+00 : f32
    %145 = vector.broadcast %cst_124 : f32 to vector<16x128xf32>
    %146 = arith.cmpf ogt, %144, %145 : vector<16x128xf32>
    %cst_125 = arith.constant 2.000000e-01 : f32
    %147 = vector.broadcast %cst_125 : f32 to vector<16x128xf32>
    %148 = arith.mulf %147, %144 : vector<16x128xf32>
    %149 = arith.select %146, %144, %148 : vector<16x128xi1>, vector<16x128xf32>
    %150 = arith.truncf %149 : vector<16x128xf32> to vector<16x128xbf16>
    %cst_126 = arith.constant 0.000000e+00 : f32
    %151 = vector.broadcast %cst_126 : f32 to vector<9x128xf32>
    %c0_127 = arith.constant 0 : index
    %c0_128 = arith.constant 0 : index
    %c0_129 = arith.constant 0 : index
    %152 = vector.load %arg7[%c0_127, %c0_128, %c0_129] : memref<16x9x16xbf16, #tpu.memory_space<vmem>>, vector<1x9x16xbf16>
    %153 = vector.shape_cast %152 : vector<1x9x16xbf16> to vector<9x16xbf16>
    %cst_130 = arith.constant dense<0.000000e+00> : vector<9x128xf32>
    %154 = tpu.matmul %153, %150, %cst_130 {dimension_numbers = #tpu.dot_dimension_numbers<[1], [0], [0], [1], [0, 0, 1, 1], [], []>} : vector<9x16xbf16>, vector<16x128xbf16>, vector<9x128xf32> -> vector<9x128xf32>
    %155 = arith.truncf %154 : vector<9x128xf32> to vector<9x128xbf16>
    %c0_131 = arith.constant 0 : index
    %c0_132 = arith.constant 0 : index
    %c0_133 = arith.constant 0 : index
    %156 = vector.load %arg8[%c0_131, %c0_132, %c0_133] : memref<16x128x128xbf16, #tpu.memory_space<vmem>>, vector<1x128x128xbf16>
    %157 = vector.shape_cast %156 : vector<1x128x128xbf16> to vector<128x128xbf16>
    %cst_134 = arith.constant dense<0.000000e+00> : vector<9x128xf32>
    %158 = tpu.matmul %155, %157, %cst_134 {dimension_numbers = #tpu.dot_dimension_numbers<[1], [0], [0], [1], [0, 0, 1, 1], [], []>} : vector<9x128xbf16>, vector<128x128xbf16>, vector<9x128xf32> -> vector<9x128xf32>
    %159 = arith.addf %151, %158 : vector<9x128xf32>
    %c1_135 = arith.constant 1 : index
    %c0_136 = arith.constant 0 : index
    %c0_137 = arith.constant 0 : index
    %160 = vector.load %arg7[%c1_135, %c0_136, %c0_137] : memref<16x9x16xbf16, #tpu.memory_space<vmem>>, vector<1x9x16xbf16>
    %161 = vector.shape_cast %160 : vector<1x9x16xbf16> to vector<9x16xbf16>
    %cst_138 = arith.constant dense<0.000000e+00> : vector<9x128xf32>
    %162 = tpu.matmul %161, %150, %cst_138 {dimension_numbers = #tpu.dot_dimension_numbers<[1], [0], [0], [1], [0, 0, 1, 1], [], []>} : vector<9x16xbf16>, vector<16x128xbf16>, vector<9x128xf32> -> vector<9x128xf32>
    %163 = arith.truncf %162 : vector<9x128xf32> to vector<9x128xbf16>
    %c1_139 = arith.constant 1 : index
    %c0_140 = arith.constant 0 : index
    %c0_141 = arith.constant 0 : index
    %164 = vector.load %arg8[%c1_139, %c0_140, %c0_141] : memref<16x128x128xbf16, #tpu.memory_space<vmem>>, vector<1x128x128xbf16>
    %165 = vector.shape_cast %164 : vector<1x128x128xbf16> to vector<128x128xbf16>
    %cst_142 = arith.constant dense<0.000000e+00> : vector<9x128xf32>
    %166 = tpu.matmul %163, %165, %cst_142 {dimension_numbers = #tpu.dot_dimension_numbers<[1], [0], [0], [1], [0, 0, 1, 1], [], []>} : vector<9x128xbf16>, vector<128x128xbf16>, vector<9x128xf32> -> vector<9x128xf32>
    %167 = arith.addf %159, %166 : vector<9x128xf32>
    %c2_143 = arith.constant 2 : index
    %c0_144 = arith.constant 0 : index
    %c0_145 = arith.constant 0 : index
    %168 = vector.load %arg7[%c2_143, %c0_144, %c0_145] : memref<16x9x16xbf16, #tpu.memory_space<vmem>>, vector<1x9x16xbf16>
    %169 = vector.shape_cast %168 : vector<1x9x16xbf16> to vector<9x16xbf16>
    %cst_146 = arith.constant dense<0.000000e+00> : vector<9x128xf32>
    %170 = tpu.matmul %169, %150, %cst_146 {dimension_numbers = #tpu.dot_dimension_numbers<[1], [0], [0], [1], [0, 0, 1, 1], [], []>} : vector<9x16xbf16>, vector<16x128xbf16>, vector<9x128xf32> -> vector<9x128xf32>
    %171 = arith.truncf %170 : vector<9x128xf32> to vector<9x128xbf16>
    %c2_147 = arith.constant 2 : index
    %c0_148 = arith.constant 0 : index
    %c0_149 = arith.constant 0 : index
    %172 = vector.load %arg8[%c2_147, %c0_148, %c0_149] : memref<16x128x128xbf16, #tpu.memory_space<vmem>>, vector<1x128x128xbf16>
    %173 = vector.shape_cast %172 : vector<1x128x128xbf16> to vector<128x128xbf16>
    %cst_150 = arith.constant dense<0.000000e+00> : vector<9x128xf32>
    %174 = tpu.matmul %171, %173, %cst_150 {dimension_numbers = #tpu.dot_dimension_numbers<[1], [0], [0], [1], [0, 0, 1, 1], [], []>} : vector<9x128xbf16>, vector<128x128xbf16>, vector<9x128xf32> -> vector<9x128xf32>
    %175 = arith.addf %167, %174 : vector<9x128xf32>
    %c3_151 = arith.constant 3 : index
    %c0_152 = arith.constant 0 : index
    %c0_153 = arith.constant 0 : index
    %176 = vector.load %arg7[%c3_151, %c0_152, %c0_153] : memref<16x9x16xbf16, #tpu.memory_space<vmem>>, vector<1x9x16xbf16>
    %177 = vector.shape_cast %176 : vector<1x9x16xbf16> to vector<9x16xbf16>
    %cst_154 = arith.constant dense<0.000000e+00> : vector<9x128xf32>
    %178 = tpu.matmul %177, %150, %cst_154 {dimension_numbers = #tpu.dot_dimension_numbers<[1], [0], [0], [1], [0, 0, 1, 1], [], []>} : vector<9x16xbf16>, vector<16x128xbf16>, vector<9x128xf32> -> vector<9x128xf32>
    %179 = arith.truncf %178 : vector<9x128xf32> to vector<9x128xbf16>
    %c3_155 = arith.constant 3 : index
    %c0_156 = arith.constant 0 : index
    %c0_157 = arith.constant 0 : index
    %180 = vector.load %arg8[%c3_155, %c0_156, %c0_157] : memref<16x128x128xbf16, #tpu.memory_space<vmem>>, vector<1x128x128xbf16>
    %181 = vector.shape_cast %180 : vector<1x128x128xbf16> to vector<128x128xbf16>
    %cst_158 = arith.constant dense<0.000000e+00> : vector<9x128xf32>
    %182 = tpu.matmul %179, %181, %cst_158 {dimension_numbers = #tpu.dot_dimension_numbers<[1], [0], [0], [1], [0, 0, 1, 1], [], []>} : vector<9x128xbf16>, vector<128x128xbf16>, vector<9x128xf32> -> vector<9x128xf32>
    %183 = arith.addf %175, %182 : vector<9x128xf32>
    %c4_159 = arith.constant 4 : index
    %c0_160 = arith.constant 0 : index
    %c0_161 = arith.constant 0 : index
    %184 = vector.load %arg7[%c4_159, %c0_160, %c0_161] : memref<16x9x16xbf16, #tpu.memory_space<vmem>>, vector<1x9x16xbf16>
    %185 = vector.shape_cast %184 : vector<1x9x16xbf16> to vector<9x16xbf16>
    %cst_162 = arith.constant dense<0.000000e+00> : vector<9x128xf32>
    %186 = tpu.matmul %185, %150, %cst_162 {dimension_numbers = #tpu.dot_dimension_numbers<[1], [0], [0], [1], [0, 0, 1, 1], [], []>} : vector<9x16xbf16>, vector<16x128xbf16>, vector<9x128xf32> -> vector<9x128xf32>
    %187 = arith.truncf %186 : vector<9x128xf32> to vector<9x128xbf16>
    %c4_163 = arith.constant 4 : index
    %c0_164 = arith.constant 0 : index
    %c0_165 = arith.constant 0 : index
    %188 = vector.load %arg8[%c4_163, %c0_164, %c0_165] : memref<16x128x128xbf16, #tpu.memory_space<vmem>>, vector<1x128x128xbf16>
    %189 = vector.shape_cast %188 : vector<1x128x128xbf16> to vector<128x128xbf16>
    %cst_166 = arith.constant dense<0.000000e+00> : vector<9x128xf32>
    %190 = tpu.matmul %187, %189, %cst_166 {dimension_numbers = #tpu.dot_dimension_numbers<[1], [0], [0], [1], [0, 0, 1, 1], [], []>} : vector<9x128xbf16>, vector<128x128xbf16>, vector<9x128xf32> -> vector<9x128xf32>
    %191 = arith.addf %183, %190 : vector<9x128xf32>
    %c5_167 = arith.constant 5 : index
    %c0_168 = arith.constant 0 : index
    %c0_169 = arith.constant 0 : index
    %192 = vector.load %arg7[%c5_167, %c0_168, %c0_169] : memref<16x9x16xbf16, #tpu.memory_space<vmem>>, vector<1x9x16xbf16>
    %193 = vector.shape_cast %192 : vector<1x9x16xbf16> to vector<9x16xbf16>
    %cst_170 = arith.constant dense<0.000000e+00> : vector<9x128xf32>
    %194 = tpu.matmul %193, %150, %cst_170 {dimension_numbers = #tpu.dot_dimension_numbers<[1], [0], [0], [1], [0, 0, 1, 1], [], []>} : vector<9x16xbf16>, vector<16x128xbf16>, vector<9x128xf32> -> vector<9x128xf32>
    %195 = arith.truncf %194 : vector<9x128xf32> to vector<9x128xbf16>
    %c5_171 = arith.constant 5 : index
    %c0_172 = arith.constant 0 : index
    %c0_173 = arith.constant 0 : index
    %196 = vector.load %arg8[%c5_171, %c0_172, %c0_173] : memref<16x128x128xbf16, #tpu.memory_space<vmem>>, vector<1x128x128xbf16>
    %197 = vector.shape_cast %196 : vector<1x128x128xbf16> to vector<128x128xbf16>
    %cst_174 = arith.constant dense<0.000000e+00> : vector<9x128xf32>
    %198 = tpu.matmul %195, %197, %cst_174 {dimension_numbers = #tpu.dot_dimension_numbers<[1], [0], [0], [1], [0, 0, 1, 1], [], []>} : vector<9x128xbf16>, vector<128x128xbf16>, vector<9x128xf32> -> vector<9x128xf32>
    %199 = arith.addf %191, %198 : vector<9x128xf32>
    %c6_175 = arith.constant 6 : index
    %c0_176 = arith.constant 0 : index
    %c0_177 = arith.constant 0 : index
    %200 = vector.load %arg7[%c6_175, %c0_176, %c0_177] : memref<16x9x16xbf16, #tpu.memory_space<vmem>>, vector<1x9x16xbf16>
    %201 = vector.shape_cast %200 : vector<1x9x16xbf16> to vector<9x16xbf16>
    %cst_178 = arith.constant dense<0.000000e+00> : vector<9x128xf32>
    %202 = tpu.matmul %201, %150, %cst_178 {dimension_numbers = #tpu.dot_dimension_numbers<[1], [0], [0], [1], [0, 0, 1, 1], [], []>} : vector<9x16xbf16>, vector<16x128xbf16>, vector<9x128xf32> -> vector<9x128xf32>
    %203 = arith.truncf %202 : vector<9x128xf32> to vector<9x128xbf16>
    %c6_179 = arith.constant 6 : index
    %c0_180 = arith.constant 0 : index
    %c0_181 = arith.constant 0 : index
    %204 = vector.load %arg8[%c6_179, %c0_180, %c0_181] : memref<16x128x128xbf16, #tpu.memory_space<vmem>>, vector<1x128x128xbf16>
    %205 = vector.shape_cast %204 : vector<1x128x128xbf16> to vector<128x128xbf16>
    %cst_182 = arith.constant dense<0.000000e+00> : vector<9x128xf32>
    %206 = tpu.matmul %203, %205, %cst_182 {dimension_numbers = #tpu.dot_dimension_numbers<[1], [0], [0], [1], [0, 0, 1, 1], [], []>} : vector<9x128xbf16>, vector<128x128xbf16>, vector<9x128xf32> -> vector<9x128xf32>
    %207 = arith.addf %199, %206 : vector<9x128xf32>
    %c7_183 = arith.constant 7 : index
    %c0_184 = arith.constant 0 : index
    %c0_185 = arith.constant 0 : index
    %208 = vector.load %arg7[%c7_183, %c0_184, %c0_185] : memref<16x9x16xbf16, #tpu.memory_space<vmem>>, vector<1x9x16xbf16>
    %209 = vector.shape_cast %208 : vector<1x9x16xbf16> to vector<9x16xbf16>
    %cst_186 = arith.constant dense<0.000000e+00> : vector<9x128xf32>
    %210 = tpu.matmul %209, %150, %cst_186 {dimension_numbers = #tpu.dot_dimension_numbers<[1], [0], [0], [1], [0, 0, 1, 1], [], []>} : vector<9x16xbf16>, vector<16x128xbf16>, vector<9x128xf32> -> vector<9x128xf32>
    %211 = arith.truncf %210 : vector<9x128xf32> to vector<9x128xbf16>
    %c7_187 = arith.constant 7 : index
    %c0_188 = arith.constant 0 : index
    %c0_189 = arith.constant 0 : index
    %212 = vector.load %arg8[%c7_187, %c0_188, %c0_189] : memref<16x128x128xbf16, #tpu.memory_space<vmem>>, vector<1x128x128xbf16>
    %213 = vector.shape_cast %212 : vector<1x128x128xbf16> to vector<128x128xbf16>
    %cst_190 = arith.constant dense<0.000000e+00> : vector<9x128xf32>
    %214 = tpu.matmul %211, %213, %cst_190 {dimension_numbers = #tpu.dot_dimension_numbers<[1], [0], [0], [1], [0, 0, 1, 1], [], []>} : vector<9x128xbf16>, vector<128x128xbf16>, vector<9x128xf32> -> vector<9x128xf32>
    %215 = arith.addf %207, %214 : vector<9x128xf32>
    %c8_191 = arith.constant 8 : index
    %c0_192 = arith.constant 0 : index
    %c0_193 = arith.constant 0 : index
    %216 = vector.load %arg7[%c8_191, %c0_192, %c0_193] : memref<16x9x16xbf16, #tpu.memory_space<vmem>>, vector<1x9x16xbf16>
    %217 = vector.shape_cast %216 : vector<1x9x16xbf16> to vector<9x16xbf16>
    %cst_194 = arith.constant dense<0.000000e+00> : vector<9x128xf32>
    %218 = tpu.matmul %217, %150, %cst_194 {dimension_numbers = #tpu.dot_dimension_numbers<[1], [0], [0], [1], [0, 0, 1, 1], [], []>} : vector<9x16xbf16>, vector<16x128xbf16>, vector<9x128xf32> -> vector<9x128xf32>
    %219 = arith.truncf %218 : vector<9x128xf32> to vector<9x128xbf16>
    %c8_195 = arith.constant 8 : index
    %c0_196 = arith.constant 0 : index
    %c0_197 = arith.constant 0 : index
    %220 = vector.load %arg8[%c8_195, %c0_196, %c0_197] : memref<16x128x128xbf16, #tpu.memory_space<vmem>>, vector<1x128x128xbf16>
    %221 = vector.shape_cast %220 : vector<1x128x128xbf16> to vector<128x128xbf16>
    %cst_198 = arith.constant dense<0.000000e+00> : vector<9x128xf32>
    %222 = tpu.matmul %219, %221, %cst_198 {dimension_numbers = #tpu.dot_dimension_numbers<[1], [0], [0], [1], [0, 0, 1, 1], [], []>} : vector<9x128xbf16>, vector<128x128xbf16>, vector<9x128xf32> -> vector<9x128xf32>
    %223 = arith.addf %215, %222 : vector<9x128xf32>
    %c9_199 = arith.constant 9 : index
    %c0_200 = arith.constant 0 : index
    %c0_201 = arith.constant 0 : index
    %224 = vector.load %arg7[%c9_199, %c0_200, %c0_201] : memref<16x9x16xbf16, #tpu.memory_space<vmem>>, vector<1x9x16xbf16>
    %225 = vector.shape_cast %224 : vector<1x9x16xbf16> to vector<9x16xbf16>
    %cst_202 = arith.constant dense<0.000000e+00> : vector<9x128xf32>
    %226 = tpu.matmul %225, %150, %cst_202 {dimension_numbers = #tpu.dot_dimension_numbers<[1], [0], [0], [1], [0, 0, 1, 1], [], []>} : vector<9x16xbf16>, vector<16x128xbf16>, vector<9x128xf32> -> vector<9x128xf32>
    %227 = arith.truncf %226 : vector<9x128xf32> to vector<9x128xbf16>
    %c9_203 = arith.constant 9 : index
    %c0_204 = arith.constant 0 : index
    %c0_205 = arith.constant 0 : index
    %228 = vector.load %arg8[%c9_203, %c0_204, %c0_205] : memref<16x128x128xbf16, #tpu.memory_space<vmem>>, vector<1x128x128xbf16>
    %229 = vector.shape_cast %228 : vector<1x128x128xbf16> to vector<128x128xbf16>
    %cst_206 = arith.constant dense<0.000000e+00> : vector<9x128xf32>
    %230 = tpu.matmul %227, %229, %cst_206 {dimension_numbers = #tpu.dot_dimension_numbers<[1], [0], [0], [1], [0, 0, 1, 1], [], []>} : vector<9x128xbf16>, vector<128x128xbf16>, vector<9x128xf32> -> vector<9x128xf32>
    %231 = arith.addf %223, %230 : vector<9x128xf32>
    %c10_207 = arith.constant 10 : index
    %c0_208 = arith.constant 0 : index
    %c0_209 = arith.constant 0 : index
    %232 = vector.load %arg7[%c10_207, %c0_208, %c0_209] : memref<16x9x16xbf16, #tpu.memory_space<vmem>>, vector<1x9x16xbf16>
    %233 = vector.shape_cast %232 : vector<1x9x16xbf16> to vector<9x16xbf16>
    %cst_210 = arith.constant dense<0.000000e+00> : vector<9x128xf32>
    %234 = tpu.matmul %233, %150, %cst_210 {dimension_numbers = #tpu.dot_dimension_numbers<[1], [0], [0], [1], [0, 0, 1, 1], [], []>} : vector<9x16xbf16>, vector<16x128xbf16>, vector<9x128xf32> -> vector<9x128xf32>
    %235 = arith.truncf %234 : vector<9x128xf32> to vector<9x128xbf16>
    %c10_211 = arith.constant 10 : index
    %c0_212 = arith.constant 0 : index
    %c0_213 = arith.constant 0 : index
    %236 = vector.load %arg8[%c10_211, %c0_212, %c0_213] : memref<16x128x128xbf16, #tpu.memory_space<vmem>>, vector<1x128x128xbf16>
    %237 = vector.shape_cast %236 : vector<1x128x128xbf16> to vector<128x128xbf16>
    %cst_214 = arith.constant dense<0.000000e+00> : vector<9x128xf32>
    %238 = tpu.matmul %235, %237, %cst_214 {dimension_numbers = #tpu.dot_dimension_numbers<[1], [0], [0], [1], [0, 0, 1, 1], [], []>} : vector<9x128xbf16>, vector<128x128xbf16>, vector<9x128xf32> -> vector<9x128xf32>
    %239 = arith.addf %231, %238 : vector<9x128xf32>
    %c11_215 = arith.constant 11 : index
    %c0_216 = arith.constant 0 : index
    %c0_217 = arith.constant 0 : index
    %240 = vector.load %arg7[%c11_215, %c0_216, %c0_217] : memref<16x9x16xbf16, #tpu.memory_space<vmem>>, vector<1x9x16xbf16>
    %241 = vector.shape_cast %240 : vector<1x9x16xbf16> to vector<9x16xbf16>
    %cst_218 = arith.constant dense<0.000000e+00> : vector<9x128xf32>
    %242 = tpu.matmul %241, %150, %cst_218 {dimension_numbers = #tpu.dot_dimension_numbers<[1], [0], [0], [1], [0, 0, 1, 1], [], []>} : vector<9x16xbf16>, vector<16x128xbf16>, vector<9x128xf32> -> vector<9x128xf32>
    %243 = arith.truncf %242 : vector<9x128xf32> to vector<9x128xbf16>
    %c11_219 = arith.constant 11 : index
    %c0_220 = arith.constant 0 : index
    %c0_221 = arith.constant 0 : index
    %244 = vector.load %arg8[%c11_219, %c0_220, %c0_221] : memref<16x128x128xbf16, #tpu.memory_space<vmem>>, vector<1x128x128xbf16>
    %245 = vector.shape_cast %244 : vector<1x128x128xbf16> to vector<128x128xbf16>
    %cst_222 = arith.constant dense<0.000000e+00> : vector<9x128xf32>
    %246 = tpu.matmul %243, %245, %cst_222 {dimension_numbers = #tpu.dot_dimension_numbers<[1], [0], [0], [1], [0, 0, 1, 1], [], []>} : vector<9x128xbf16>, vector<128x128xbf16>, vector<9x128xf32> -> vector<9x128xf32>
    %247 = arith.addf %239, %246 : vector<9x128xf32>
    %c12_223 = arith.constant 12 : index
    %c0_224 = arith.constant 0 : index
    %c0_225 = arith.constant 0 : index
    %248 = vector.load %arg7[%c12_223, %c0_224, %c0_225] : memref<16x9x16xbf16, #tpu.memory_space<vmem>>, vector<1x9x16xbf16>
    %249 = vector.shape_cast %248 : vector<1x9x16xbf16> to vector<9x16xbf16>
    %cst_226 = arith.constant dense<0.000000e+00> : vector<9x128xf32>
    %250 = tpu.matmul %249, %150, %cst_226 {dimension_numbers = #tpu.dot_dimension_numbers<[1], [0], [0], [1], [0, 0, 1, 1], [], []>} : vector<9x16xbf16>, vector<16x128xbf16>, vector<9x128xf32> -> vector<9x128xf32>
    %251 = arith.truncf %250 : vector<9x128xf32> to vector<9x128xbf16>
    %c12_227 = arith.constant 12 : index
    %c0_228 = arith.constant 0 : index
    %c0_229 = arith.constant 0 : index
    %252 = vector.load %arg8[%c12_227, %c0_228, %c0_229] : memref<16x128x128xbf16, #tpu.memory_space<vmem>>, vector<1x128x128xbf16>
    %253 = vector.shape_cast %252 : vector<1x128x128xbf16> to vector<128x128xbf16>
    %cst_230 = arith.constant dense<0.000000e+00> : vector<9x128xf32>
    %254 = tpu.matmul %251, %253, %cst_230 {dimension_numbers = #tpu.dot_dimension_numbers<[1], [0], [0], [1], [0, 0, 1, 1], [], []>} : vector<9x128xbf16>, vector<128x128xbf16>, vector<9x128xf32> -> vector<9x128xf32>
    %255 = arith.addf %247, %254 : vector<9x128xf32>
    %c13_231 = arith.constant 13 : index
    %c0_232 = arith.constant 0 : index
    %c0_233 = arith.constant 0 : index
    %256 = vector.load %arg7[%c13_231, %c0_232, %c0_233] : memref<16x9x16xbf16, #tpu.memory_space<vmem>>, vector<1x9x16xbf16>
    %257 = vector.shape_cast %256 : vector<1x9x16xbf16> to vector<9x16xbf16>
    %cst_234 = arith.constant dense<0.000000e+00> : vector<9x128xf32>
    %258 = tpu.matmul %257, %150, %cst_234 {dimension_numbers = #tpu.dot_dimension_numbers<[1], [0], [0], [1], [0, 0, 1, 1], [], []>} : vector<9x16xbf16>, vector<16x128xbf16>, vector<9x128xf32> -> vector<9x128xf32>
    %259 = arith.truncf %258 : vector<9x128xf32> to vector<9x128xbf16>
    %c13_235 = arith.constant 13 : index
    %c0_236 = arith.constant 0 : index
    %c0_237 = arith.constant 0 : index
    %260 = vector.load %arg8[%c13_235, %c0_236, %c0_237] : memref<16x128x128xbf16, #tpu.memory_space<vmem>>, vector<1x128x128xbf16>
    %261 = vector.shape_cast %260 : vector<1x128x128xbf16> to vector<128x128xbf16>
    %cst_238 = arith.constant dense<0.000000e+00> : vector<9x128xf32>
    %262 = tpu.matmul %259, %261, %cst_238 {dimension_numbers = #tpu.dot_dimension_numbers<[1], [0], [0], [1], [0, 0, 1, 1], [], []>} : vector<9x128xbf16>, vector<128x128xbf16>, vector<9x128xf32> -> vector<9x128xf32>
    %263 = arith.addf %255, %262 : vector<9x128xf32>
    %c14_239 = arith.constant 14 : index
    %c0_240 = arith.constant 0 : index
    %c0_241 = arith.constant 0 : index
    %264 = vector.load %arg7[%c14_239, %c0_240, %c0_241] : memref<16x9x16xbf16, #tpu.memory_space<vmem>>, vector<1x9x16xbf16>
    %265 = vector.shape_cast %264 : vector<1x9x16xbf16> to vector<9x16xbf16>
    %cst_242 = arith.constant dense<0.000000e+00> : vector<9x128xf32>
    %266 = tpu.matmul %265, %150, %cst_242 {dimension_numbers = #tpu.dot_dimension_numbers<[1], [0], [0], [1], [0, 0, 1, 1], [], []>} : vector<9x16xbf16>, vector<16x128xbf16>, vector<9x128xf32> -> vector<9x128xf32>
    %267 = arith.truncf %266 : vector<9x128xf32> to vector<9x128xbf16>
    %c14_243 = arith.constant 14 : index
    %c0_244 = arith.constant 0 : index
    %c0_245 = arith.constant 0 : index
    %268 = vector.load %arg8[%c14_243, %c0_244, %c0_245] : memref<16x128x128xbf16, #tpu.memory_space<vmem>>, vector<1x128x128xbf16>
    %269 = vector.shape_cast %268 : vector<1x128x128xbf16> to vector<128x128xbf16>
    %cst_246 = arith.constant dense<0.000000e+00> : vector<9x128xf32>
    %270 = tpu.matmul %267, %269, %cst_246 {dimension_numbers = #tpu.dot_dimension_numbers<[1], [0], [0], [1], [0, 0, 1, 1], [], []>} : vector<9x128xbf16>, vector<128x128xbf16>, vector<9x128xf32> -> vector<9x128xf32>
    %271 = arith.addf %263, %270 : vector<9x128xf32>
    %c15_247 = arith.constant 15 : index
    %c0_248 = arith.constant 0 : index
    %c0_249 = arith.constant 0 : index
    %272 = vector.load %arg7[%c15_247, %c0_248, %c0_249] : memref<16x9x16xbf16, #tpu.memory_space<vmem>>, vector<1x9x16xbf16>
    %273 = vector.shape_cast %272 : vector<1x9x16xbf16> to vector<9x16xbf16>
    %cst_250 = arith.constant dense<0.000000e+00> : vector<9x128xf32>
    %274 = tpu.matmul %273, %150, %cst_250 {dimension_numbers = #tpu.dot_dimension_numbers<[1], [0], [0], [1], [0, 0, 1, 1], [], []>} : vector<9x16xbf16>, vector<16x128xbf16>, vector<9x128xf32> -> vector<9x128xf32>
    %275 = arith.truncf %274 : vector<9x128xf32> to vector<9x128xbf16>
    %c15_251 = arith.constant 15 : index
    %c0_252 = arith.constant 0 : index
    %c0_253 = arith.constant 0 : index
    %276 = vector.load %arg8[%c15_251, %c0_252, %c0_253] : memref<16x128x128xbf16, #tpu.memory_space<vmem>>, vector<1x128x128xbf16>
    %277 = vector.shape_cast %276 : vector<1x128x128xbf16> to vector<128x128xbf16>
    %cst_254 = arith.constant dense<0.000000e+00> : vector<9x128xf32>
    %278 = tpu.matmul %275, %277, %cst_254 {dimension_numbers = #tpu.dot_dimension_numbers<[1], [0], [0], [1], [0, 0, 1, 1], [], []>} : vector<9x128xbf16>, vector<128x128xbf16>, vector<9x128xf32> -> vector<9x128xf32>
    %279 = arith.addf %271, %278 : vector<9x128xf32>
    %c0_255 = arith.constant 0 : index
    %c0_256 = arith.constant 0 : index
    %280 = vector.load %arg9[%c0_255, %c0_256] : memref<1x128xf32, #tpu.memory_space<vmem>>, vector<1x128xf32>
    %281 = vector.broadcast %280 : vector<1x128xf32> to vector<9x128xf32>
    %282 = arith.addf %279, %281 : vector<9x128xf32>
    %cst_257 = arith.constant 0.000000e+00 : f32
    %283 = vector.broadcast %cst_257 : f32 to vector<9x128xf32>
    %284 = arith.subf %283, %282 : vector<9x128xf32>
    %285 = math.exp %284 : vector<9x128xf32>
    %cst_258 = arith.constant 1.000000e+00 : f32
    %286 = vector.broadcast %cst_258 : f32 to vector<9x128xf32>
    %287 = arith.addf %286, %285 : vector<9x128xf32>
    %288 = tpu.reciprocal %287 {approx = true} : vector<9x128xf32> -> vector<9x128xf32>
    %c0_259 = arith.constant 0 : index
    %c0_260 = arith.constant 0 : index
    %c0_261 = arith.constant 0 : index
    %289 = vector.load %arg10[%c0_259, %c0_260, %c0_261] : memref<1x9x128xf32, #tpu.memory_space<vmem>>, vector<1x9x128xf32>
    %290 = vector.shape_cast %289 : vector<1x9x128xf32> to vector<9x128xf32>
    %291 = vector.shape_cast %288 : vector<9x128xf32> to vector<1x9x128xf32>
    tpu.vector_store %arg10[%c0_259, %c0_260, %c0_261], %291 {strides = array<i32>} : memref<1x9x128xf32, #tpu.memory_space<vmem>>, vector<1x9x128xf32>,
    return
  }
  func.func @transform_0(%arg0: i32) -> (i32, i32, i32) {
    %c0_i32 = arith.constant 0 : i32
    %c0_i32_0 = arith.constant 0 : i32
    %c0_i32_1 = arith.constant 0 : i32
    return %arg0, %c0_i32, %c0_i32_0 : i32, i32, i32
  }
  func.func @transform_1(%arg0: i32) -> (i32, i32) {
    %c0_i32 = arith.constant 0 : i32
    %c0_i32_0 = arith.constant 0 : i32
    %c0_i32_1 = arith.constant 0 : i32
    return %c0_i32, %c0_i32_0 : i32, i32
  }
  func.func @transform_2(%arg0: i32) -> (i32, i32) {
    %c0_i32 = arith.constant 0 : i32
    %c0_i32_0 = arith.constant 0 : i32
    %c0_i32_1 = arith.constant 0 : i32
    return %c0_i32, %c0_i32_0 : i32, i32
  }
  func.func @transform_3(%arg0: i32) -> (i32, i32, i32) {
    %c0_i32 = arith.constant 0 : i32
    %c0_i32_0 = arith.constant 0 : i32
    %c0_i32_1 = arith.constant 0 : i32
    %c0_i32_2 = arith.constant 0 : i32
    return %c0_i32, %c0_i32_0, %c0_i32_1 : i32, i32, i32
  }
  func.func @transform_4(%arg0: i32) -> (i32, i32, i32) {
    %c0_i32 = arith.constant 0 : i32
    %c0_i32_0 = arith.constant 0 : i32
    %c0_i32_1 = arith.constant 0 : i32
    %c0_i32_2 = arith.constant 0 : i32
    return %c0_i32, %c0_i32_0, %c0_i32_1 : i32, i32, i32
  }
  func.func @transform_5(%arg0: i32) -> (i32, i32) {
    %c0_i32 = arith.constant 0 : i32
    %c0_i32_0 = arith.constant 0 : i32
    %c0_i32_1 = arith.constant 0 : i32
    return %c0_i32, %c0_i32_0 : i32, i32
  }
  func.func @transform_6(%arg0: i32) -> (i32, i32, i32) {
    %c0_i32 = arith.constant 0 : i32
    %c0_i32_0 = arith.constant 0 : i32
    %c0_i32_1 = arith.constant 0 : i32
    %c0_i32_2 = arith.constant 0 : i32
    return %c0_i32, %c0_i32_0, %c0_i32_1 : i32, i32, i32
  }
  func.func @transform_7(%arg0: i32) -> (i32, i32, i32) {
    %c0_i32 = arith.constant 0 : i32
    %c0_i32_0 = arith.constant 0 : i32
    %c0_i32_1 = arith.constant 0 : i32
    %c0_i32_2 = arith.constant 0 : i32
    return %c0_i32, %c0_i32_0, %c0_i32_1 : i32, i32, i32
  }
  func.func @transform_8(%arg0: i32) -> (i32, i32) {
    %c0_i32 = arith.constant 0 : i32
    %c0_i32_0 = arith.constant 0 : i32
    %c0_i32_1 = arith.constant 0 : i32
    return %c0_i32, %c0_i32_0 : i32, i32
  }
  func.func @transform_9(%arg0: i32) -> (i32, i32, i32) {
    %c0_i32 = arith.constant 0 : i32
    %c0_i32_0 = arith.constant 0 : i32
    %c0_i32_1 = arith.constant 0 : i32
    return %arg0, %c0_i32, %c0_i32_0 : i32, i32, i32
  }
}

</mosaic_0001>

<bundles_post_ra>
// kernel: squeeze.0
= control target key start
LH: loop header
LB: loop body
LE: loop exit
PB: predicated region body
PF: predicated region fallthrough
CT: control target
= control target key end

     0   :  { %s130_s0 = inlined_call_operand.vmem [shape: f32[2,9], index: 0, kind: input, shape index: {}]   ;;  %s131_s1 = inlined_call_operand.hbm [shape: f32[2,1,3,3], index: 1, kind: output, shape index: {}]  }
   0x1   :  { %v5_v0 = vld [vmem:[%s130_s0] sm:$0x3] }
   0x2   :  { %6 = vst [vmem:[#allocation3] sm:$0x3] %v5_v0 }
   0x3   :  { %2 = vsyncpa [#allocation1], 0  ;;  %s11_s0 = smov 3  ;;  %s19_s8 = smov 3  ;;  %vm8_vm0 = vcmask 23552  }
   0x4   :  { %s102_s9 = smov 125   ;;  %s103_s10 = smov 122  }
   0x5   :  { %s104_s11 = smov [#allocation0]  }
   0x6   :  { %s65_s12 = sshll.u32 %s104_s11, 4  ;;  %s66_s12 = int_to_ptr.vmem [resolvable:$true] %s65_s12 }
   0x7   :  { %s78_s13 = scalar_lea.vmem %s66_s12, 96  ;;  %p83_p1 = scmp.lt.s32.totalorder %s66_s12, %s66_s12 }
   0x8   :  { %p79_p0 = scmp.ne.s32.totalorder %s66_s12, %s78_s13  ;;  %p84_p2 = scmp.lt.s32.totalorder %s78_s13, %s78_s13 }
   0x9   :  { %v12_v1 = vld [vmem:[#allocation3 + $0x1] ss:$-1 sm:%s11_s0]  }
   0xa   :  { %v7_v2 = vld [vmem:[#allocation3] sm:$0x3]   ;;  %13 = vrot.lane.b32.xlu0 %v12_v1, %s102_s9  ;;  %p85_p3 = por %p84_p2, %p83_p1 }
   0xb   :  { %9 = vst.msk [vmem:[#allocation2] ss:$24 sm:$0x3] %vm8_vm0, %v7_v2   ;;  %v20_v3 = vld [vmem:[#allocation3 + $0x1] ss:$-1 sm:%s19_s8]  }
   0xc   :  { %p86_p4 = pnand %p85_p3, %p79_p0 }
   0xe   :  { %21 = vrot.lane.b32.xlu0 %v20_v3, %s103_s10 }
  0x12   :  { %v29_v4 = vld [vmem:[#allocation2] sm:$0x1]  ;;  %v44_v5 = vld [vmem:[#allocation2 + $0x18] sm:$0x1] }
  0x13   :  { %31 = vst [vmem:[#allocation0] sm:$0x1] %v29_v4  ;;  %48 = vst [vmem:[#allocation0 + $0x3] sm:$0x1] %v44_v5 }
  0x7c   :  { %v14_v6 = vpop.permute.xlu0 %13  }
  0x7d   :  { %17 = vst.msk [vmem:[#allocation2 + $0x20] ss:$-24 sm:$0x3] %vm8_vm0, %v14_v6  }
  0x80   :  { %v22_v7 = vpop.permute.xlu0 %21  }
  0x81   :  { %25 = vst.msk [vmem:[#allocation2 + $0x28] ss:$-24 sm:$0x3] %vm8_vm0, %v22_v7  }
  0x84   :  { %v33_v8 = vld [vmem:[#allocation2 + $0x8] sm:$0x1]  ;;  %v50_v9 = vld [vmem:[#allocation2 + $0x20] sm:$0x1] }
  0x85   :  { %36 = vst [vmem:[#allocation0 + $0x1] sm:$0x1] %v33_v8  ;;  %54 = vst [vmem:[#allocation0 + $0x4] sm:$0x1] %v50_v9 }
  0x88   :  { %v38_v10 = vld [vmem:[#allocation2 + $0x10] sm:$0x1]  ;;  %v56_v11 = vld [vmem:[#allocation2 + $0x28] sm:$0x1] }
  0x89   :  { %42 = vst [vmem:[#allocation0 + $0x2] sm:$0x1] %v38_v10  ;;  %60 = vst [vmem:[#allocation0 + $0x5] sm:$0x1] %v56_v11 }
  0x8a   :  { %89 = shalt.err (!%p86_p4)
}
  0x8b   :  { %s90_s16 = scalar_lea.hbm %s131_s1, 96 }
  0x8c   :  { %p91_p5 = scmp.ne.s32.totalorder %s131_s1, %s90_s16  ;;  %p94_p6 = scmp.lt.u32.totalorder %s90_s16, %s131_s1 }
  0x8e   :  { %p96_p7 = pnand %p94_p6, %p91_p5 }
  0x90   :  { %99 = shalt.err (!%p96_p7)
}
  0x91   :  { %68 = dma.vmem_to_hbm [thread:$0]  %s66_s12, 96, %s131_s1, [#allocation1]  }
  0x92   :  { %100 = dma.done.wait [#allocation1], 96  }
  0x93   :  { %101 = vsyncadd [#allocation1], 4294967200 }
  0x94   :  { %70 = vsyncpa [#allocation1], 1 }

// kernel: boundary_discriminator.1
= control target key start
LH: loop header
LB: loop body
LE: loop exit
PB: predicated region body
PF: predicated region fallthrough
CT: control target
= control target key end

     0   :  { %s7427_s30 = smov 0   ;;  %s8716_s0 = inlined_call_operand.vmem [shape: bf16[2,64,16], index: 0, kind: input, shape index: {}]   ;;  %s8717_s1 = inlined_call_operand.vmem [shape: bf16[16,64], index: 1, kind: input, shape index: {}]   ;;  %s8718_s2 = inlined_call_operand.vmem [shape: f32[1,64], index: 2, kind: input, shape index: {}]   ;;  %s8719_s3 = inlined_call_operand.vmem [shape: bf16[16,16,64], index: 3, kind: input, shape index: {}]   ;;  %s8720_s4 = inlined_call_operand.vmem [shape: bf16[16,64,128], index: 4, kind: input, shape index: {}]   ;;  %s8721_s5 = inlined_call_operand.vmem [shape: f32[1,128], index: 5, kind: input, shape index: {}]   ;;  %s8722_s6 = inlined_call_operand.vmem [shape: bf16[16,9,16], index: 6, kind: input, shape index: {}]   ;;  %s8723_s7 = inlined_call_operand.vmem [shape: bf16[16,128,128], index: 7, kind: input, shape index: {}]   ;;  %s8724_s8 = inlined_call_operand.vmem [shape: f32[1,128], index: 8, kind: input, shape index: {}]   ;;  %s8725_s9 = inlined_call_operand.vmem [shape: f32[2,9,128], index: 9, kind: output, shape index: {}]  }
   0x1 LB: > { %s5252_s10 = sadd.s32 4294967295, %s7373_s30   ;;  %p5256_p0 = scmp.ge.s32.totalorder %s7373_s30, 1  ;;  %s7373_s30 = sphi %s7427_s30, %s19_s30  }
   0x2   : > { %p287_p1 = scmp.lt.s32.totalorder %s7373_s30, 3 }
   0x4   : > { %p288_p2 = pnand %p5256_p0, %p287_p1 }
   0x5   : > { %v7130_v0 = vld [vmem:[%s8717_s1] sm:$0xff] (!%p288_p2)   ;;  %p323_p3 = scmp.lt.s32.totalorder (!%p288_p2), %s5252_s10, 1  ;;  %vm377_vm0 = vcmask (!%p288_p2), 130048   ;;  %v7375_v5 = vmov (!%p288_p2), 0.0   ;;  %vm7376_vm1 = vmmov (!%p288_p2), 0   ;;  %v7136_v44 = vld [vmem:[%s8719_s3 + $0x8] sm:$0xff] (!%p288_p2)  }
   0x6   : > { %291 = sbr.rel (%p288_p2) target bundleno = 3184 (0xc70), region = 56  ;;  %6310 = vmatprep.subr.bf16.mxu0 (!%p288_p2), %v7130_v0  ;;  %6320 = vmatprep.subr.bf16.mxu1 (!%p288_p2), %v7375_v5  ;;  %v5261_v6 = vld [vmem:[%s8718_s2] ss:$0 sm:$0xff] (!%p288_p2)  ;;  %vm490_vm10 = vcmask (!%p288_p2), 523264   ;;  %v7139_v47 = vld [vmem:[%s8720_s4 + $0x28] sm:$0xff] (!%p288_p2)   ;;  %v7141_v49 = vld [vmem:[%s8720_s4 + $0x30] sm:$0xff] (!%p288_p2)  }
   0x7   : > { %6311 = vmatpush3.bf16.msra.mxu0 (!%p288_p2), %v7130_v0  ;;  %6328 = vmatprep.mubr.msk.bf16.mxu1 (!%p288_p2), %vm7376_vm1, %v7375_v5  ;;  %v7135_v43 = vld [vmem:[%s8719_s3] sm:$0xff] (!%p288_p2)   ;;  %v7140_v48 = vld [vmem:[%s8720_s4 + $0x8] sm:$0xff] (!%p288_p2)   ;;  %v7142_v50 = vld [vmem:[%s8720_s4 + $0x10] sm:$0xff] (!%p288_p2)  }
   0x8   : > { %6332 = vmatprep.subr.bf16.mxu0 (!%p288_p2), %v7375_v5  ;;  %v7137_v45 = vld [vmem:[%s8720_s4 + $0x20] sm:$0xff] (!%p288_p2)   ;;  %v7143_v51 = vld [vmem:[%s8720_s4 + $0x38] sm:$0xff] (!%p288_p2)   ;;  %v7145_v63 = vld [vmem:[%s8719_s3 + $0x10] sm:$0xff] (!%p288_p2)  }
   0x9   : > { %v7138_v46 = vld [vmem:[%s8720_s4] sm:$0xff] (!%p288_p2)   ;;  %v7144_v52 = vld [vmem:[%s8720_s4 + $0x18] sm:$0xff] (!%p288_p2)  }
   0xa   : > { %v7146_v0 = vld [vmem:[%s8719_s3 + $0x18] sm:$0xff] (!%p288_p2)  }
   0xd   : > { %s8727_s10 = smov (!%p323_p3, %s5252_s10), 1 }
   0xe   : > { %s5967_s13 = sshll.u32 %s8727_s10, 5  ;;  %s5968_s15 = sshll.u32 %s8727_s10, 4 }
   0xf   : > { %s327_s16 = scalar_lea.vmem %s8716_s0, %s5967_s13  ;;  %s332_s18 = scalar_lea.vmem %s8725_s9, %s5968_s15 }
  0x10   : > { %v7131_v1 = vld [vmem:[%s327_s16] sm:$0xff]   ;;  %v7132_v2 = vld [vmem:[%s327_s16 + $0x8] sm:$0xff]   ;;  %v7133_v3 = vld [vmem:[%s327_s16 + $0x10] sm:$0xff]  }
  0x11   : > { %6312 = vmatprep.mubr.msk.bf16.mxu0 %vm377_vm0, %v7131_v1  ;;  %v7134_v4 = vld [vmem:[%s327_s16 + $0x18] sm:$0xff]   ;;  %v7147_v1 = vld [vmem:[%s8719_s3 + $0x20] sm:$0xff]  }
  0x12   : > { %6313 = vmatmul.mubr.msk.bf16.vlgmr.msra.gmra.mrb[0].mxu0 %vm377_vm0, %v7132_v2  ;;  %v7148_v2 = vld [vmem:[%s8719_s3 + $0x28] sm:$0xff]  }
  0x13   : > { %6316 = vmatprep.mubr.msk.bf16.mxu0 %vm377_vm0, %v7133_v3  ;;  %v7149_v3 = vld [vmem:[%s8719_s3 + $0x30] sm:$0xff]  }
  0x1a   : > { %6317 = vmatmul.mubr.msk.bf16.gmra.mrb[4].mxu0 %vm377_vm0, %v7134_v4  ;;  %v7158_v4 = vld [vmem:[%s8720_s4 + $0x40] sm:$0xff]  }
  0x1b   : > { %6340 = vmatprep.mubr.msk.bf16.mxu0 %vm7376_vm1, %v7375_v5 }
  0xe5   : > { %v6314_v7 = vpop.f32.mrb[0].mxu0 }
  0xe6   : > { %v433_v8 = vadd.f32 %v6314_v7, %v5261_v6  ;;  %v424_v9 = vpop.f32.mrb[1].mxu0  ;;  %v7150_v7 = vld [vmem:[%s8719_s3 + $0x38] sm:$0xff]  }
  0xe7   : > { %v425_v10 = vadd.f32 %v5261_v6, %v424_v9  ;;  %v6315_v11 = vpop.f32.mrb[2].mxu0  ;;  %v7162_v9 = vld [vmem:[%s8720_s4 + $0x58] sm:$0xff]  }
  0xe8   : > { %v465_v12 = vmul.f32 0.2, %v433_v8  ;;  %v436_v13 = vadd.f32 %v6315_v11, %v5261_v6  ;;  %v427_v14 = vpop.f32.mrb[3].mxu0  ;;  %vm457_vm2 = vcmp.gt.f32.partialorder %v433_v8, 0.0  ;;  %v7152_v11 = vld [vmem:[%s8719_s3 + $0x48] sm:$0xff]  }
  0xe9   : > { %v463_v15 = vmul.f32 0.2, %v425_v10  ;;  %v428_v16 = vadd.f32 %v5261_v6, %v427_v14  ;;  %vm455_vm3 = vcmp.gt.f32.partialorder %v425_v10, 0.0  ;;  %v7155_v14 = vld [vmem:[%s8719_s3 + $0x60] sm:$0xff]  }
  0xea   : > { %vm458_vm4 = vcmp.gt.f32.partialorder %v436_v13, 0.0  ;;  %v466_v17 = vmul.f32 0.2, %v436_v13  ;;  %v473_v19 = vsel %vm457_vm2, %v433_v8, %v465_v12  ;;  %v7161_v8 = vld [vmem:[%s8720_s4 + $0x50] sm:$0xff]  }
  0xeb   : > { %vm456_vm5 = vcmp.gt.f32.partialorder %v428_v16, 0.0  ;;  %v464_v18 = vmul.f32 0.2, %v428_v16  ;;  %v471_v21 = vsel %vm455_vm3, %v425_v10, %v463_v15  ;;  %v7151_v10 = vld [vmem:[%s8719_s3 + $0x40] sm:$0xff]   ;;  %v7153_v12 = vld [vmem:[%s8719_s3 + $0x50] sm:$0xff]   ;;  %v7156_v15 = vld [vmem:[%s8719_s3 + $0x68] sm:$0xff]  }
  0xec   : > { %v474_v20 = vsel %vm458_vm4, %v436_v13, %v466_v17  ;;  %v7154_v13 = vld [vmem:[%s8719_s3 + $0x58] sm:$0xff]  }
  0xed   : > { %v7457_v22 = vpack.c.bf16 %v474_v20, %v473_v19  ;;  %v472_v23 = vsel %vm456_vm5, %v428_v16, %v464_v18  ;;  %v6318_v24 = vpop.f32.mrb[4].mxu0  ;;  %v7157_v16 = vld [vmem:[%s8719_s3 + $0x70] sm:$0xff]  }
  0xee   : > { %v7459_v25 = vpack.c.bf16 %v472_v23, %v471_v21  ;;  %v449_v26 = vadd.f32 %v6318_v24, %v5261_v6  ;;  %v440_v27 = vpop.f32.mrb[5].mxu0 }
  0xef   : > { %v441_v28 = vadd.f32 %v5261_v6, %v440_v27  ;;  %v6319_v29 = vpop.f32.mrb[6].mxu0 }
  0xf0   : > { %v469_v30 = vmul.f32 0.2, %v449_v26  ;;  %v452_v31 = vadd.f32 %v6319_v29, %v5261_v6  ;;  %v443_v32 = vpop.f32.mrb[7].mxu0  ;;  %6321 = vmatpush3.bf16.msra.mxu1 %v7459_v25  ;;  %6333 = vmatpush3.bf16.msra.mxu0 %v7459_v25  ;;  %vm461_vm6 = vcmp.gt.f32.partialorder %v449_v26, 0.0 }
  0xf1   : > { %v467_v33 = vmul.f32 0.2, %v441_v28  ;;  %v444_v34 = vadd.f32 %v5261_v6, %v443_v32  ;;  %6322 = vmatprep.subr.bf16.mxu1 %v7375_v5  ;;  %6334 = vmatprep.subr.bf16.mxu0 %v7375_v5  ;;  %vm459_vm7 = vcmp.gt.f32.partialorder %v441_v28, 0.0  ;;  %v7159_v6 = vld [vmem:[%s8720_s4 + $0x48] sm:$0xff]  }
  0xf2   : > { %vm462_vm8 = vcmp.gt.f32.partialorder %v452_v31, 0.0  ;;  %v470_v35 = vmul.f32 0.2, %v452_v31  ;;  %v477_v37 = vsel %vm461_vm6, %v449_v26, %v469_v30 }
  0xf3   : > { %vm460_vm9 = vcmp.gt.f32.partialorder %v444_v34, 0.0  ;;  %v468_v36 = vmul.f32 0.2, %v444_v34  ;;  %v475_v39 = vsel %vm459_vm7, %v441_v28, %v467_v33  ;;  %v7160_v28 = vld [vmem:[%s8719_s3 + $0x78] sm:$0xff]  }
  0xf4   : > { %v478_v38 = vsel %vm462_vm8, %v452_v31, %v470_v35  ;;  %6323 = vmatpush3.bf16.msra.mxu1 %v7457_v22  ;;  %6335 = vmatpush3.bf16.msra.mxu0 %v7457_v22  ;;  %v7163_v31 = vld [vmem:[%s8720_s4 + $0x60] sm:$0xff]   ;;  %v7165_v35 = vld [vmem:[%s8720_s4 + $0x70] sm:$0xff]  }
  0xf5   : > { %v7467_v40 = vpack.c.bf16 %v478_v38, %v477_v37  ;;  %v476_v41 = vsel %vm460_vm9, %v444_v34, %v468_v36  ;;  %6324 = vmatprep.subr.bf16.mxu1 %v7375_v5  ;;  %6336 = vmatprep.subr.bf16.mxu0 %v7375_v5  ;;  %v7164_v34 = vld [vmem:[%s8720_s4 + $0x68] sm:$0xff]   ;;  %v7166_v36 = vld [vmem:[%s8720_s4 + $0x78] sm:$0xff]  }
  0xf6   : > { %v7471_v42 = vpack.c.bf16 %v476_v41, %v475_v39 }
  0xf8   : > { %6325 = vmatpush3.bf16.msra.mxu1 %v7471_v42  ;;  %6337 = vmatpush3.bf16.msra.mxu0 %v7471_v42 }
  0xf9   : > { %6326 = vmatprep.subr.bf16.mxu1 %v7375_v5  ;;  %6338 = vmatprep.subr.bf16.mxu0 %v7375_v5 }
  0xfc   : > { %6327 = vmatpush3.bf16.msra.mxu1 %v7467_v40  ;;  %6339 = vmatpush3.bf16.msra.mxu0 %v7467_v40 }
  0xfd   : > { %6344 = vmatprep.subr.bf16.mxu1 %v7375_v5  ;;  %6356 = vmatprep.subr.bf16.mxu0 %v7375_v5 }
  0xff   : > { %6329 = vmatmul.mubr.msk.bf16.vlgmr.msra.gmra.mrb[0].mxu1 %vm490_vm10, %v7135_v43  ;;  %6341 = vmatmul.mubr.msk.bf16.vlgmr.msra.gmra.mrb[8].mxu0 %vm490_vm10, %v7136_v44  ;;  %v7168_v43 = vld [vmem:[%s8720_s4 + $0x88] sm:$0xff]   ;;  %v7169_v44 = vld [vmem:[%s8720_s4 + $0x90] sm:$0xff]  }
 0x100   : > { %6345 = vmatpush3.bf16.msra.mxu1 %v7137_v45  ;;  %6357 = vmatpush3.bf16.msra.mxu0 %v7138_v46  ;;  %v7170_v45 = vld [vmem:[%s8720_s4 + $0x98] sm:$0xff]  }
 0x101   : > { %6346 = vmatprep.subr.bf16.mxu1 %v7375_v5  ;;  %6358 = vmatprep.subr.bf16.mxu0 %v7375_v5 }
 0x102   : > { %6352 = vmatprep.mubr.msk.bf16.mxu1 %vm7376_vm1, %v7375_v5  ;;  %6364 = vmatprep.mubr.msk.bf16.mxu0 %vm7376_vm1, %v7375_v5 }
 0x104   : > { %6347 = vmatpush3.bf16.msra.mxu1 %v7139_v47  ;;  %6359 = vmatpush3.bf16.msra.mxu0 %v7140_v48 }
 0x105   : > { %6348 = vmatprep.subr.bf16.mxu1 %v7375_v5  ;;  %6360 = vmatprep.subr.bf16.mxu0 %v7375_v5 }
 0x108   : > { %6349 = vmatpush3.bf16.msra.mxu1 %v7141_v49  ;;  %6361 = vmatpush3.bf16.msra.mxu0 %v7142_v50  ;;  %v7171_v49 = vld [vmem:[%s8720_s4 + $0xa0] sm:$0xff]  }
 0x109   : > { %6350 = vmatprep.subr.bf16.mxu1 %v7375_v5  ;;  %6362 = vmatprep.subr.bf16.mxu0 %v7375_v5 }
 0x10c   : > { %6351 = vmatpush3.bf16.msra.mxu1 %v7143_v51  ;;  %6363 = vmatpush3.bf16.msra.mxu0 %v7144_v52  ;;  %v7172_v52 = vld [vmem:[%s8720_s4 + $0xa8] sm:$0xff]  }
 0x10d   : > { %6368 = vmatprep.subr.bf16.mxu1 %v7375_v5  ;;  %6380 = vmatprep.subr.bf16.mxu0 %v7375_v5 }
 0x1d2   : > { %v528_v53 = vpop.f32.mrb[0].mxu1  ;;  %v589_v54 = vpop.f32.mrb[8].mxu0 }
 0x1d3   : > { %v6330_v55 = vpop.f32.mrb[1].mxu1  ;;  %v6342_v56 = vpop.f32.mrb[9].mxu0 }
 0x1d4   : > { %v531_v57 = vpop.f32.mrb[2].mxu1  ;;  %v592_v58 = vpop.f32.mrb[10].mxu0 }
 0x1d5   : > { %v535_v59 = vpack.c.bf16 %v531_v57, %v528_v53  ;;  %v596_v60 = vpack.c.bf16 %v592_v58, %v589_v54  ;;  %v6343_v61 = vpop.f32.mrb[11].mxu0  ;;  %v6331_v62 = vpop.f32.mrb[3].mxu1  ;;  %v7173_v53 = vld [vmem:[%s8720_s4 + $0xb0] sm:$0xff]   ;;  %v7174_v54 = vld [vmem:[%s8720_s4 + $0xb8] sm:$0xff]   ;;  %v7175_v58 = vld [vmem:[%s8720_s4 + $0xc0] sm:$0xff]  }
 0x1d6   : > { %v7176_v61 = vld [vmem:[%s8720_s4 + $0xc8] sm:$0xff]   ;;  %v7177_v62 = vld [vmem:[%s8720_s4 + $0xd0] sm:$0xff]  }
 0x1d7   : > { %6353 = vmatmul.mubr.msk.bf16.vlgmr.msra.gmra.mrb[4].mxu1 %vm490_vm10, %v596_v60  ;;  %6365 = vmatmul.mubr.msk.bf16.vlgmr.msra.gmra.mrb[12].mxu0 %vm490_vm10, %v535_v59 }
 0x1d8   : > { %6369 = vmatpush3.bf16.msra.mxu1 %v7459_v25  ;;  %6376 = vmatprep.mubr.msk.bf16.mxu1 %vm7376_vm1, %v7375_v5 }
 0x1d9   : > { %6370 = vmatprep.subr.bf16.mxu1 %v7375_v5  ;;  %6388 = vmatprep.mubr.msk.bf16.mxu0 %vm7376_vm1, %v7375_v5 }
 0x1da   : > { %6381 = vmatpush3.bf16.msra.mxu0 %v7158_v4 }
 0x1db   : > { %6382 = vmatprep.subr.bf16.mxu0 %v7375_v5 }
 0x1dc   : > { %6371 = vmatpush3.bf16.msra.mxu1 %v7457_v22 }
 0x1dd   : > { %6372 = vmatprep.subr.bf16.mxu1 %v7375_v5 }
 0x1de   : > { %6383 = vmatpush3.bf16.msra.mxu0 %v7159_v6 }
 0x1df   : > { %6384 = vmatprep.subr.bf16.mxu0 %v7375_v5 }
 0x1e0   : > { %6373 = vmatpush3.bf16.msra.mxu1 %v7471_v42 }
 0x1e1   : > { %6374 = vmatprep.subr.bf16.mxu1 %v7375_v5 }
 0x1e2   : > { %6385 = vmatpush3.bf16.msra.mxu0 %v7161_v8  ;;  %v7181_v8 = vld [vmem:[%s8720_s4 + $0xf0] sm:$0xff]  }
 0x1e3   : > { %6386 = vmatprep.subr.bf16.mxu0 %v7375_v5 }
 0x1e4   : > { %6375 = vmatpush3.bf16.msra.mxu1 %v7467_v40 }
 0x1e5   : > { %6392 = vmatprep.subr.bf16.mxu1 %v7375_v5 }
 0x1e6   : > { %6387 = vmatpush3.bf16.msra.mxu0 %v7162_v9  ;;  %v7182_v9 = vld [vmem:[%s8720_s4 + $0xf8] sm:$0xff]  }
 0x1e7   : > { %6377 = vmatmul.mubr.msk.bf16.vlgmr.msra.gmra.mrb[8].mxu1 %vm490_vm10, %v7145_v63  ;;  %6404 = vmatprep.subr.bf16.mxu0 %v7375_v5  ;;  %v7178_v63 = vld [vmem:[%s8720_s4 + $0xd8] sm:$0xff]  }
 0x1e8   : > { %6393 = vmatpush3.bf16.msra.mxu1 %v7459_v25  ;;  %6400 = vmatprep.mubr.msk.bf16.mxu1 %vm7376_vm1, %v7375_v5 }
 0x1e9   : > { %6394 = vmatprep.subr.bf16.mxu1 %v7375_v5 }
 0x1ec   : > { %6395 = vmatpush3.bf16.msra.mxu1 %v7457_v22 }
 0x1ed   : > { %6396 = vmatprep.subr.bf16.mxu1 %v7375_v5 }
 0x1f0   : > { %6397 = vmatpush3.bf16.msra.mxu1 %v7471_v42 }
 0x1f1   : > { %6398 = vmatprep.subr.bf16.mxu1 %v7375_v5 }
 0x1f4   : > { %6399 = vmatpush3.bf16.msra.mxu1 %v7467_v40 }
 0x1f5   : > { %6416 = vmatprep.subr.bf16.mxu1 %v7375_v5 }
 0x1f7   : > { %6401 = vmatmul.mubr.msk.bf16.vlgmr.msra.gmra.mrb[12].mxu1 %vm490_vm10, %v7146_v0 }
 0x1f8   : > { %6417 = vmatpush3.bf16.msra.mxu1 %v7459_v25  ;;  %6424 = vmatprep.mubr.msk.bf16.mxu1 %vm7376_vm1, %v7375_v5 }
 0x1f9   : > { %6418 = vmatprep.subr.bf16.mxu1 %v7375_v5 }
 0x1fc   : > { %6419 = vmatpush3.bf16.msra.mxu1 %v7457_v22 }
 0x1fd   : > { %6420 = vmatprep.subr.bf16.mxu1 %v7375_v5 }
 0x200   : > { %6421 = vmatpush3.bf16.msra.mxu1 %v7471_v42 }
 0x201   : > { %6422 = vmatprep.subr.bf16.mxu1 %v7375_v5 }
 0x204   : > { %6423 = vmatpush3.bf16.msra.mxu1 %v7467_v40 }
 0x205   : > { %6440 = vmatprep.subr.bf16.mxu1 %v7375_v5 }
 0x207   : > { %6425 = vmatmul.mubr.msk.bf16.vlgmr.msra.gmra.mrb[16].mxu1 %vm490_vm10, %v7147_v1 }
 0x208   : > { %6441 = vmatpush3.bf16.msra.mxu1 %v7459_v25  ;;  %6448 = vmatprep.mubr.msk.bf16.mxu1 %vm7376_vm1, %v7375_v5 }
 0x209   : > { %6442 = vmatprep.subr.bf16.mxu1 %v7375_v5 }
 0x20c   : > { %6443 = vmatpush3.bf16.msra.mxu1 %v7457_v22 }
 0x20d   : > { %6444 = vmatprep.subr.bf16.mxu1 %v7375_v5 }
 0x210   : > { %6445 = vmatpush3.bf16.msra.mxu1 %v7471_v42 }
 0x211   : > { %6446 = vmatprep.subr.bf16.mxu1 %v7375_v5 }
 0x214   : > { %6447 = vmatpush3.bf16.msra.mxu1 %v7467_v40 }
 0x215   : > { %6464 = vmatprep.subr.bf16.mxu1 %v7375_v5 }
 0x217   : > { %6449 = vmatmul.mubr.msk.bf16.vlgmr.msra.gmra.mrb[20].mxu1 %vm490_vm10, %v7148_v2 }
 0x218   : > { %6465 = vmatpush3.bf16.msra.mxu1 %v7459_v25  ;;  %6472 = vmatprep.mubr.msk.bf16.mxu1 %vm7376_vm1, %v7375_v5 }
 0x219   : > { %6466 = vmatprep.subr.bf16.mxu1 %v7375_v5 }
 0x21c   : > { %6467 = vmatpush3.bf16.msra.mxu1 %v7457_v22 }
 0x21d   : > { %6468 = vmatprep.subr.bf16.mxu1 %v7375_v5 }
 0x220   : > { %6469 = vmatpush3.bf16.msra.mxu1 %v7471_v42 }
 0x221   : > { %6470 = vmatprep.subr.bf16.mxu1 %v7375_v5 }
 0x224   : > { %6471 = vmatpush3.bf16.msra.mxu1 %v7467_v40 }
 0x225   : > { %6488 = vmatprep.subr.bf16.mxu1 %v7375_v5 }
 0x227   : > { %6473 = vmatmul.mubr.msk.bf16.vlgmr.msra.gmra.mrb[24].mxu1 %vm490_vm10, %v7149_v3  ;;  %v7179_v3 = vld [vmem:[%s8720_s4 + $0xe0] sm:$0xff]  }
 0x228   : > { %6489 = vmatpush3.bf16.msra.mxu1 %v7459_v25  ;;  %6496 = vmatprep.mubr.msk.bf16.mxu1 %vm7376_vm1, %v7375_v5 }
 0x229   : > { %6490 = vmatprep.subr.bf16.mxu1 %v7375_v5 }
 0x22c   : > { %6491 = vmatpush3.bf16.msra.mxu1 %v7457_v22 }
 0x22d   : > { %6492 = vmatprep.subr.bf16.mxu1 %v7375_v5 }
 0x230   : > { %6493 = vmatpush3.bf16.msra.mxu1 %v7471_v42 }
 0x231   : > { %6494 = vmatprep.subr.bf16.mxu1 %v7375_v5 }
 0x234   : > { %6495 = vmatpush3.bf16.msra.mxu1 %v7467_v40 }
 0x235   : > { %6512 = vmatprep.subr.bf16.mxu1 %v7375_v5 }
 0x237   : > { %6497 = vmatmul.mubr.msk.bf16.vlgmr.msra.gmra.mrb[28].mxu1 %vm490_vm10, %v7150_v7  ;;  %v7180_v7 = vld [vmem:[%s8720_s4 + $0xe8] sm:$0xff]  }
 0x238   : > { %6513 = vmatpush3.bf16.msra.mxu1 %v7459_v25  ;;  %6520 = vmatprep.mubr.msk.bf16.mxu1 %vm7376_vm1, %v7375_v5 }
 0x239   : > { %6514 = vmatprep.subr.bf16.mxu1 %v7375_v5 }
 0x23c   : > { %6515 = vmatpush3.bf16.msra.mxu1 %v7457_v22 }
 0x23d   : > { %6516 = vmatprep.subr.bf16.mxu1 %v7375_v5 }
 0x240   : > { %6517 = vmatpush3.bf16.msra.mxu1 %v7471_v42 }
 0x241   : > { %6518 = vmatprep.subr.bf16.mxu1 %v7375_v5 }
 0x244   : > { %6519 = vmatpush3.bf16.msra.mxu1 %v7467_v40 }
 0x245   : > { %6536 = vmatprep.subr.bf16.mxu1 %v7375_v5 }
 0x247   : > { %6521 = vmatmul.mubr.msk.bf16.vlgmr.msra.gmra.mrb[32].mxu1 %vm490_vm10, %v7151_v10 }
 0x248   : > { %6537 = vmatpush3.bf16.msra.mxu1 %v7459_v25  ;;  %6544 = vmatprep.mubr.msk.bf16.mxu1 %vm7376_vm1, %v7375_v5 }
 0x249   : > { %6538 = vmatprep.subr.bf16.mxu1 %v7375_v5 }
 0x24c   : > { %6539 = vmatpush3.bf16.msra.mxu1 %v7457_v22 }
 0x24d   : > { %6540 = vmatprep.subr.bf16.mxu1 %v7375_v5 }
 0x250   : > { %6541 = vmatpush3.bf16.msra.mxu1 %v7471_v42 }
 0x251   : > { %6542 = vmatprep.subr.bf16.mxu1 %v7375_v5 }
 0x254   : > { %6543 = vmatpush3.bf16.msra.mxu1 %v7467_v40 }
 0x255   : > { %6560 = vmatprep.subr.bf16.mxu1 %v7375_v5 }
 0x257   : > { %6545 = vmatmul.mubr.msk.bf16.vlgmr.msra.gmra.mrb[36].mxu1 %vm490_vm10, %v7152_v11 }
 0x258   : > { %6561 = vmatpush3.bf16.msra.mxu1 %v7459_v25  ;;  %6568 = vmatprep.mubr.msk.bf16.mxu1 %vm7376_vm1, %v7375_v5 }
 0x259   : > { %6562 = vmatprep.subr.bf16.mxu1 %v7375_v5 }
 0x25c   : > { %6563 = vmatpush3.bf16.msra.mxu1 %v7457_v22 }
 0x25d   : > { %6564 = vmatprep.subr.bf16.mxu1 %v7375_v5 }
 0x260   : > { %6565 = vmatpush3.bf16.msra.mxu1 %v7471_v42 }
 0x261   : > { %6566 = vmatprep.subr.bf16.mxu1 %v7375_v5 }
 0x264   : > { %6567 = vmatpush3.bf16.msra.mxu1 %v7467_v40 }
 0x265   : > { %6584 = vmatprep.subr.bf16.mxu1 %v7375_v5 }
 0x267   : > { %6569 = vmatmul.mubr.msk.bf16.vlgmr.msra.gmra.mrb[40].mxu1 %vm490_vm10, %v7153_v12 }
 0x268   : > { %6585 = vmatpush3.bf16.msra.mxu1 %v7459_v25  ;;  %6592 = vmatprep.mubr.msk.bf16.mxu1 %vm7376_vm1, %v7375_v5 }
 0x269   : > { %6586 = vmatprep.subr.bf16.mxu1 %v7375_v5 }
 0x26c   : > { %6587 = vmatpush3.bf16.msra.mxu1 %v7457_v22 }
 0x26d   : > { %6588 = vmatprep.subr.bf16.mxu1 %v7375_v5 }
 0x270   : > { %6589 = vmatpush3.bf16.msra.mxu1 %v7471_v42 }
 0x271   : > { %6590 = vmatprep.subr.bf16.mxu1 %v7375_v5 }
 0x274   : > { %6591 = vmatpush3.bf16.msra.mxu1 %v7467_v40 }
 0x275   : > { %6608 = vmatprep.subr.bf16.mxu1 %v7375_v5 }
 0x277   : > { %6593 = vmatmul.mubr.msk.bf16.vlgmr.msra.gmra.mrb[44].mxu1 %vm490_vm10, %v7154_v13  ;;  %v7183_v13 = vld [vmem:[%s8720_s4 + $0x100] sm:$0xff]  }
 0x278   : > { %6609 = vmatpush3.bf16.msra.mxu1 %v7459_v25  ;;  %6616 = vmatprep.mubr.msk.bf16.mxu1 %vm7376_vm1, %v7375_v5 }
 0x279   : > { %6610 = vmatprep.subr.bf16.mxu1 %v7375_v5 }
 0x27c   : > { %6611 = vmatpush3.bf16.msra.mxu1 %v7457_v22 }
 0x27d   : > { %6612 = vmatprep.subr.bf16.mxu1 %v7375_v5 }
 0x280   : > { %6613 = vmatpush3.bf16.msra.mxu1 %v7471_v42 }
 0x281   : > { %6614 = vmatprep.subr.bf16.mxu1 %v7375_v5 }
 0x284   : > { %6615 = vmatpush3.bf16.msra.mxu1 %v7467_v40 }
 0x285   : > { %6632 = vmatprep.subr.bf16.mxu1 %v7375_v5 }
 0x287   : > { %6617 = vmatmul.mubr.msk.bf16.vlgmr.msra.gmra.mrb[48].mxu1 %vm490_vm10, %v7155_v14 }
 0x288   : > { %6633 = vmatpush3.bf16.msra.mxu1 %v7459_v25  ;;  %6640 = vmatprep.mubr.msk.bf16.mxu1 %vm7376_vm1, %v7375_v5 }
 0x289   : > { %6634 = vmatprep.subr.bf16.mxu1 %v7375_v5 }
 0x28c   : > { %6635 = vmatpush3.bf16.msra.mxu1 %v7457_v22 }
 0x28d   : > { %6636 = vmatprep.subr.bf16.mxu1 %v7375_v5 }
 0x290   : > { %6637 = vmatpush3.bf16.msra.mxu1 %v7471_v42 }
 0x291   : > { %6638 = vmatprep.subr.bf16.mxu1 %v7375_v5 }
 0x294   : > { %6639 = vmatpush3.bf16.msra.mxu1 %v7467_v40 }
 0x295   : > { %6656 = vmatprep.subr.bf16.mxu1 %v7375_v5 }
 0x297   : > { %6641 = vmatmul.mubr.msk.bf16.vlgmr.msra.gmra.mrb[52].mxu1 %vm490_vm10, %v7156_v15 }
 0x298   : > { %6657 = vmatpush3.bf16.msra.mxu1 %v7459_v25  ;;  %6664 = vmatprep.mubr.msk.bf16.mxu1 %vm7376_vm1, %v7375_v5 }
 0x299   : > { %6658 = vmatprep.subr.bf16.mxu1 %v7375_v5 }
 0x29c   : > { %6659 = vmatpush3.bf16.msra.mxu1 %v7457_v22 }
 0x29d   : > { %6660 = vmatprep.subr.bf16.mxu1 %v7375_v5 }
 0x2a0   : > { %6661 = vmatpush3.bf16.msra.mxu1 %v7471_v42 }
 0x2a1   : > { %6662 = vmatprep.subr.bf16.mxu1 %v7375_v5 }
 0x2a4   : > { %6663 = vmatpush3.bf16.msra.mxu1 %v7467_v40 }
 0x2a5   : > { %6680 = vmatprep.subr.bf16.mxu1 %v7375_v5 }
 0x2a7   : > { %6665 = vmatmul.mubr.msk.bf16.vlgmr.msra.gmra.mrb[56].mxu1 %vm490_vm10, %v7157_v16  ;;  %v7184_v16 = vld [vmem:[%s8720_s4 + $0x108] sm:$0xff]  }
 0x2a8   : > { %6681 = vmatpush3.bf16.msra.mxu1 %v7459_v25  ;;  %6688 = vmatprep.mubr.msk.bf16.mxu1 %vm7376_vm1, %v7375_v5 }
 0x2a9   : > { %6682 = vmatprep.subr.bf16.mxu1 %v7375_v5 }
 0x2aa   : > { %v667_v17 = vpop.f32.mrb[4].mxu1  ;;  %v735_v18 = vpop.f32.mrb[12].mxu0 }
 0x2ab   : > { %v7731_v19 = vadd.f32 %v735_v18, %v667_v17  ;;  %v6354_v20 = vpop.f32.mrb[5].mxu1  ;;  %v6366_v21 = vpop.f32.mrb[13].mxu0  ;;  %v7185_v17 = vld [vmem:[%s8720_s4 + $0x110] sm:$0xff]   ;;  %v7186_v18 = vld [vmem:[%s8720_s4 + $0x118] sm:$0xff]  }
 0x2ac   : > { %6683 = vmatpush3.bf16.msra.mxu1 %v7457_v22  ;;  %v670_v23 = vpop.f32.mrb[6].mxu1  ;;  %v738_v24 = vpop.f32.mrb[14].mxu0 }
 0x2ad   : > { %v7734_v26 = vadd.f32 %v738_v24, %v670_v23  ;;  %v6355_v27 = vpop.f32.mrb[7].mxu1  ;;  %6684 = vmatprep.subr.bf16.mxu1 %v7375_v5  ;;  %v6367_v25 = vpop.f32.mrb[15].mxu0  ;;  %v7187_v24 = vld [vmem:[%s8720_s4 + $0x120] sm:$0xff]  }
 0x2b0   : > { %6685 = vmatpush3.bf16.msra.mxu1 %v7471_v42 }
 0x2b1   : > { %6686 = vmatprep.subr.bf16.mxu1 %v7375_v5 }
 0x2b4   : > { %6687 = vmatpush3.bf16.msra.mxu1 %v7467_v40  ;;  %v7167_v40 = vld [vmem:[%s8720_s4 + $0x80] sm:$0xff]  }
 0x2b5   : > { %6716 = vmatprep.subr.bf16.mxu1 %v7375_v5 }
 0x2b7   : > { %6689 = vmatmul.mubr.msk.bf16.vlgmr.msra.gmra.mrb[60].mxu1 %vm490_vm10, %v7160_v28  ;;  %v7188_v28 = vld [vmem:[%s8720_s4 + $0x128] sm:$0xff]  }
 0x2b8   : > { %6732 = vmatprep.mubr.msk.bf16.mxu1 %vm7376_vm1, %v7375_v5 }
 0x2ba   : > { %v787_v22 = vpop.f32.mrb[8].mxu1 }
 0x2bb   : > { %v6378_v29 = vpop.f32.mrb[9].mxu1 }
 0x2bc   : > { %v790_v30 = vpop.f32.mrb[10].mxu1  ;;  %v7190_v29 = vld [vmem:[%s8720_s4 + $0x138] sm:$0xff]  }
 0x2bd   : > { %v794_v32 = vpack.c.bf16 %v790_v30, %v787_v22  ;;  %v6379_v33 = vpop.f32.mrb[11].mxu1  ;;  %v7189_v22 = vld [vmem:[%s8720_s4 + $0x130] sm:$0xff]  }
 0x2be   : > { %v7191_v33 = vld [vmem:[%s8720_s4 + $0x140] sm:$0xff]  }
 0x2bf   : > { %6389 = vmatmul.mubr.msk.bf16.vlgmr.msra.gmra.mrb[16].mxu0 %vm490_vm10, %v794_v32 }
 0x2c0   : > { %6405 = vmatpush3.bf16.msra.mxu0 %v7163_v31  ;;  %6412 = vmatprep.mubr.msk.bf16.mxu0 %vm7376_vm1, %v7375_v5 }
 0x2c1   : > { %6406 = vmatprep.subr.bf16.mxu0 %v7375_v5 }
 0x2c4   : > { %6407 = vmatpush3.bf16.msra.mxu0 %v7164_v34 }
 0x2c5   : > { %6408 = vmatprep.subr.bf16.mxu0 %v7375_v5 }
 0x2c8   : > { %6409 = vmatpush3.bf16.msra.mxu0 %v7165_v35 }
 0x2c9   : > { %6410 = vmatprep.subr.bf16.mxu0 %v7375_v5 }
 0x2ca   : > { %v919_v37 = vpop.f32.mrb[12].mxu1 }
 0x2cb   : > { %v6402_v38 = vpop.f32.mrb[13].mxu1 }
 0x2cc   : > { %v922_v39 = vpop.f32.mrb[14].mxu1  ;;  %6411 = vmatpush3.bf16.msra.mxu0 %v7166_v36  ;;  %v7192_v36 = vld [vmem:[%s8720_s4 + $0x148] sm:$0xff]   ;;  %v7194_v38 = vld [vmem:[%s8720_s4 + $0x158] sm:$0xff]  }
 0x2cd   : > { %v926_v41 = vpack.c.bf16 %v922_v39, %v919_v37  ;;  %v6403_v42 = vpop.f32.mrb[15].mxu1  ;;  %6428 = vmatprep.subr.bf16.mxu0 %v7375_v5  ;;  %v7193_v37 = vld [vmem:[%s8720_s4 + $0x150] sm:$0xff]  }
 0x2ce   : > { %v7195_v42 = vld [vmem:[%s8720_s4 + $0x160] sm:$0xff]  }
 0x2cf   : > { %6413 = vmatmul.mubr.msk.bf16.vlgmr.msra.gmra.mrb[20].mxu0 %vm490_vm10, %v926_v41 }
 0x2d0   : > { %6429 = vmatpush3.bf16.msra.mxu0 %v7167_v40  ;;  %6436 = vmatprep.mubr.msk.bf16.mxu0 %vm7376_vm1, %v7375_v5 }
 0x2d1   : > { %6430 = vmatprep.subr.bf16.mxu0 %v7375_v5 }
 0x2d4   : > { %6431 = vmatpush3.bf16.msra.mxu0 %v7168_v43 }
 0x2d5   : > { %6432 = vmatprep.subr.bf16.mxu0 %v7375_v5 }
 0x2d8   : > { %6433 = vmatpush3.bf16.msra.mxu0 %v7169_v44 }
 0x2d9   : > { %6434 = vmatprep.subr.bf16.mxu0 %v7375_v5 }
 0x2da   : > { %v1051_v46 = vpop.f32.mrb[16].mxu1 }
 0x2db   : > { %v6426_v47 = vpop.f32.mrb[17].mxu1 }
 0x2dc   : > { %v1054_v48 = vpop.f32.mrb[18].mxu1  ;;  %6435 = vmatpush3.bf16.msra.mxu0 %v7170_v45  ;;  %v7196_v45 = vld [vmem:[%s8720_s4 + $0x168] sm:$0xff]   ;;  %v7198_v47 = vld [vmem:[%s8720_s4 + $0x178] sm:$0xff]  }
 0x2dd   : > { %v1058_v50 = vpack.c.bf16 %v1054_v48, %v1051_v46  ;;  %v6427_v51 = vpop.f32.mrb[19].mxu1  ;;  %6452 = vmatprep.subr.bf16.mxu0 %v7375_v5  ;;  %v7197_v46 = vld [vmem:[%s8720_s4 + $0x170] sm:$0xff]  }
 0x2de   : > { %v7199_v51 = vld [vmem:[%s8720_s4 + $0x180] sm:$0xff]  }
 0x2df   : > { %6437 = vmatmul.mubr.msk.bf16.vlgmr.msra.gmra.mrb[24].mxu0 %vm490_vm10, %v1058_v50 }
 0x2e0   : > { %6453 = vmatpush3.bf16.msra.mxu0 %v7171_v49  ;;  %6460 = vmatprep.mubr.msk.bf16.mxu0 %vm7376_vm1, %v7375_v5 }
 0x2e1   : > { %6454 = vmatprep.subr.bf16.mxu0 %v7375_v5 }
 0x2e4   : > { %6455 = vmatpush3.bf16.msra.mxu0 %v7172_v52 }
 0x2e5   : > { %6456 = vmatprep.subr.bf16.mxu0 %v7375_v5 }
 0x2e8   : > { %6457 = vmatpush3.bf16.msra.mxu0 %v7173_v53 }
 0x2e9   : > { %6458 = vmatprep.subr.bf16.mxu0 %v7375_v5 }
 0x2ea   : > { %v1183_v55 = vpop.f32.mrb[20].mxu1 }
 0x2eb   : > { %v6450_v56 = vpop.f32.mrb[21].mxu1 }
 0x2ec   : > { %v1186_v57 = vpop.f32.mrb[22].mxu1  ;;  %6459 = vmatpush3.bf16.msra.mxu0 %v7174_v54  ;;  %v7200_v54 = vld [vmem:[%s8720_s4 + $0x188] sm:$0xff]   ;;  %v7202_v56 = vld [vmem:[%s8720_s4 + $0x198] sm:$0xff]  }
 0x2ed   : > { %v1190_v59 = vpack.c.bf16 %v1186_v57, %v1183_v55  ;;  %v6451_v60 = vpop.f32.mrb[23].mxu1  ;;  %6476 = vmatprep.subr.bf16.mxu0 %v7375_v5  ;;  %v7201_v55 = vld [vmem:[%s8720_s4 + $0x190] sm:$0xff]  }
 0x2ee   : > { %v7203_v60 = vld [vmem:[%s8720_s4 + $0x1a0] sm:$0xff]  }
 0x2ef   : > { %6461 = vmatmul.mubr.msk.bf16.vlgmr.msra.gmra.mrb[28].mxu0 %vm490_vm10, %v1190_v59 }
 0x2f0   : > { %6477 = vmatpush3.bf16.msra.mxu0 %v7175_v58  ;;  %6484 = vmatprep.mubr.msk.bf16.mxu0 %vm7376_vm1, %v7375_v5 }
 0x2f1   : > { %6478 = vmatprep.subr.bf16.mxu0 %v7375_v5 }
 0x2f4   : > { %6479 = vmatpush3.bf16.msra.mxu0 %v7176_v61 }
 0x2f5   : > { %6480 = vmatprep.subr.bf16.mxu0 %v7375_v5 }
 0x2f8   : > { %6481 = vmatpush3.bf16.msra.mxu0 %v7177_v62 }
 0x2f9   : > { %6482 = vmatprep.subr.bf16.mxu0 %v7375_v5 }
 0x2fa   : > { %v1315_v0 = vpop.f32.mrb[24].mxu1 }
 0x2fb   : > { %v6474_v1 = vpop.f32.mrb[25].mxu1 }
 0x2fc   : > { %v1318_v2 = vpop.f32.mrb[26].mxu1  ;;  %6483 = vmatpush3.bf16.msra.mxu0 %v7178_v63  ;;  %v7204_v63 = vld [vmem:[%s8720_s4 + $0x1a8] sm:$0xff]   ;;  %v7206_v1 = vld [vmem:[%s8720_s4 + $0x1b8] sm:$0xff]  }
 0x2fd   : > { %v1322_v4 = vpack.c.bf16 %v1318_v2, %v1315_v0  ;;  %v6475_v6 = vpop.f32.mrb[27].mxu1  ;;  %6500 = vmatprep.subr.bf16.mxu0 %v7375_v5  ;;  %v7205_v0 = vld [vmem:[%s8720_s4 + $0x1b0] sm:$0xff]  }
 0x2fe   : > { %v7207_v6 = vld [vmem:[%s8720_s4 + $0x1c0] sm:$0xff]  }
 0x2ff   : > { %6485 = vmatmul.mubr.msk.bf16.vlgmr.msra.gmra.mrb[32].mxu0 %vm490_vm10, %v1322_v4 }
 0x300   : > { %6501 = vmatpush3.bf16.msra.mxu0 %v7179_v3  ;;  %6508 = vmatprep.mubr.msk.bf16.mxu0 %vm7376_vm1, %v7375_v5 }
 0x301   : > { %6502 = vmatprep.subr.bf16.mxu0 %v7375_v5 }
 0x304   : > { %6503 = vmatpush3.bf16.msra.mxu0 %v7180_v7 }
 0x305   : > { %6504 = vmatprep.subr.bf16.mxu0 %v7375_v5 }
 0x308   : > { %6505 = vmatpush3.bf16.msra.mxu0 %v7181_v8 }
 0x309   : > { %6506 = vmatprep.subr.bf16.mxu0 %v7375_v5 }
 0x30a   : > { %v1447_v10 = vpop.f32.mrb[28].mxu1 }
 0x30b   : > { %v6498_v11 = vpop.f32.mrb[29].mxu1 }
 0x30c   : > { %v1450_v12 = vpop.f32.mrb[30].mxu1  ;;  %6507 = vmatpush3.bf16.msra.mxu0 %v7182_v9  ;;  %v7208_v9 = vld [vmem:[%s8720_s4 + $0x1c8] sm:$0xff]   ;;  %v7210_v11 = vld [vmem:[%s8720_s4 + $0x1d8] sm:$0xff]  }
 0x30d   : > { %v1454_v14 = vpack.c.bf16 %v1450_v12, %v1447_v10  ;;  %v6499_v15 = vpop.f32.mrb[31].mxu1  ;;  %6524 = vmatprep.subr.bf16.mxu0 %v7375_v5  ;;  %v7209_v10 = vld [vmem:[%s8720_s4 + $0x1d0] sm:$0xff]  }
 0x30e   : > { %v7211_v15 = vld [vmem:[%s8720_s4 + $0x1e0] sm:$0xff]  }
 0x30f   : > { %6509 = vmatmul.mubr.msk.bf16.vlgmr.msra.gmra.mrb[36].mxu0 %vm490_vm10, %v1454_v14 }
 0x310   : > { %6525 = vmatpush3.bf16.msra.mxu0 %v7183_v13  ;;  %6532 = vmatprep.mubr.msk.bf16.mxu0 %vm7376_vm1, %v7375_v5 }
 0x311   : > { %6526 = vmatprep.subr.bf16.mxu0 %v7375_v5 }
 0x314   : > { %6527 = vmatpush3.bf16.msra.mxu0 %v7184_v16 }
 0x315   : > { %6528 = vmatprep.subr.bf16.mxu0 %v7375_v5 }
 0x318   : > { %6529 = vmatpush3.bf16.msra.mxu0 %v7185_v17 }
 0x319   : > { %6530 = vmatprep.subr.bf16.mxu0 %v7375_v5 }
 0x31a   : > { %v1579_v20 = vpop.f32.mrb[32].mxu1 }
 0x31b   : > { %v6522_v21 = vpop.f32.mrb[33].mxu1 }
 0x31c   : > { %v1582_v23 = vpop.f32.mrb[34].mxu1  ;;  %6531 = vmatpush3.bf16.msra.mxu0 %v7186_v18  ;;  %v7212_v18 = vld [vmem:[%s8720_s4 + $0x1e8] sm:$0xff]   ;;  %v7214_v21 = vld [vmem:[%s8720_s4 + $0x1f8] sm:$0xff]  }
 0x31d   : > { %v1586_v27 = vpack.c.bf16 %v1582_v23, %v1579_v20  ;;  %v6523_v25 = vpop.f32.mrb[35].mxu1  ;;  %6548 = vmatprep.subr.bf16.mxu0 %v7375_v5  ;;  %v7213_v20 = vld [vmem:[%s8720_s4 + $0x1f0] sm:$0xff]  }
 0x31f   : > { %6533 = vmatmul.mubr.msk.bf16.vlgmr.msra.gmra.mrb[40].mxu0 %vm490_vm10, %v1586_v27 }
 0x320   : > { %6549 = vmatpush3.bf16.msra.mxu0 %v7187_v24  ;;  %6556 = vmatprep.mubr.msk.bf16.mxu0 %vm7376_vm1, %v7375_v5 }
 0x321   : > { %6550 = vmatprep.subr.bf16.mxu0 %v7375_v5 }
 0x324   : > { %6551 = vmatpush3.bf16.msra.mxu0 %v7188_v28 }
 0x325   : > { %6552 = vmatprep.subr.bf16.mxu0 %v7375_v5 }
 0x328   : > { %6553 = vmatpush3.bf16.msra.mxu0 %v7189_v22 }
 0x329   : > { %6554 = vmatprep.subr.bf16.mxu0 %v7375_v5 }
 0x32a   : > { %v1711_v30 = vpop.f32.mrb[36].mxu1 }
 0x32b   : > { %v6546_v31 = vpop.f32.mrb[37].mxu1 }
 0x32c   : > { %v1714_v32 = vpop.f32.mrb[38].mxu1  ;;  %6555 = vmatpush3.bf16.msra.mxu0 %v7190_v29 }
 0x32d   : > { %v1718_v34 = vpack.c.bf16 %v1714_v32, %v1711_v30  ;;  %v6547_v35 = vpop.f32.mrb[39].mxu1  ;;  %6572 = vmatprep.subr.bf16.mxu0 %v7375_v5 }
 0x32f   : > { %6557 = vmatmul.mubr.msk.bf16.vlgmr.msra.gmra.mrb[44].mxu0 %vm490_vm10, %v1718_v34 }
 0x330   : > { %6573 = vmatpush3.bf16.msra.mxu0 %v7191_v33  ;;  %6580 = vmatprep.mubr.msk.bf16.mxu0 %vm7376_vm1, %v7375_v5 }
 0x331   : > { %6574 = vmatprep.subr.bf16.mxu0 %v7375_v5 }
 0x334   : > { %6575 = vmatpush3.bf16.msra.mxu0 %v7192_v36 }
 0x335   : > { %6576 = vmatprep.subr.bf16.mxu0 %v7375_v5 }
 0x338   : > { %6577 = vmatpush3.bf16.msra.mxu0 %v7193_v37 }
 0x339   : > { %6578 = vmatprep.subr.bf16.mxu0 %v7375_v5 }
 0x33a   : > { %v1843_v39 = vpop.f32.mrb[40].mxu1 }
 0x33b   : > { %v6570_v40 = vpop.f32.mrb[41].mxu1 }
 0x33c   : > { %v1846_v41 = vpop.f32.mrb[42].mxu1  ;;  %6579 = vmatpush3.bf16.msra.mxu0 %v7194_v38 }
 0x33d   : > { %v1850_v43 = vpack.c.bf16 %v1846_v41, %v1843_v39  ;;  %v6571_v44 = vpop.f32.mrb[43].mxu1  ;;  %6596 = vmatprep.subr.bf16.mxu0 %v7375_v5 }
 0x33f   : > { %6581 = vmatmul.mubr.msk.bf16.vlgmr.msra.gmra.mrb[48].mxu0 %vm490_vm10, %v1850_v43 }
 0x340   : > { %6597 = vmatpush3.bf16.msra.mxu0 %v7195_v42  ;;  %6604 = vmatprep.mubr.msk.bf16.mxu0 %vm7376_vm1, %v7375_v5 }
 0x341   : > { %6598 = vmatprep.subr.bf16.mxu0 %v7375_v5 }
 0x344   : > { %6599 = vmatpush3.bf16.msra.mxu0 %v7196_v45 }
 0x345   : > { %6600 = vmatprep.subr.bf16.mxu0 %v7375_v5 }
 0x348   : > { %6601 = vmatpush3.bf16.msra.mxu0 %v7197_v46 }
 0x349   : > { %6602 = vmatprep.subr.bf16.mxu0 %v7375_v5 }
 0x34a   : > { %v1975_v48 = vpop.f32.mrb[44].mxu1 }
 0x34b   : > { %v6594_v49 = vpop.f32.mrb[45].mxu1 }
 0x34c   : > { %v1978_v50 = vpop.f32.mrb[46].mxu1  ;;  %6603 = vmatpush3.bf16.msra.mxu0 %v7198_v47 }
 0x34d   : > { %v1982_v52 = vpack.c.bf16 %v1978_v50, %v1975_v48  ;;  %v6595_v53 = vpop.f32.mrb[47].mxu1  ;;  %6620 = vmatprep.subr.bf16.mxu0 %v7375_v5 }
 0x34f   : > { %6605 = vmatmul.mubr.msk.bf16.vlgmr.msra.gmra.mrb[52].mxu0 %vm490_vm10, %v1982_v52 }
 0x350   : > { %6621 = vmatpush3.bf16.msra.mxu0 %v7199_v51  ;;  %6628 = vmatprep.mubr.msk.bf16.mxu0 %vm7376_vm1, %v7375_v5 }
 0x351   : > { %6622 = vmatprep.subr.bf16.mxu0 %v7375_v5 }
 0x354   : > { %6623 = vmatpush3.bf16.msra.mxu0 %v7200_v54 }
 0x355   : > { %6624 = vmatprep.subr.bf16.mxu0 %v7375_v5 }
 0x358   : > { %6625 = vmatpush3.bf16.msra.mxu0 %v7201_v55 }
 0x359   : > { %6626 = vmatprep.subr.bf16.mxu0 %v7375_v5 }
 0x35a   : > { %v2107_v57 = vpop.f32.mrb[48].mxu1 }
 0x35b   : > { %v6618_v58 = vpop.f32.mrb[49].mxu1 }
 0x35c   : > { %v2110_v59 = vpop.f32.mrb[50].mxu1  ;;  %6627 = vmatpush3.bf16.msra.mxu0 %v7202_v56 }
 0x35d   : > { %v2114_v61 = vpack.c.bf16 %v2110_v59, %v2107_v57  ;;  %v6619_v62 = vpop.f32.mrb[51].mxu1  ;;  %6644 = vmatprep.subr.bf16.mxu0 %v7375_v5 }
 0x35f   : > { %6629 = vmatmul.mubr.msk.bf16.vlgmr.msra.gmra.mrb[56].mxu0 %vm490_vm10, %v2114_v61 }
 0x360   : > { %6645 = vmatpush3.bf16.msra.mxu0 %v7203_v60  ;;  %6652 = vmatprep.mubr.msk.bf16.mxu0 %vm7376_vm1, %v7375_v5 }
 0x361   : > { %6646 = vmatprep.subr.bf16.mxu0 %v7375_v5 }
 0x364   : > { %6647 = vmatpush3.bf16.msra.mxu0 %v7204_v63 }
 0x365   : > { %6648 = vmatprep.subr.bf16.mxu0 %v7375_v5 }
 0x368   : > { %6649 = vmatpush3.bf16.msra.mxu0 %v7205_v0 }
 0x369   : > { %6650 = vmatprep.subr.bf16.mxu0 %v7375_v5 }
 0x36a   : > { %v2239_v2 = vpop.f32.mrb[52].mxu1 }
 0x36b   : > { %v6642_v3 = vpop.f32.mrb[53].mxu1 }
 0x36c   : > { %v2242_v4 = vpop.f32.mrb[54].mxu1  ;;  %6651 = vmatpush3.bf16.msra.mxu0 %v7206_v1 }
 0x36d   : > { %v2246_v7 = vpack.c.bf16 %v2242_v4, %v2239_v2  ;;  %v6643_v8 = vpop.f32.mrb[55].mxu1  ;;  %6668 = vmatprep.subr.bf16.mxu0 %v7375_v5  ;;  %v7219_v4 = vld [vmem:[%s8723_s7 + $0x40] sm:$0xff]  }
 0x36e   : > { %6717 = vmatpush3.bf16.msra.mxu1 %v7219_v4  ;;  %v7228_v4 = vld [vmem:[%s8723_s7 + $0x30] sm:$0xff]  }
 0x36f   : > { %6653 = vmatmul.mubr.msk.bf16.vlgmr.msra.gmra.mrb[60].mxu0 %vm490_vm10, %v2246_v7  ;;  %6718 = vmatprep.subr.bf16.mxu1 %v7375_v5  ;;  %v7221_v7 = vld [vmem:[%s8723_s7 + $0x48] sm:$0xff]  }
 0x370   : > { %6669 = vmatpush3.bf16.msra.mxu0 %v7207_v6  ;;  %6676 = vmatprep.mubr.msk.bf16.mxu0 %vm7376_vm1, %v7375_v5 }
 0x371   : > { %6670 = vmatprep.subr.bf16.mxu0 %v7375_v5 }
 0x372   : > { %6719 = vmatpush3.bf16.msra.mxu1 %v7221_v7  ;;  %v7230_v7 = vld [vmem:[%s8723_s7 + $0x38] sm:$0xff]  }
 0x373   : > { %6720 = vmatprep.subr.bf16.mxu1 %v7375_v5 }
 0x374   : > { %6671 = vmatpush3.bf16.msra.mxu0 %v7208_v9 }
 0x375   : > { %6672 = vmatprep.subr.bf16.mxu0 %v7375_v5 }
 0x378   : > { %6673 = vmatpush3.bf16.msra.mxu0 %v7209_v10 }
 0x379   : > { %6674 = vmatprep.subr.bf16.mxu0 %v7375_v5 }
 0x37a   : > { %v2371_v12 = vpop.f32.mrb[56].mxu1 }
 0x37b   : > { %v6666_v13 = vpop.f32.mrb[57].mxu1 }
 0x37c   : > { %v2374_v14 = vpop.f32.mrb[58].mxu1  ;;  %6675 = vmatpush3.bf16.msra.mxu0 %v7210_v11  ;;  %v7223_v13 = vld [vmem:[%s8723_s7 + $0x50] sm:$0xff]  }
 0x37d   : > { %v2378_v16 = vpack.c.bf16 %v2374_v14, %v2371_v12  ;;  %v6667_v17 = vpop.f32.mrb[59].mxu1  ;;  %6692 = vmatprep.subr.bf16.mxu0 %v7375_v5  ;;  %6721 = vmatpush3.bf16.msra.mxu1 %v7223_v13  ;;  %v7225_v14 = vld [vmem:[%s8723_s7 + $0x58] sm:$0xff]   ;;  %v7235_v13 = vld [vmem:[%s8723_s7 + $0x80] sm:$0xff]  }
 0x37e   : > { %6722 = vmatprep.subr.bf16.mxu1 %v7375_v5 }
 0x37f   : > { %6677 = vmatmul.mubr.msk.bf16.vlgmr.msra.gmra.mrb[64].mxu0 %vm490_vm10, %v2378_v16 }
 0x380   : > { %6693 = vmatpush3.bf16.msra.mxu0 %v7211_v15  ;;  %6700 = vmatprep.mubr.msk.bf16.mxu0 %vm7376_vm1, %v7375_v5  ;;  %v7227_v15 = vld [vmem:[%s8723_s7 + $0x60] sm:$0xff]  }
 0x381   : > { %6694 = vmatprep.subr.bf16.mxu0 %v7375_v5  ;;  %6723 = vmatpush3.bf16.msra.mxu1 %v7225_v14 }
 0x382   : > { %6724 = vmatprep.subr.bf16.mxu1 %v7375_v5 }
 0x384   : > { %6695 = vmatpush3.bf16.msra.mxu0 %v7212_v18 }
 0x385   : > { %6696 = vmatprep.subr.bf16.mxu0 %v7375_v5  ;;  %6725 = vmatpush3.bf16.msra.mxu1 %v7227_v15 }
 0x386   : > { %6726 = vmatprep.subr.bf16.mxu1 %v7375_v5 }
 0x388   : > { %6697 = vmatpush3.bf16.msra.mxu0 %v7213_v20 }
 0x389   : > { %6698 = vmatprep.subr.bf16.mxu0 %v7375_v5 }
 0x38a   : > { %v2503_v23 = vpop.f32.mrb[60].mxu1 }
 0x38b   : > { %v6690_v24 = vpop.f32.mrb[61].mxu1 }
 0x38c   : > { %v2506_v27 = vpop.f32.mrb[62].mxu1  ;;  %6699 = vmatpush3.bf16.msra.mxu0 %v7214_v21 }
 0x38d   : > { %v2510_v25 = vpack.c.bf16 %v2506_v27, %v2503_v23  ;;  %v6691_v28 = vpop.f32.mrb[63].mxu1  ;;  %6704 = vmatprep.subr.bf16.mxu0 %v7375_v5 }
 0x38f   : > { %6701 = vmatmul.mubr.msk.bf16.vlgmr.msra.gmra.mrb[68].mxu0 %vm490_vm10, %v2510_v25 }
 0x390   : > { %6706 = vmatprep.mubr.msk.bf16.mxu0 %vm7376_vm1, %v7375_v5 }
 0x392   : > { %v865_v22 = vpop.f32.mrb[16].mxu0 }
 0x393   : > { %v872_v29 = vadd.f32 %v865_v22, %v7731_v19  ;;  %v6390_v30 = vpop.f32.mrb[17].mxu0 }
 0x394   : > { %v868_v31 = vpop.f32.mrb[18].mxu0 }
 0x395   : > { %v873_v32 = vadd.f32 %v868_v31, %v7734_v26  ;;  %v6391_v33 = vpop.f32.mrb[19].mxu0 }
 0x3a2   : > { %v997_v34 = vpop.f32.mrb[20].mxu0 }
 0x3a3   : > { %v1004_v35 = vadd.f32 %v997_v34, %v872_v29  ;;  %v6414_v36 = vpop.f32.mrb[21].mxu0 }
 0x3a4   : > { %v1000_v37 = vpop.f32.mrb[22].mxu0 }
 0x3a5   : > { %v1005_v38 = vadd.f32 %v1000_v37, %v873_v32  ;;  %v6415_v39 = vpop.f32.mrb[23].mxu0 }
 0x3b2   : > { %v1129_v40 = vpop.f32.mrb[24].mxu0 }
 0x3b3   : > { %v1136_v41 = vadd.f32 %v1129_v40, %v1004_v35  ;;  %v6438_v42 = vpop.f32.mrb[25].mxu0 }
 0x3b4   : > { %v1132_v43 = vpop.f32.mrb[26].mxu0 }
 0x3b5   : > { %v1137_v44 = vadd.f32 %v1132_v43, %v1005_v38  ;;  %v6439_v45 = vpop.f32.mrb[27].mxu0 }
 0x3c2   : > { %v1261_v46 = vpop.f32.mrb[28].mxu0 }
 0x3c3   : > { %v1268_v47 = vadd.f32 %v1261_v46, %v1136_v41  ;;  %v6462_v19 = vpop.f32.mrb[29].mxu0 }
 0x3c4   : > { %v1264_v48 = vpop.f32.mrb[30].mxu0 }
 0x3c5   : > { %v1269_v49 = vadd.f32 %v1264_v48, %v1137_v44  ;;  %v6463_v50 = vpop.f32.mrb[31].mxu0  ;;  %v5533_v48 = vld [vmem:[%s8721_s5] ss:$0 sm:$0xff] }
 0x3d2   : > { %v1393_v26 = vpop.f32.mrb[32].mxu0 }
 0x3d3   : > { %v1400_v51 = vadd.f32 %v1393_v26, %v1268_v47  ;;  %v6486_v52 = vpop.f32.mrb[33].mxu0 }
 0x3d4   : > { %v1396_v53 = vpop.f32.mrb[34].mxu0 }
 0x3d5   : > { %v1401_v54 = vadd.f32 %v1396_v53, %v1269_v49  ;;  %v6487_v55 = vpop.f32.mrb[35].mxu0 }
 0x3e2   : > { %v1525_v56 = vpop.f32.mrb[36].mxu0 }
 0x3e3   : > { %v1532_v57 = vadd.f32 %v1525_v56, %v1400_v51  ;;  %v6510_v58 = vpop.f32.mrb[37].mxu0 }
 0x3e4   : > { %v1528_v59 = vpop.f32.mrb[38].mxu0 }
 0x3e5   : > { %v1533_v60 = vadd.f32 %v1528_v59, %v1401_v54  ;;  %v6511_v61 = vpop.f32.mrb[39].mxu0 }
 0x3e6   : > { %v7216_v61 = vld [vmem:[%s8722_s6 + $0x8] sm:$0x1f]  }
 0x3f2   : > { %v1657_v62 = vpop.f32.mrb[40].mxu0 }
 0x3f3   : > { %v1664_v63 = vadd.f32 %v1657_v62, %v1532_v57  ;;  %v6534_v0 = vpop.f32.mrb[41].mxu0  ;;  %v7217_v62 = vld [vmem:[%s8723_s7] sm:$0xff]  }
 0x3f4   : > { %v1660_v1 = vpop.f32.mrb[42].mxu0  ;;  %v7220_v0 = vld [vmem:[%s8723_s7 + $0x10] sm:$0xff]  }
 0x3f5   : > { %v1665_v2 = vadd.f32 %v1660_v1, %v1533_v60  ;;  %v6535_v3 = vpop.f32.mrb[43].mxu0  ;;  %v7215_v60 = vld [vmem:[%s8722_s6] sm:$0x1f]   ;;  %v7222_v1 = vld [vmem:[%s8723_s7 + $0x18] sm:$0xff]  }
 0x3f6   : > { %v7226_v3 = vld [vmem:[%s8723_s7 + $0x28] sm:$0xff]  }
 0x402   : > { %v1789_v6 = vpop.f32.mrb[44].mxu0 }
 0x403   : > { %v1796_v8 = vadd.f32 %v1789_v6, %v1664_v63  ;;  %v6558_v9 = vpop.f32.mrb[45].mxu0  ;;  %v7218_v63 = vld [vmem:[%s8723_s7 + $0x8] sm:$0xff]  }
 0x404   : > { %v1792_v10 = vpop.f32.mrb[46].mxu0  ;;  %v7229_v6 = vld [vmem:[%s8723_s7 + $0x68] sm:$0xff]   ;;  %v7232_v9 = vld [vmem:[%s8723_s7 + $0x78] sm:$0xff]  }
 0x405   : > { %v1797_v11 = vadd.f32 %v1792_v10, %v1665_v2  ;;  %v6559_v12 = vpop.f32.mrb[47].mxu0  ;;  %v7224_v2 = vld [vmem:[%s8723_s7 + $0x20] sm:$0xff]   ;;  %6727 = vmatpush3.bf16.msra.mxu1 %v7229_v6  ;;  %v7261_v6 = vld [vmem:[%s8723_s7 + $0x128] sm:$0xff]  }
 0x406   : > { %6728 = vmatprep.subr.bf16.mxu1 %v7375_v5 }
 0x412   : > { %v1921_v16 = vpop.f32.mrb[48].mxu0 }
 0x413   : > { %v1928_v17 = vadd.f32 %v1921_v16, %v1796_v8  ;;  %v6582_v18 = vpop.f32.mrb[49].mxu0  ;;  %v7231_v8 = vld [vmem:[%s8723_s7 + $0x70] sm:$0xff]   ;;  %v7236_v16 = vld [vmem:[%s8723_s7 + $0x88] sm:$0xff]  }
 0x414   : > { %v1924_v20 = vpop.f32.mrb[50].mxu0  ;;  %6729 = vmatpush3.bf16.msra.mxu1 %v7231_v8  ;;  %v7263_v8 = vld [vmem:[%s8723_s7 + $0x130] sm:$0xff]  }
 0x415   : > { %v1929_v21 = vadd.f32 %v1924_v20, %v1797_v11  ;;  %v6583_v23 = vpop.f32.mrb[51].mxu0  ;;  %6730 = vmatprep.subr.bf16.mxu1 %v7375_v5 }
 0x418   : > { %6731 = vmatpush3.bf16.msra.mxu1 %v7232_v9  ;;  %v7264_v9 = vld [vmem:[%s8723_s7 + $0x160] sm:$0xff]  }
 0x419   : > { %6756 = vmatprep.subr.bf16.mxu1 %v7375_v5 }
 0x422   : > { %v2053_v24 = vpop.f32.mrb[52].mxu0 }
 0x423   : > { %v2060_v27 = vadd.f32 %v2053_v24, %v1928_v17  ;;  %v6606_v25 = vpop.f32.mrb[53].mxu0  ;;  %v7237_v24 = vld [vmem:[%s8723_s7 + $0x90] sm:$0xff]  }
 0x424   : > { %v2056_v28 = vpop.f32.mrb[54].mxu0  ;;  %v7234_v25 = vld [vmem:[%s8722_s6 + $0x18] sm:$0x1f]  }
 0x425   : > { %v2061_v22 = vadd.f32 %v2056_v28, %v1929_v21  ;;  %v6607_v29 = vpop.f32.mrb[55].mxu0  ;;  %v7238_v28 = vld [vmem:[%s8723_s7 + $0xc0] sm:$0xff]  }
 0x426   : > { %v7240_v29 = vld [vmem:[%s8723_s7 + $0xc8] sm:$0xff]  }
 0x432   : > { %v2185_v30 = vpop.f32.mrb[56].mxu0 }
 0x433   : > { %v2192_v31 = vadd.f32 %v2185_v30, %v2060_v27  ;;  %v6630_v32 = vpop.f32.mrb[57].mxu0  ;;  %v7233_v27 = vld [vmem:[%s8722_s6 + $0x10] sm:$0x1f]   ;;  %v7241_v30 = vld [vmem:[%s8723_s7 + $0xa0] sm:$0xff]  }
 0x434   : > { %v2188_v33 = vpop.f32.mrb[58].mxu0  ;;  %v7243_v32 = vld [vmem:[%s8723_s7 + $0xa8] sm:$0xff]  }
 0x435   : > { %v2193_v34 = vadd.f32 %v2188_v33, %v2061_v22  ;;  %v6631_v35 = vpop.f32.mrb[59].mxu0  ;;  %v7239_v22 = vld [vmem:[%s8723_s7 + $0x98] sm:$0xff]  }
 0x436   : > { %v7244_v33 = vld [vmem:[%s8723_s7 + $0xd8] sm:$0xff]   ;;  %v7246_v35 = vld [vmem:[%s8723_s7 + $0xe0] sm:$0xff]  }
 0x442   : > { %v2317_v36 = vpop.f32.mrb[60].mxu0 }
 0x443   : > { %v2324_v37 = vadd.f32 %v2317_v36, %v2192_v31  ;;  %v6654_v38 = vpop.f32.mrb[61].mxu0  ;;  %v7242_v31 = vld [vmem:[%s8723_s7 + $0xd0] sm:$0xff]   ;;  %v7247_v36 = vld [vmem:[%s8723_s7 + $0xb8] sm:$0xff]  }
 0x444   : > { %v2320_v39 = vpop.f32.mrb[62].mxu0  ;;  %v7249_v38 = vld [vmem:[%s8723_s7 + $0xf0] sm:$0xff]  }
 0x445   : > { %v2325_v40 = vadd.f32 %v2320_v39, %v2193_v34  ;;  %v6655_v41 = vpop.f32.mrb[63].mxu0  ;;  %v7245_v34 = vld [vmem:[%s8723_s7 + $0xb0] sm:$0xff]   ;;  %v7250_v39 = vld [vmem:[%s8723_s7 + $0xf8] sm:$0xff]  }
 0x452   : > { %v2449_v42 = vpop.f32.mrb[64].mxu0 }
 0x453   : > { %v2456_v43 = vadd.f32 %v2449_v42, %v2324_v37  ;;  %v6678_v44 = vpop.f32.mrb[65].mxu0  ;;  %v7248_v37 = vld [vmem:[%s8723_s7 + $0xe8] sm:$0xff]  }
 0x454   : > { %v2452_v45 = vpop.f32.mrb[66].mxu0 }
 0x455   : > { %v2457_v46 = vadd.f32 %v2452_v45, %v2325_v40  ;;  %v6679_v47 = vpop.f32.mrb[67].mxu0 }
 0x462   : > { %v2581_v19 = vpop.f32.mrb[68].mxu0 }
 0x463   : > { %v2588_v49 = vadd.f32 %v2581_v19, %v2456_v43  ;;  %v6702_v50 = vpop.f32.mrb[69].mxu0 }
 0x464   : > { %v2584_v26 = vpop.f32.mrb[70].mxu0 }
 0x465   : > { %v2597_v51 = vadd.f32 %v5533_v48, %v2588_v49  ;;  %v2589_v52 = vadd.f32 %v2584_v26, %v2457_v46  ;;  %v6703_v53 = vpop.f32.mrb[71].mxu0 }
 0x467   : > { %v2601_v54 = vmul.f32 0.2, %v2597_v51  ;;  %v2598_v55 = vadd.f32 %v5533_v48, %v2589_v52  ;;  %vm2599_vm11 = vcmp.gt.f32.partialorder %v2597_v51, 0.0 }
 0x469   : > { %vm2600_vm12 = vcmp.gt.f32.partialorder %v2598_v55, 0.0  ;;  %v2602_v56 = vmul.f32 0.2, %v2598_v55  ;;  %v2603_v57 = vsel %vm2599_vm11, %v2597_v51, %v2601_v54 }
 0x46b   : > { %v2604_v58 = vsel %vm2600_vm12, %v2598_v55, %v2602_v56  ;;  %v7251_v55 = vld [vmem:[%s8722_s6 + $0x20] sm:$0x1f]  }
 0x46c   : > { %v8022_v59 = vpack.c.bf16 %v2604_v58, %v2603_v57 }
 0x46e   : > { %6705 = vmatpush3.bf16.msra.mxu0 %v8022_v59 }
 0x46f   : > { %6710 = vmatprep.subr.bf16.mxu0 %v7375_v5 }
 0x471   : > { %6707 = vmatmul.mubr.msk.bf16.vlgmr.msra.gmra.mrb[72].mxu0 %vm377_vm0, %v7215_v60  ;;  %v7253_v60 = vld [vmem:[%s8723_s7 + $0x100] sm:$0xff]  }
 0x472   : > { %6711 = vmatpush3.bf16.msra.mxu0 %v8022_v59  ;;  %6712 = vmatprep.mubr.msk.bf16.mxu0 %vm7376_vm1, %v7375_v5 }
 0x473   : > { %6736 = vmatprep.subr.bf16.mxu0 %v7375_v5 }
 0x479   : > { %6713 = vmatmul.mubr.msk.bf16.vlgmr.msra.gmra.mrb[76].mxu0 %vm377_vm0, %v7216_v61  ;;  %v7254_v61 = vld [vmem:[%s8723_s7 + $0x108] sm:$0xff]  }
 0x47a   : > { %6737 = vmatpush3.bf16.msra.mxu0 %v7217_v62  ;;  %6752 = vmatprep.mubr.msk.bf16.mxu0 %vm7376_vm1, %v7375_v5  ;;  %v7252_v62 = vld [vmem:[%s8722_s6 + $0x28] sm:$0x1f]  }
 0x47b   : > { %6738 = vmatprep.subr.bf16.mxu0 %v7375_v5 }
 0x47e   : > { %6739 = vmatpush3.bf16.msra.mxu0 %v7218_v63  ;;  %v7256_v63 = vld [vmem:[%s8723_s7 + $0x140] sm:$0xff]  }
 0x47f   : > { %6740 = vmatprep.subr.bf16.mxu0 %v7375_v5 }
 0x482   : > { %6741 = vmatpush3.bf16.msra.mxu0 %v7220_v0  ;;  %v7255_v0 = vld [vmem:[%s8723_s7 + $0x110] sm:$0xff]  }
 0x483   : > { %6742 = vmatprep.subr.bf16.mxu0 %v7375_v5 }
 0x486   : > { %6743 = vmatpush3.bf16.msra.mxu0 %v7222_v1  ;;  %v7258_v1 = vld [vmem:[%s8723_s7 + $0x148] sm:$0xff]  }
 0x487   : > { %6744 = vmatprep.subr.bf16.mxu0 %v7375_v5 }
 0x48a   : > { %6745 = vmatpush3.bf16.msra.mxu0 %v7224_v2  ;;  %v7257_v2 = vld [vmem:[%s8723_s7 + $0x118] sm:$0xff]  }
 0x48b   : > { %6746 = vmatprep.subr.bf16.mxu0 %v7375_v5 }
 0x48e   : > { %6747 = vmatpush3.bf16.msra.mxu0 %v7226_v3  ;;  %v7260_v3 = vld [vmem:[%s8723_s7 + $0x150] sm:$0xff]  }
 0x48f   : > { %6748 = vmatprep.subr.bf16.mxu0 %v7375_v5 }
 0x492   : > { %6749 = vmatpush3.bf16.msra.mxu0 %v7228_v4  ;;  %v7259_v4 = vld [vmem:[%s8723_s7 + $0x120] sm:$0xff]  }
 0x493   : > { %6750 = vmatprep.subr.bf16.mxu0 %v7375_v5 }
 0x496   : > { %6751 = vmatpush3.bf16.msra.mxu0 %v7230_v7  ;;  %v7262_v7 = vld [vmem:[%s8723_s7 + $0x158] sm:$0xff]  }
 0x497   : > { %6762 = vmatprep.subr.bf16.mxu0 %v7375_v5 }
 0x544   : > { %v2650_v10 = vpop.f32.mrb[72].mxu0 }
 0x545   : > { %v6708_v11 = vpop.f32.mrb[73].mxu0 }
 0x546   : > { %v2653_v12 = vpop.f32.mrb[74].mxu0  ;;  %v7266_v11 = vld [vmem:[%s8723_s7 + $0x168] sm:$0xff]  }
 0x547   : > { %v2657_v14 = vpack.c.bf16 %v2653_v12, %v2650_v10  ;;  %v6709_v15 = vpop.f32.mrb[75].mxu0  ;;  %v7265_v10 = vld [vmem:[%s8723_s7 + $0x138] sm:$0xff]   ;;  %v7267_v12 = vld [vmem:[%s8723_s7 + $0x170] sm:$0xff]  }
 0x549   : > { %6753 = vmatmul.mubr.bf16.vlgmr.msra.gmra.mrb[80].mxu0 %v2657_v14 }
 0x54a   : > { %6763 = vmatpush3.bf16.msra.mxu0 %v7235_v13  ;;  %6778 = vmatprep.mubr.msk.bf16.mxu0 %vm7376_vm1, %v7375_v5  ;;  %v7268_v13 = vld [vmem:[%s8723_s7 + $0x178] sm:$0xff]  }
 0x54b   : > { %6764 = vmatprep.subr.bf16.mxu0 %v7375_v5 }
 0x54c   : > { %v2719_v17 = vpop.f32.mrb[76].mxu0 }
 0x54d   : > { %v6714_v18 = vpop.f32.mrb[77].mxu0 }
 0x54e   : > { %v2722_v20 = vpop.f32.mrb[78].mxu0  ;;  %6765 = vmatpush3.bf16.msra.mxu0 %v7236_v16 }
 0x54f   : > { %v2726_v21 = vpack.c.bf16 %v2722_v20, %v2719_v17  ;;  %v6715_v23 = vpop.f32.mrb[79].mxu0  ;;  %6766 = vmatprep.subr.bf16.mxu0 %v7375_v5 }
 0x551   : > { %6733 = vmatmul.mubr.bf16.vlgmr.msra.gmra.mrb[64].mxu1 %v2726_v21 }
 0x552   : > { %6757 = vmatpush3.bf16.msra.mxu1 %v8022_v59  ;;  %6758 = vmatprep.mubr.msk.bf16.mxu1 %vm7376_vm1, %v7375_v5 }
 0x553   : > { %6782 = vmatprep.subr.bf16.mxu1 %v7375_v5  ;;  %6767 = vmatpush3.bf16.msra.mxu0 %v7237_v24 }
 0x554   : > { %6768 = vmatprep.subr.bf16.mxu0 %v7375_v5 }
 0x557   : > { %6769 = vmatpush3.bf16.msra.mxu0 %v7239_v22 }
 0x558   : > { %6770 = vmatprep.subr.bf16.mxu0 %v7375_v5 }
 0x559   : > { %6759 = vmatmul.mubr.msk.bf16.vlgmr.msra.gmra.mrb[68].mxu1 %vm377_vm0, %v7233_v27 }
 0x55a   : > { %6783 = vmatpush3.bf16.msra.mxu1 %v8022_v59  ;;  %6784 = vmatprep.mubr.msk.bf16.mxu1 %vm7376_vm1, %v7375_v5 }
 0x55b   : > { %6788 = vmatprep.subr.bf16.mxu1 %v7375_v5  ;;  %6771 = vmatpush3.bf16.msra.mxu0 %v7241_v30 }
 0x55c   : > { %6772 = vmatprep.subr.bf16.mxu0 %v7375_v5 }
 0x55f   : > { %6773 = vmatpush3.bf16.msra.mxu0 %v7243_v32 }
 0x560   : > { %6774 = vmatprep.subr.bf16.mxu0 %v7375_v5 }
 0x561   : > { %6785 = vmatmul.mubr.msk.bf16.vlgmr.msra.gmra.mrb[72].mxu1 %vm377_vm0, %v7234_v25 }
 0x562   : > { %6789 = vmatpush3.bf16.msra.mxu1 %v7238_v28  ;;  %6804 = vmatprep.mubr.msk.bf16.mxu1 %vm7376_vm1, %v7375_v5 }
 0x563   : > { %6790 = vmatprep.subr.bf16.mxu1 %v7375_v5  ;;  %6775 = vmatpush3.bf16.msra.mxu0 %v7245_v34 }
 0x564   : > { %6776 = vmatprep.subr.bf16.mxu0 %v7375_v5 }
 0x566   : > { %6791 = vmatpush3.bf16.msra.mxu1 %v7240_v29 }
 0x567   : > { %6792 = vmatprep.subr.bf16.mxu1 %v7375_v5  ;;  %6777 = vmatpush3.bf16.msra.mxu0 %v7247_v36 }
 0x568   : > { %6808 = vmatprep.subr.bf16.mxu0 %v7375_v5 }
 0x56a   : > { %6793 = vmatpush3.bf16.msra.mxu1 %v7242_v31 }
 0x56b   : > { %6794 = vmatprep.subr.bf16.mxu1 %v7375_v5 }
 0x56e   : > { %6795 = vmatpush3.bf16.msra.mxu1 %v7244_v33 }
 0x56f   : > { %6796 = vmatprep.subr.bf16.mxu1 %v7375_v5 }
 0x572   : > { %6797 = vmatpush3.bf16.msra.mxu1 %v7246_v35  ;;  %v7269_v35 = vld [vmem:[%s8722_s6 + $0x30] sm:$0x1f]  }
 0x573   : > { %6798 = vmatprep.subr.bf16.mxu1 %v7375_v5 }
 0x576   : > { %6799 = vmatpush3.bf16.msra.mxu1 %v7248_v37 }
 0x577   : > { %6800 = vmatprep.subr.bf16.mxu1 %v7375_v5 }
 0x57a   : > { %6801 = vmatpush3.bf16.msra.mxu1 %v7249_v38 }
 0x57b   : > { %6802 = vmatprep.subr.bf16.mxu1 %v7375_v5 }
 0x57e   : > { %6803 = vmatpush3.bf16.msra.mxu1 %v7250_v39  ;;  %v7271_v39 = vld [vmem:[%s8723_s7 + $0x180] sm:$0xff]  }
 0x57f   : > { %6834 = vmatprep.subr.bf16.mxu1 %v7375_v5 }
 0x61c   : > { %v2915_v40 = vpop.f32.mrb[80].mxu0 }
 0x61d   : > { %v6754_v41 = vpop.f32.mrb[81].mxu0 }
 0x61e   : > { %v2918_v42 = vpop.f32.mrb[82].mxu0  ;;  %v7270_v41 = vld [vmem:[%s8722_s6 + $0x38] sm:$0x1f]  }
 0x61f   : > { %v6755_v43 = vpop.f32.mrb[83].mxu0 }
 0x620   : > { %v7273_v43 = vld [vmem:[%s8723_s7 + $0x190] sm:$0xff]  }
 0x624   : > { %v2826_v44 = vpop.f32.mrb[64].mxu1 }
 0x625   : > { %v8168_v45 = vadd.f32 %v2915_v40, %v2826_v44  ;;  %v6734_v46 = vpop.f32.mrb[65].mxu1  ;;  %v7272_v40 = vld [vmem:[%s8723_s7 + $0x188] sm:$0xff]  }
 0x626   : > { %v2829_v47 = vpop.f32.mrb[66].mxu1  ;;  %v7276_v44 = vld [vmem:[%s8723_s7 + $0x1c8] sm:$0xff]   ;;  %v7278_v46 = vld [vmem:[%s8723_s7 + $0x1d0] sm:$0xff]  }
 0x627   : > { %v8170_v19 = vadd.f32 %v2918_v42, %v2829_v47  ;;  %v6735_v48 = vpop.f32.mrb[67].mxu1  ;;  %v7274_v42 = vld [vmem:[%s8723_s7 + $0x1c0] sm:$0xff]  }
 0x628   : > { %v7277_v47 = vld [vmem:[%s8723_s7 + $0x1a0] sm:$0xff]   ;;  %v7280_v48 = vld [vmem:[%s8723_s7 + $0x1d8] sm:$0xff]  }
 0x62c   : > { %v2967_v49 = vpop.f32.mrb[68].mxu1 }
 0x62d   : > { %v6760_v50 = vpop.f32.mrb[69].mxu1 }
 0x62e   : > { %v2970_v26 = vpop.f32.mrb[70].mxu1  ;;  %v7282_v50 = vld [vmem:[%s8723_s7 + $0x1e0] sm:$0xff]  }
 0x62f   : > { %v2974_v51 = vpack.c.bf16 %v2970_v26, %v2967_v49  ;;  %v6761_v52 = vpop.f32.mrb[71].mxu1  ;;  %v7281_v49 = vld [vmem:[%s8723_s7 + $0x1b0] sm:$0xff]   ;;  %v7283_v26 = vld [vmem:[%s8723_s7 + $0x1b8] sm:$0xff]  }
 0x630   : > { %v7285_v52 = vld [vmem:[%s8723_s7 + $0x1f0] sm:$0xff]  }
 0x631   : > { %6779 = vmatmul.mubr.bf16.vlgmr.msra.gmra.mrb[84].mxu0 %v2974_v51  ;;  %v7284_v51 = vld [vmem:[%s8723_s7 + $0x1e8] sm:$0xff]  }
 0x632   : > { %6809 = vmatpush3.bf16.msra.mxu0 %v8022_v59  ;;  %6810 = vmatprep.mubr.msk.bf16.mxu0 %vm7376_vm1, %v7375_v5 }
 0x633   : > { %6814 = vmatprep.subr.bf16.mxu0 %v7375_v5 }
 0x634   : > { %v3128_v53 = vpop.f32.mrb[72].mxu1 }
 0x635   : > { %v6786_v54 = vpop.f32.mrb[73].mxu1 }
 0x636   : > { %v3131_v56 = vpop.f32.mrb[74].mxu1 }
 0x637   : > { %v3135_v57 = vpack.c.bf16 %v3131_v56, %v3128_v53  ;;  %v6787_v58 = vpop.f32.mrb[75].mxu1  ;;  %v7286_v53 = vld [vmem:[%s8723_s7 + $0x1f8] sm:$0xff]  }
 0x639   : > { %6805 = vmatmul.mubr.bf16.vlgmr.msra.gmra.mrb[76].mxu1 %v3135_v57  ;;  %6811 = vmatmul.mubr.msk.bf16.vlgmr.msra.gmra.mrb[88].mxu0 %vm377_vm0, %v7251_v55 }
 0x63a   : > { %6835 = vmatpush3.bf16.msra.mxu1 %v8022_v59  ;;  %6836 = vmatprep.mubr.msk.bf16.mxu1 %vm7376_vm1, %v7375_v5 }
 0x63b   : > { %6815 = vmatpush3.bf16.msra.mxu0 %v7253_v60  ;;  %6840 = vmatprep.subr.bf16.mxu1 %v7375_v5 }
 0x63c   : > { %6816 = vmatprep.subr.bf16.mxu0 %v7375_v5  ;;  %6830 = vmatprep.mubr.msk.bf16.mxu0 %vm7376_vm1, %v7375_v5 }
 0x63f   : > { %6817 = vmatpush3.bf16.msra.mxu0 %v7254_v61 }
 0x640   : > { %6818 = vmatprep.subr.bf16.mxu0 %v7375_v5 }
 0x641   : > { %6837 = vmatmul.mubr.msk.bf16.vlgmr.msra.gmra.mrb[80].mxu1 %vm377_vm0, %v7252_v62 }
 0x642   : > { %6841 = vmatpush3.bf16.msra.mxu1 %v7256_v63  ;;  %6856 = vmatprep.mubr.msk.bf16.mxu1 %vm7376_vm1, %v7375_v5 }
 0x643   : > { %6819 = vmatpush3.bf16.msra.mxu0 %v7255_v0  ;;  %6842 = vmatprep.subr.bf16.mxu1 %v7375_v5 }
 0x644   : > { %6820 = vmatprep.subr.bf16.mxu0 %v7375_v5 }
 0x646   : > { %6843 = vmatpush3.bf16.msra.mxu1 %v7258_v1 }
 0x647   : > { %6821 = vmatpush3.bf16.msra.mxu0 %v7257_v2  ;;  %6844 = vmatprep.subr.bf16.mxu1 %v7375_v5 }
 0x648   : > { %6822 = vmatprep.subr.bf16.mxu0 %v7375_v5 }
 0x64a   : > { %6845 = vmatpush3.bf16.msra.mxu1 %v7260_v3 }
 0x64b   : > { %6823 = vmatpush3.bf16.msra.mxu0 %v7259_v4  ;;  %6846 = vmatprep.subr.bf16.mxu1 %v7375_v5 }
 0x64c   : > { %6824 = vmatprep.subr.bf16.mxu0 %v7375_v5 }
 0x64e   : > { %6847 = vmatpush3.bf16.msra.mxu1 %v7262_v7 }
 0x64f   : > { %6825 = vmatpush3.bf16.msra.mxu0 %v7261_v6  ;;  %6848 = vmatprep.subr.bf16.mxu1 %v7375_v5 }
 0x650   : > { %6826 = vmatprep.subr.bf16.mxu0 %v7375_v5 }
 0x652   : > { %6849 = vmatpush3.bf16.msra.mxu1 %v7264_v9 }
 0x653   : > { %6827 = vmatpush3.bf16.msra.mxu0 %v7263_v8  ;;  %6850 = vmatprep.subr.bf16.mxu1 %v7375_v5 }
 0x654   : > { %6828 = vmatprep.subr.bf16.mxu0 %v7375_v5 }
 0x656   : > { %6851 = vmatpush3.bf16.msra.mxu1 %v7266_v11  ;;  %v7287_v11 = vld [vmem:[%s8722_s6 + $0x40] sm:$0x1f]  }
 0x657   : > { %6829 = vmatpush3.bf16.msra.mxu0 %v7265_v10  ;;  %6852 = vmatprep.subr.bf16.mxu1 %v7375_v5 }
 0x658   : > { %6860 = vmatprep.subr.bf16.mxu0 %v7375_v5 }
 0x65a   : > { %6853 = vmatpush3.bf16.msra.mxu1 %v7267_v12 }
 0x65b   : > { %6854 = vmatprep.subr.bf16.mxu1 %v7375_v5 }
 0x65e   : > { %6855 = vmatpush3.bf16.msra.mxu1 %v7268_v13 }
 0x65f   : > { %6886 = vmatprep.subr.bf16.mxu1 %v7375_v5 }
 0x704   : > { %v3074_v14 = vpop.f32.mrb[84].mxu0 }
 0x705   : > { %v3081_v15 = vadd.f32 %v3074_v14, %v8168_v45  ;;  %v6780_v16 = vpop.f32.mrb[85].mxu0  ;;  %v7275_v45 = vld [vmem:[%s8723_s7 + $0x198] sm:$0xff]  }
 0x706   : > { %v3077_v17 = vpop.f32.mrb[86].mxu0  ;;  %v7290_v16 = vld [vmem:[%s8723_s7 + $0x208] sm:$0xff]  }
 0x707   : > { %v3082_v18 = vadd.f32 %v3077_v17, %v8170_v19  ;;  %v6781_v20 = vpop.f32.mrb[87].mxu0  ;;  %v7279_v19 = vld [vmem:[%s8723_s7 + $0x1a8] sm:$0xff]  }
 0x708   : > { %v7288_v17 = vld [vmem:[%s8722_s6 + $0x48] sm:$0x1f]   ;;  %v7291_v20 = vld [vmem:[%s8723_s7 + $0x210] sm:$0xff]  }
 0x70c   : > { %v3235_v21 = vpop.f32.mrb[76].mxu1  ;;  %v3289_v23 = vpop.f32.mrb[88].mxu0 }
 0x70d   : > { %v8258_v24 = vadd.f32 %v3235_v21, %v3081_v15  ;;  %v6806_v27 = vpop.f32.mrb[77].mxu1  ;;  %v6812_v25 = vpop.f32.mrb[89].mxu0  ;;  %v7289_v15 = vld [vmem:[%s8723_s7 + $0x200] sm:$0xff]   ;;  %v7294_v21 = vld [vmem:[%s8723_s7 + $0x248] sm:$0xff]  }
 0x70e   : > { %v3238_v28 = vpop.f32.mrb[78].mxu1  ;;  %v3292_v22 = vpop.f32.mrb[90].mxu0  ;;  %v7295_v27 = vld [vmem:[%s8723_s7 + $0x220] sm:$0xff]   ;;  %v7297_v25 = vld [vmem:[%s8723_s7 + $0x228] sm:$0xff]  }
 0x70f   : > { %v8260_v29 = vadd.f32 %v3238_v28, %v3082_v18  ;;  %v3296_v30 = vpack.c.bf16 %v3292_v22, %v3289_v23  ;;  %v6807_v31 = vpop.f32.mrb[79].mxu1  ;;  %v6813_v32 = vpop.f32.mrb[91].mxu0  ;;  %v7292_v18 = vld [vmem:[%s8723_s7 + $0x240] sm:$0xff]   ;;  %v7293_v23 = vld [vmem:[%s8723_s7 + $0x218] sm:$0xff]   ;;  %v7299_v22 = vld [vmem:[%s8723_s7 + $0x230] sm:$0xff]  }
 0x710   : > { %v7298_v28 = vld [vmem:[%s8723_s7 + $0x258] sm:$0xff]   ;;  %v7302_v31 = vld [vmem:[%s8723_s7 + $0x268] sm:$0xff]   ;;  %v7303_v32 = vld [vmem:[%s8723_s7 + $0x270] sm:$0xff]  }
 0x711   : > { %6831 = vmatmul.mubr.bf16.vlgmr.msra.gmra.mrb[92].mxu0 %v3296_v30  ;;  %v7301_v30 = vld [vmem:[%s8723_s7 + $0x238] sm:$0xff]  }
 0x712   : > { %6861 = vmatpush3.bf16.msra.mxu0 %v8022_v59  ;;  %6862 = vmatprep.mubr.msk.bf16.mxu0 %vm7376_vm1, %v7375_v5 }
 0x713   : > { %6866 = vmatprep.subr.bf16.mxu0 %v7375_v5 }
 0x714   : > { %v3450_v33 = vpop.f32.mrb[80].mxu1 }
 0x715   : > { %v6838_v34 = vpop.f32.mrb[81].mxu1 }
 0x716   : > { %v3453_v36 = vpop.f32.mrb[82].mxu1 }
 0x717   : > { %v3457_v37 = vpack.c.bf16 %v3453_v36, %v3450_v33  ;;  %v6839_v38 = vpop.f32.mrb[83].mxu1  ;;  %v7304_v33 = vld [vmem:[%s8723_s7 + $0x278] sm:$0xff]  }
 0x719   : > { %6857 = vmatmul.mubr.bf16.vlgmr.msra.gmra.mrb[84].mxu1 %v3457_v37  ;;  %6863 = vmatmul.mubr.msk.bf16.vlgmr.msra.gmra.mrb[96].mxu0 %vm377_vm0, %v7269_v35 }
 0x71a   : > { %6887 = vmatpush3.bf16.msra.mxu1 %v8022_v59  ;;  %6888 = vmatprep.mubr.msk.bf16.mxu1 %vm7376_vm1, %v7375_v5 }
 0x71b   : > { %6867 = vmatpush3.bf16.msra.mxu0 %v7271_v39  ;;  %6892 = vmatprep.subr.bf16.mxu1 %v7375_v5 }
 0x71c   : > { %6868 = vmatprep.subr.bf16.mxu0 %v7375_v5  ;;  %6882 = vmatprep.mubr.msk.bf16.mxu0 %vm7376_vm1, %v7375_v5 }
 0x71f   : > { %6869 = vmatpush3.bf16.msra.mxu0 %v7272_v40 }
 0x720   : > { %6870 = vmatprep.subr.bf16.mxu0 %v7375_v5 }
 0x721   : > { %6889 = vmatmul.mubr.msk.bf16.vlgmr.msra.gmra.mrb[88].mxu1 %vm377_vm0, %v7270_v41 }
 0x722   : > { %6893 = vmatpush3.bf16.msra.mxu1 %v7274_v42  ;;  %6908 = vmatprep.mubr.msk.bf16.mxu1 %vm7376_vm1, %v7375_v5 }
 0x723   : > { %6871 = vmatpush3.bf16.msra.mxu0 %v7273_v43  ;;  %6894 = vmatprep.subr.bf16.mxu1 %v7375_v5 }
 0x724   : > { %6872 = vmatprep.subr.bf16.mxu0 %v7375_v5 }
 0x726   : > { %6895 = vmatpush3.bf16.msra.mxu1 %v7276_v44 }
 0x727   : > { %6873 = vmatpush3.bf16.msra.mxu0 %v7275_v45  ;;  %6896 = vmatprep.subr.bf16.mxu1 %v7375_v5 }
 0x728   : > { %6874 = vmatprep.subr.bf16.mxu0 %v7375_v5 }
 0x72a   : > { %6897 = vmatpush3.bf16.msra.mxu1 %v7278_v46 }
 0x72b   : > { %6875 = vmatpush3.bf16.msra.mxu0 %v7277_v47  ;;  %6898 = vmatprep.subr.bf16.mxu1 %v7375_v5 }
 0x72c   : > { %6876 = vmatprep.subr.bf16.mxu0 %v7375_v5 }
 0x72e   : > { %6899 = vmatpush3.bf16.msra.mxu1 %v7280_v48 }
 0x72f   : > { %6877 = vmatpush3.bf16.msra.mxu0 %v7279_v19  ;;  %6900 = vmatprep.subr.bf16.mxu1 %v7375_v5 }
 0x730   : > { %6878 = vmatprep.subr.bf16.mxu0 %v7375_v5 }
 0x732   : > { %6901 = vmatpush3.bf16.msra.mxu1 %v7282_v50 }
 0x733   : > { %6879 = vmatpush3.bf16.msra.mxu0 %v7281_v49  ;;  %6902 = vmatprep.subr.bf16.mxu1 %v7375_v5 }
 0x734   : > { %6880 = vmatprep.subr.bf16.mxu0 %v7375_v5 }
 0x736   : > { %6903 = vmatpush3.bf16.msra.mxu1 %v7284_v51  ;;  %v7305_v51 = vld [vmem:[%s8722_s6 + $0x50] sm:$0x1f]  }
 0x737   : > { %6881 = vmatpush3.bf16.msra.mxu0 %v7283_v26  ;;  %6904 = vmatprep.subr.bf16.mxu1 %v7375_v5 }
 0x738   : > { %6912 = vmatprep.subr.bf16.mxu0 %v7375_v5 }
 0x73a   : > { %6905 = vmatpush3.bf16.msra.mxu1 %v7285_v52 }
 0x73b   : > { %6906 = vmatprep.subr.bf16.mxu1 %v7375_v5 }
 0x73e   : > { %6907 = vmatpush3.bf16.msra.mxu1 %v7286_v53 }
 0x73f   : > { %6938 = vmatprep.subr.bf16.mxu1 %v7375_v5 }
 0x7e4   : > { %v3396_v54 = vpop.f32.mrb[92].mxu0 }
 0x7e5   : > { %v3403_v55 = vadd.f32 %v3396_v54, %v8258_v24  ;;  %v6832_v56 = vpop.f32.mrb[93].mxu0  ;;  %v7296_v24 = vld [vmem:[%s8723_s7 + $0x250] sm:$0xff]  }
 0x7e6   : > { %v3399_v57 = vpop.f32.mrb[94].mxu0  ;;  %v7308_v56 = vld [vmem:[%s8723_s7 + $0x288] sm:$0xff]  }
 0x7e7   : > { %v3404_v58 = vadd.f32 %v3399_v57, %v8260_v29  ;;  %v6833_v60 = vpop.f32.mrb[95].mxu0  ;;  %v7300_v29 = vld [vmem:[%s8723_s7 + $0x260] sm:$0xff]   ;;  %v7306_v57 = vld [vmem:[%s8722_s6 + $0x58] sm:$0x1f]  }
 0x7e8   : > { %v7309_v60 = vld [vmem:[%s8723_s7 + $0x290] sm:$0xff]  }
 0x7ec   : > { %v3557_v61 = vpop.f32.mrb[84].mxu1  ;;  %v3611_v62 = vpop.f32.mrb[96].mxu0 }
 0x7ed   : > { %v8348_v63 = vadd.f32 %v3557_v61, %v3403_v55  ;;  %v6858_v0 = vpop.f32.mrb[85].mxu1  ;;  %v6864_v1 = vpop.f32.mrb[97].mxu0  ;;  %v7307_v55 = vld [vmem:[%s8723_s7 + $0x280] sm:$0xff]   ;;  %v7312_v61 = vld [vmem:[%s8723_s7 + $0x2c8] sm:$0xff]  }
 0x7ee   : > { %v3560_v2 = vpop.f32.mrb[86].mxu1  ;;  %v3614_v3 = vpop.f32.mrb[98].mxu0  ;;  %v7313_v0 = vld [vmem:[%s8723_s7 + $0x2a0] sm:$0xff]   ;;  %v7315_v1 = vld [vmem:[%s8723_s7 + $0x2a8] sm:$0xff]  }
 0x7ef   : > { %v8350_v4 = vadd.f32 %v3560_v2, %v3404_v58  ;;  %v3618_v6 = vpack.c.bf16 %v3614_v3, %v3611_v62  ;;  %v6859_v7 = vpop.f32.mrb[87].mxu1  ;;  %v6865_v8 = vpop.f32.mrb[99].mxu0  ;;  %v7310_v58 = vld [vmem:[%s8723_s7 + $0x2c0] sm:$0xff]   ;;  %v7311_v62 = vld [vmem:[%s8723_s7 + $0x298] sm:$0xff]   ;;  %v7317_v3 = vld [vmem:[%s8723_s7 + $0x2b0] sm:$0xff]  }
 0x7f0   : > { %v7316_v2 = vld [vmem:[%s8723_s7 + $0x2d8] sm:$0xff]   ;;  %v7320_v7 = vld [vmem:[%s8723_s7 + $0x2e8] sm:$0xff]   ;;  %v7321_v8 = vld [vmem:[%s8723_s7 + $0x2f0] sm:$0xff]  }
 0x7f1   : > { %6883 = vmatmul.mubr.bf16.vlgmr.msra.gmra.mrb[100].mxu0 %v3618_v6  ;;  %v7319_v6 = vld [vmem:[%s8723_s7 + $0x2b8] sm:$0xff]  }
 0x7f2   : > { %6913 = vmatpush3.bf16.msra.mxu0 %v8022_v59  ;;  %6914 = vmatprep.mubr.msk.bf16.mxu0 %vm7376_vm1, %v7375_v5 }
 0x7f3   : > { %6918 = vmatprep.subr.bf16.mxu0 %v7375_v5 }
 0x7f4   : > { %v3772_v9 = vpop.f32.mrb[88].mxu1 }
 0x7f5   : > { %v6890_v10 = vpop.f32.mrb[89].mxu1 }
 0x7f6   : > { %v3775_v12 = vpop.f32.mrb[90].mxu1 }
 0x7f7   : > { %v3779_v13 = vpack.c.bf16 %v3775_v12, %v3772_v9  ;;  %v6891_v14 = vpop.f32.mrb[91].mxu1  ;;  %v7322_v9 = vld [vmem:[%s8723_s7 + $0x2f8] sm:$0xff]  }
 0x7f9   : > { %6909 = vmatmul.mubr.bf16.vlgmr.msra.gmra.mrb[92].mxu1 %v3779_v13  ;;  %6915 = vmatmul.mubr.msk.bf16.vlgmr.msra.gmra.mrb[104].mxu0 %vm377_vm0, %v7287_v11 }
 0x7fa   : > { %6939 = vmatpush3.bf16.msra.mxu1 %v8022_v59  ;;  %6940 = vmatprep.mubr.msk.bf16.mxu1 %vm7376_vm1, %v7375_v5 }
 0x7fb   : > { %6919 = vmatpush3.bf16.msra.mxu0 %v7289_v15  ;;  %6944 = vmatprep.subr.bf16.mxu1 %v7375_v5 }
 0x7fc   : > { %6920 = vmatprep.subr.bf16.mxu0 %v7375_v5  ;;  %6934 = vmatprep.mubr.msk.bf16.mxu0 %vm7376_vm1, %v7375_v5 }
 0x7ff   : > { %6921 = vmatpush3.bf16.msra.mxu0 %v7290_v16 }
 0x800   : > { %6922 = vmatprep.subr.bf16.mxu0 %v7375_v5 }
 0x801   : > { %6941 = vmatmul.mubr.msk.bf16.vlgmr.msra.gmra.mrb[96].mxu1 %vm377_vm0, %v7288_v17 }
 0x802   : > { %6945 = vmatpush3.bf16.msra.mxu1 %v7292_v18  ;;  %6960 = vmatprep.mubr.msk.bf16.mxu1 %vm7376_vm1, %v7375_v5 }
 0x803   : > { %6923 = vmatpush3.bf16.msra.mxu0 %v7291_v20  ;;  %6946 = vmatprep.subr.bf16.mxu1 %v7375_v5 }
 0x804   : > { %6924 = vmatprep.subr.bf16.mxu0 %v7375_v5 }
 0x806   : > { %6947 = vmatpush3.bf16.msra.mxu1 %v7294_v21 }
 0x807   : > { %6925 = vmatpush3.bf16.msra.mxu0 %v7293_v23  ;;  %6948 = vmatprep.subr.bf16.mxu1 %v7375_v5 }
 0x808   : > { %6926 = vmatprep.subr.bf16.mxu0 %v7375_v5 }
 0x80a   : > { %6949 = vmatpush3.bf16.msra.mxu1 %v7296_v24 }
 0x80b   : > { %6927 = vmatpush3.bf16.msra.mxu0 %v7295_v27  ;;  %6950 = vmatprep.subr.bf16.mxu1 %v7375_v5 }
 0x80c   : > { %6928 = vmatprep.subr.bf16.mxu0 %v7375_v5 }
 0x80e   : > { %6951 = vmatpush3.bf16.msra.mxu1 %v7298_v28 }
 0x80f   : > { %6929 = vmatpush3.bf16.msra.mxu0 %v7297_v25  ;;  %6952 = vmatprep.subr.bf16.mxu1 %v7375_v5 }
 0x810   : > { %6930 = vmatprep.subr.bf16.mxu0 %v7375_v5 }
 0x812   : > { %6953 = vmatpush3.bf16.msra.mxu1 %v7300_v29 }
 0x813   : > { %6931 = vmatpush3.bf16.msra.mxu0 %v7299_v22  ;;  %6954 = vmatprep.subr.bf16.mxu1 %v7375_v5 }
 0x814   : > { %6932 = vmatprep.subr.bf16.mxu0 %v7375_v5 }
 0x816   : > { %6955 = vmatpush3.bf16.msra.mxu1 %v7302_v31  ;;  %v7323_v31 = vld [vmem:[%s8722_s6 + $0x60] sm:$0x1f]  }
 0x817   : > { %6933 = vmatpush3.bf16.msra.mxu0 %v7301_v30  ;;  %6956 = vmatprep.subr.bf16.mxu1 %v7375_v5 }
 0x818   : > { %6964 = vmatprep.subr.bf16.mxu0 %v7375_v5 }
 0x81a   : > { %6957 = vmatpush3.bf16.msra.mxu1 %v7303_v32 }
 0x81b   : > { %6958 = vmatprep.subr.bf16.mxu1 %v7375_v5 }
 0x81e   : > { %6959 = vmatpush3.bf16.msra.mxu1 %v7304_v33 }
 0x81f   : > { %6990 = vmatprep.subr.bf16.mxu1 %v7375_v5 }
 0x8c4   : > { %v3718_v34 = vpop.f32.mrb[100].mxu0 }
 0x8c5   : > { %v3725_v35 = vadd.f32 %v3718_v34, %v8348_v63  ;;  %v6884_v36 = vpop.f32.mrb[101].mxu0  ;;  %v7314_v63 = vld [vmem:[%s8723_s7 + $0x2d0] sm:$0xff]  }
 0x8c6   : > { %v3721_v37 = vpop.f32.mrb[102].mxu0  ;;  %v7326_v36 = vld [vmem:[%s8723_s7 + $0x308] sm:$0xff]  }
 0x8c7   : > { %v3726_v38 = vadd.f32 %v3721_v37, %v8350_v4  ;;  %v6885_v39 = vpop.f32.mrb[103].mxu0  ;;  %v7318_v4 = vld [vmem:[%s8723_s7 + $0x2e0] sm:$0xff]   ;;  %v7324_v37 = vld [vmem:[%s8722_s6 + $0x68] sm:$0x1f]  }
 0x8c8   : > { %v7327_v39 = vld [vmem:[%s8723_s7 + $0x310] sm:$0xff]  }
 0x8cc   : > { %v3879_v40 = vpop.f32.mrb[92].mxu1  ;;  %v3933_v41 = vpop.f32.mrb[104].mxu0 }
 0x8cd   : > { %v8438_v42 = vadd.f32 %v3879_v40, %v3725_v35  ;;  %v6910_v43 = vpop.f32.mrb[93].mxu1  ;;  %v6916_v44 = vpop.f32.mrb[105].mxu0  ;;  %v7325_v35 = vld [vmem:[%s8723_s7 + $0x300] sm:$0xff]   ;;  %v7330_v40 = vld [vmem:[%s8723_s7 + $0x348] sm:$0xff]  }
 0x8ce   : > { %v3882_v45 = vpop.f32.mrb[94].mxu1  ;;  %v3936_v46 = vpop.f32.mrb[106].mxu0  ;;  %v7331_v43 = vld [vmem:[%s8723_s7 + $0x320] sm:$0xff]   ;;  %v7333_v44 = vld [vmem:[%s8723_s7 + $0x328] sm:$0xff]  }
 0x8cf   : > { %v8440_v47 = vadd.f32 %v3882_v45, %v3726_v38  ;;  %v3940_v19 = vpack.c.bf16 %v3936_v46, %v3933_v41  ;;  %v6911_v48 = vpop.f32.mrb[95].mxu1  ;;  %v6917_v49 = vpop.f32.mrb[107].mxu0  ;;  %v7328_v38 = vld [vmem:[%s8723_s7 + $0x340] sm:$0xff]   ;;  %v7329_v41 = vld [vmem:[%s8723_s7 + $0x318] sm:$0xff]   ;;  %v7335_v46 = vld [vmem:[%s8723_s7 + $0x330] sm:$0xff]  }
 0x8d0   : > { %v7334_v45 = vld [vmem:[%s8723_s7 + $0x358] sm:$0xff]   ;;  %v7338_v48 = vld [vmem:[%s8723_s7 + $0x368] sm:$0xff]   ;;  %v7339_v49 = vld [vmem:[%s8723_s7 + $0x370] sm:$0xff]  }
 0x8d1   : > { %6935 = vmatmul.mubr.bf16.vlgmr.msra.gmra.mrb[108].mxu0 %v3940_v19  ;;  %v7337_v19 = vld [vmem:[%s8723_s7 + $0x338] sm:$0xff]  }
 0x8d2   : > { %6965 = vmatpush3.bf16.msra.mxu0 %v8022_v59  ;;  %6966 = vmatprep.mubr.msk.bf16.mxu0 %vm7376_vm1, %v7375_v5 }
 0x8d3   : > { %6970 = vmatprep.subr.bf16.mxu0 %v7375_v5 }
 0x8d4   : > { %v4094_v50 = vpop.f32.mrb[96].mxu1 }
 0x8d5   : > { %v6942_v26 = vpop.f32.mrb[97].mxu1 }
 0x8d6   : > { %v4097_v52 = vpop.f32.mrb[98].mxu1 }
 0x8d7   : > { %v4101_v53 = vpack.c.bf16 %v4097_v52, %v4094_v50  ;;  %v6943_v54 = vpop.f32.mrb[99].mxu1  ;;  %v7340_v50 = vld [vmem:[%s8723_s7 + $0x378] sm:$0xff]  }
 0x8d9   : > { %6961 = vmatmul.mubr.bf16.vlgmr.msra.gmra.mrb[100].mxu1 %v4101_v53  ;;  %6967 = vmatmul.mubr.msk.bf16.vlgmr.msra.gmra.mrb[112].mxu0 %vm377_vm0, %v7305_v51 }
 0x8da   : > { %6991 = vmatpush3.bf16.msra.mxu1 %v8022_v59  ;;  %6992 = vmatprep.mubr.msk.bf16.mxu1 %vm7376_vm1, %v7375_v5 }
 0x8db   : > { %6971 = vmatpush3.bf16.msra.mxu0 %v7307_v55  ;;  %6996 = vmatprep.subr.bf16.mxu1 %v7375_v5 }
 0x8dc   : > { %6972 = vmatprep.subr.bf16.mxu0 %v7375_v5  ;;  %6986 = vmatprep.mubr.msk.bf16.mxu0 %vm7376_vm1, %v7375_v5 }
 0x8df   : > { %6973 = vmatpush3.bf16.msra.mxu0 %v7308_v56 }
 0x8e0   : > { %6974 = vmatprep.subr.bf16.mxu0 %v7375_v5 }
 0x8e1   : > { %6993 = vmatmul.mubr.msk.bf16.vlgmr.msra.gmra.mrb[104].mxu1 %vm377_vm0, %v7306_v57 }
 0x8e2   : > { %6997 = vmatpush3.bf16.msra.mxu1 %v7310_v58  ;;  %7012 = vmatprep.mubr.msk.bf16.mxu1 %vm7376_vm1, %v7375_v5 }
 0x8e3   : > { %6975 = vmatpush3.bf16.msra.mxu0 %v7309_v60  ;;  %6998 = vmatprep.subr.bf16.mxu1 %v7375_v5 }
 0x8e4   : > { %6976 = vmatprep.subr.bf16.mxu0 %v7375_v5 }
 0x8e6   : > { %6999 = vmatpush3.bf16.msra.mxu1 %v7312_v61 }
 0x8e7   : > { %6977 = vmatpush3.bf16.msra.mxu0 %v7311_v62  ;;  %7000 = vmatprep.subr.bf16.mxu1 %v7375_v5 }
 0x8e8   : > { %6978 = vmatprep.subr.bf16.mxu0 %v7375_v5 }
 0x8ea   : > { %7001 = vmatpush3.bf16.msra.mxu1 %v7314_v63 }
 0x8eb   : > { %6979 = vmatpush3.bf16.msra.mxu0 %v7313_v0  ;;  %7002 = vmatprep.subr.bf16.mxu1 %v7375_v5 }
 0x8ec   : > { %6980 = vmatprep.subr.bf16.mxu0 %v7375_v5 }
 0x8ee   : > { %7003 = vmatpush3.bf16.msra.mxu1 %v7316_v2 }
 0x8ef   : > { %6981 = vmatpush3.bf16.msra.mxu0 %v7315_v1  ;;  %7004 = vmatprep.subr.bf16.mxu1 %v7375_v5 }
 0x8f0   : > { %6982 = vmatprep.subr.bf16.mxu0 %v7375_v5 }
 0x8f2   : > { %7005 = vmatpush3.bf16.msra.mxu1 %v7318_v4 }
 0x8f3   : > { %6983 = vmatpush3.bf16.msra.mxu0 %v7317_v3  ;;  %7006 = vmatprep.subr.bf16.mxu1 %v7375_v5 }
 0x8f4   : > { %6984 = vmatprep.subr.bf16.mxu0 %v7375_v5 }
 0x8f6   : > { %7007 = vmatpush3.bf16.msra.mxu1 %v7320_v7  ;;  %v7341_v7 = vld [vmem:[%s8722_s6 + $0x70] sm:$0x1f]  }
 0x8f7   : > { %6985 = vmatpush3.bf16.msra.mxu0 %v7319_v6  ;;  %7008 = vmatprep.subr.bf16.mxu1 %v7375_v5 }
 0x8f8   : > { %7016 = vmatprep.subr.bf16.mxu0 %v7375_v5 }
 0x8fa   : > { %7009 = vmatpush3.bf16.msra.mxu1 %v7321_v8 }
 0x8fb   : > { %7010 = vmatprep.subr.bf16.mxu1 %v7375_v5 }
 0x8fe   : > { %7011 = vmatpush3.bf16.msra.mxu1 %v7322_v9 }
 0x8ff   : > { %7042 = vmatprep.subr.bf16.mxu1 %v7375_v5 }
 0x9a4   : > { %v4040_v10 = vpop.f32.mrb[108].mxu0 }
 0x9a5   : > { %v4047_v11 = vadd.f32 %v4040_v10, %v8438_v42  ;;  %v6936_v12 = vpop.f32.mrb[109].mxu0  ;;  %v7332_v42 = vld [vmem:[%s8723_s7 + $0x350] sm:$0xff]  }
 0x9a6   : > { %v4043_v13 = vpop.f32.mrb[110].mxu0  ;;  %v7344_v12 = vld [vmem:[%s8723_s7 + $0x388] sm:$0xff]  }
 0x9a7   : > { %v4048_v14 = vadd.f32 %v4043_v13, %v8440_v47  ;;  %v6937_v15 = vpop.f32.mrb[111].mxu0  ;;  %v7336_v47 = vld [vmem:[%s8723_s7 + $0x360] sm:$0xff]   ;;  %v7342_v13 = vld [vmem:[%s8722_s6 + $0x78] sm:$0x1f]  }
 0x9a8   : > { %v7348_v15 = vld [vmem:[%s8723_s7 + $0x3c8] sm:$0xff]  }
 0x9ac   : > { %v4201_v16 = vpop.f32.mrb[100].mxu1  ;;  %v4255_v17 = vpop.f32.mrb[112].mxu0 }
 0x9ad   : > { %v8528_v18 = vadd.f32 %v4201_v16, %v4047_v11  ;;  %v6962_v20 = vpop.f32.mrb[101].mxu1  ;;  %v6968_v21 = vpop.f32.mrb[113].mxu0  ;;  %v7343_v11 = vld [vmem:[%s8723_s7 + $0x380] sm:$0xff]   ;;  %v7347_v16 = vld [vmem:[%s8723_s7 + $0x398] sm:$0xff]  }
 0x9ae   : > { %v4204_v23 = vpop.f32.mrb[102].mxu1  ;;  %v4258_v24 = vpop.f32.mrb[114].mxu0  ;;  %v7351_v20 = vld [vmem:[%s8723_s7 + $0x3a8] sm:$0xff]   ;;  %v7352_v21 = vld [vmem:[%s8723_s7 + $0x3d8] sm:$0xff]  }
 0x9af   : > { %v8530_v27 = vadd.f32 %v4204_v23, %v4048_v14  ;;  %v4262_v25 = vpack.c.bf16 %v4258_v24, %v4255_v17  ;;  %v6963_v28 = vpop.f32.mrb[103].mxu1  ;;  %v6969_v22 = vpop.f32.mrb[115].mxu0  ;;  %v7345_v14 = vld [vmem:[%s8723_s7 + $0x390] sm:$0xff]   ;;  %v7354_v24 = vld [vmem:[%s8723_s7 + $0x3e0] sm:$0xff]  }
 0x9b0   : > { %v7350_v17 = vld [vmem:[%s8723_s7 + $0x3d0] sm:$0xff]   ;;  %v7358_v22 = vld [vmem:[%s8723_s7 + $0x3f8] sm:$0xff]  }
 0x9b1   : > { %6987 = vmatmul.mubr.bf16.vlgmr.msra.gmra.mrb[116].mxu0 %v4262_v25  ;;  %v7353_v23 = vld [vmem:[%s8723_s7 + $0x3b0] sm:$0xff]   ;;  %v7356_v25 = vld [vmem:[%s8723_s7 + $0x3e8] sm:$0xff]  }
 0x9b2   : > { %7017 = vmatpush3.bf16.msra.mxu0 %v8022_v59  ;;  %7018 = vmatprep.mubr.msk.bf16.mxu0 %vm7376_vm1, %v7375_v5  ;;  %v7357_v28 = vld [vmem:[%s8723_s7 + $0x3f0] sm:$0xff]  }
 0x9b3   : > { %7022 = vmatprep.subr.bf16.mxu0 %v7375_v5 }
 0x9b4   : > { %v4416_v29 = vpop.f32.mrb[104].mxu1 }
 0x9b5   : > { %v6994_v30 = vpop.f32.mrb[105].mxu1 }
 0x9b6   : > { %v4419_v32 = vpop.f32.mrb[106].mxu1 }
 0x9b7   : > { %v4423_v33 = vpack.c.bf16 %v4419_v32, %v4416_v29  ;;  %v6995_v34 = vpop.f32.mrb[107].mxu1 }
 0x9b9   : > { %7013 = vmatmul.mubr.bf16.vlgmr.msra.gmra.mrb[108].mxu1 %v4423_v33  ;;  %7019 = vmatmul.mubr.msk.bf16.vlgmr.msra.gmra.mrb[120].mxu0 %vm377_vm0, %v7323_v31 }
 0x9ba   : > { %7043 = vmatpush3.bf16.msra.mxu1 %v8022_v59  ;;  %7044 = vmatprep.mubr.msk.bf16.mxu1 %vm7376_vm1, %v7375_v5 }
 0x9bb   : > { %7023 = vmatpush3.bf16.msra.mxu0 %v7325_v35  ;;  %7048 = vmatprep.subr.bf16.mxu1 %v7375_v5 }
 0x9bc   : > { %7024 = vmatprep.subr.bf16.mxu0 %v7375_v5  ;;  %7038 = vmatprep.mubr.msk.bf16.mxu0 %vm7376_vm1, %v7375_v5 }
 0x9bf   : > { %7025 = vmatpush3.bf16.msra.mxu0 %v7326_v36 }
 0x9c0   : > { %7026 = vmatprep.subr.bf16.mxu0 %v7375_v5 }
 0x9c1   : > { %7045 = vmatmul.mubr.msk.bf16.vlgmr.msra.gmra.mrb[112].mxu1 %vm377_vm0, %v7324_v37 }
 0x9c2   : > { %7049 = vmatpush3.bf16.msra.mxu1 %v7328_v38  ;;  %7064 = vmatprep.mubr.msk.bf16.mxu1 %vm7376_vm1, %v7375_v5 }
 0x9c3   : > { %7027 = vmatpush3.bf16.msra.mxu0 %v7327_v39  ;;  %7050 = vmatprep.subr.bf16.mxu1 %v7375_v5 }
 0x9c4   : > { %7028 = vmatprep.subr.bf16.mxu0 %v7375_v5 }
 0x9c6   : > { %7051 = vmatpush3.bf16.msra.mxu1 %v7330_v40 }
 0x9c7   : > { %7029 = vmatpush3.bf16.msra.mxu0 %v7329_v41  ;;  %7052 = vmatprep.subr.bf16.mxu1 %v7375_v5 }
 0x9c8   : > { %7030 = vmatprep.subr.bf16.mxu0 %v7375_v5 }
 0x9ca   : > { %7053 = vmatpush3.bf16.msra.mxu1 %v7332_v42 }
 0x9cb   : > { %7031 = vmatpush3.bf16.msra.mxu0 %v7331_v43  ;;  %7054 = vmatprep.subr.bf16.mxu1 %v7375_v5 }
 0x9cc   : > { %7032 = vmatprep.subr.bf16.mxu0 %v7375_v5 }
 0x9ce   : > { %7055 = vmatpush3.bf16.msra.mxu1 %v7334_v45 }
 0x9cf   : > { %7033 = vmatpush3.bf16.msra.mxu0 %v7333_v44  ;;  %7056 = vmatprep.subr.bf16.mxu1 %v7375_v5 }
 0x9d0   : > { %7034 = vmatprep.subr.bf16.mxu0 %v7375_v5 }
 0x9d2   : > { %7057 = vmatpush3.bf16.msra.mxu1 %v7336_v47 }
 0x9d3   : > { %7035 = vmatpush3.bf16.msra.mxu0 %v7335_v46  ;;  %7058 = vmatprep.subr.bf16.mxu1 %v7375_v5 }
 0x9d4   : > { %7036 = vmatprep.subr.bf16.mxu0 %v7375_v5 }
 0x9d6   : > { %7059 = vmatpush3.bf16.msra.mxu1 %v7338_v48 }
 0x9d7   : > { %7037 = vmatpush3.bf16.msra.mxu0 %v7337_v19  ;;  %7060 = vmatprep.subr.bf16.mxu1 %v7375_v5 }
 0x9d8   : > { %7068 = vmatprep.subr.bf16.mxu0 %v7375_v5 }
 0x9da   : > { %7061 = vmatpush3.bf16.msra.mxu1 %v7339_v49 }
 0x9db   : > { %7062 = vmatprep.subr.bf16.mxu1 %v7375_v5 }
 0x9de   : > { %7063 = vmatpush3.bf16.msra.mxu1 %v7340_v50 }
 0x9df   : > { %7094 = vmatprep.subr.bf16.mxu1 %v7375_v5 }
 0xa84   : > { %v4362_v26 = vpop.f32.mrb[116].mxu0 }
 0xa85   : > { %v4369_v51 = vadd.f32 %v4362_v26, %v8528_v18  ;;  %v6988_v52 = vpop.f32.mrb[117].mxu0  ;;  %v7349_v18 = vld [vmem:[%s8723_s7 + $0x3a0] sm:$0xff]  }
 0xa86   : > { %v4365_v53 = vpop.f32.mrb[118].mxu0 }
 0xa87   : > { %v4370_v54 = vadd.f32 %v4365_v53, %v8530_v27  ;;  %v6989_v55 = vpop.f32.mrb[119].mxu0  ;;  %v7355_v27 = vld [vmem:[%s8723_s7 + $0x3b8] sm:$0xff]  }
 0xa88   : > { %v5964_v55 = vld [vmem:[%s8724_s8] ss:$0 sm:$0xff] }
 0xa8c   : > { %v4523_v56 = vpop.f32.mrb[108].mxu1  ;;  %v4577_v57 = vpop.f32.mrb[120].mxu0 }
 0xa8d   : > { %v8618_v58 = vadd.f32 %v4523_v56, %v4369_v51  ;;  %v7014_v60 = vpop.f32.mrb[109].mxu1  ;;  %v7020_v61 = vpop.f32.mrb[121].mxu0 }
 0xa8e   : > { %v4526_v62 = vpop.f32.mrb[110].mxu1  ;;  %v4580_v63 = vpop.f32.mrb[122].mxu0 }
 0xa8f   : > { %v8620_v0 = vadd.f32 %v4526_v62, %v4370_v54  ;;  %v4584_v1 = vpack.c.bf16 %v4580_v63, %v4577_v57  ;;  %v7015_v2 = vpop.f32.mrb[111].mxu1  ;;  %v7021_v3 = vpop.f32.mrb[123].mxu0 }
 0xa91   : > { %7039 = vmatmul.mubr.bf16.vlgmr.msra.gmra.mrb[124].mxu0 %v4584_v1 }
 0xa92   : > { %7069 = vmatpush3.bf16.msra.mxu0 %v8022_v59  ;;  %7070 = vmatprep.mubr.msk.bf16.mxu0 %vm7376_vm1, %v7375_v5 }
 0xa93   : > { %7074 = vmatprep.subr.bf16.mxu0 %v7375_v5 }
 0xa94   : > { %v4738_v4 = vpop.f32.mrb[112].mxu1 }
 0xa95   : > { %v7046_v6 = vpop.f32.mrb[113].mxu1 }
 0xa96   : > { %v4741_v8 = vpop.f32.mrb[114].mxu1 }
 0xa97   : > { %v4745_v9 = vpack.c.bf16 %v4741_v8, %v4738_v4  ;;  %v7047_v10 = vpop.f32.mrb[115].mxu1 }
 0xa99   : > { %7065 = vmatmul.mubr.bf16.vlgmr.msra.gmra.mrb[116].mxu1 %v4745_v9  ;;  %7071 = vmatmul.mubr.msk.bf16.vlgmr.msra.gmra.mrb[128].mxu0 %vm377_vm0, %v7341_v7 }
 0xa9a   : > { %7095 = vmatpush3.bf16.msra.mxu1 %v8022_v59  ;;  %7096 = vmatprep.mubr.msk.bf16.mxu1 %vm7376_vm1, %v7375_v5  ;;  %v7346_v59 = vld [vmem:[%s8723_s7 + $0x3c0] sm:$0xff]  }
 0xa9b   : > { %7075 = vmatpush3.bf16.msra.mxu0 %v7343_v11  ;;  %7100 = vmatprep.subr.bf16.mxu1 %v7375_v5 }
 0xa9c   : > { %7076 = vmatprep.subr.bf16.mxu0 %v7375_v5  ;;  %7090 = vmatprep.mubr.msk.bf16.mxu0 %vm7376_vm1, %v7375_v5 }
 0xa9f   : > { %7077 = vmatpush3.bf16.msra.mxu0 %v7344_v12 }
 0xaa0   : > { %7078 = vmatprep.subr.bf16.mxu0 %v7375_v5 }
 0xaa1   : > { %7097 = vmatmul.mubr.msk.bf16.vlgmr.msra.gmra.mrb[120].mxu1 %vm377_vm0, %v7342_v13 }
 0xaa2   : > { %7101 = vmatpush3.bf16.msra.mxu1 %v7346_v59  ;;  %7116 = vmatprep.mubr.msk.bf16.mxu1 %vm7376_vm1, %v7375_v5 }
 0xaa3   : > { %7079 = vmatpush3.bf16.msra.mxu0 %v7345_v14  ;;  %7102 = vmatprep.subr.bf16.mxu1 %v7375_v5 }
 0xaa4   : > { %7080 = vmatprep.subr.bf16.mxu0 %v7375_v5 }
 0xaa6   : > { %7103 = vmatpush3.bf16.msra.mxu1 %v7348_v15 }
 0xaa7   : > { %7081 = vmatpush3.bf16.msra.mxu0 %v7347_v16  ;;  %7104 = vmatprep.subr.bf16.mxu1 %v7375_v5 }
 0xaa8   : > { %7082 = vmatprep.subr.bf16.mxu0 %v7375_v5 }
 0xaaa   : > { %7105 = vmatpush3.bf16.msra.mxu1 %v7350_v17 }
 0xaab   : > { %7083 = vmatpush3.bf16.msra.mxu0 %v7349_v18  ;;  %7106 = vmatprep.subr.bf16.mxu1 %v7375_v5 }
 0xaac   : > { %7084 = vmatprep.subr.bf16.mxu0 %v7375_v5 }
 0xaae   : > { %7107 = vmatpush3.bf16.msra.mxu1 %v7352_v21 }
 0xaaf   : > { %7085 = vmatpush3.bf16.msra.mxu0 %v7351_v20  ;;  %7108 = vmatprep.subr.bf16.mxu1 %v7375_v5 }
 0xab0   : > { %7086 = vmatprep.subr.bf16.mxu0 %v7375_v5 }
 0xab2   : > { %7109 = vmatpush3.bf16.msra.mxu1 %v7354_v24 }
 0xab3   : > { %7087 = vmatpush3.bf16.msra.mxu0 %v7353_v23  ;;  %7110 = vmatprep.subr.bf16.mxu1 %v7375_v5 }
 0xab4   : > { %7088 = vmatprep.subr.bf16.mxu0 %v7375_v5 }
 0xab6   : > { %7111 = vmatpush3.bf16.msra.mxu1 %v7356_v25 }
 0xab7   : > { %7089 = vmatpush3.bf16.msra.mxu0 %v7355_v27  ;;  %7112 = vmatprep.subr.bf16.mxu1 %v7375_v5 }
 0xaba   : > { %7113 = vmatpush3.bf16.msra.mxu1 %v7357_v28 }
 0xabb   : > { %7114 = vmatprep.subr.bf16.mxu1 %v7375_v5 }
 0xabe   : > { %7115 = vmatpush3.bf16.msra.mxu1 %v7358_v22 }
 0xb64   : > { %v4684_v29 = vpop.f32.mrb[124].mxu0 }
 0xb65   : > { %v4691_v30 = vadd.f32 %v4684_v29, %v8618_v58  ;;  %v7040_v31 = vpop.f32.mrb[125].mxu0 }
 0xb66   : > { %v4687_v32 = vpop.f32.mrb[126].mxu0 }
 0xb67   : > { %v4692_v33 = vadd.f32 %v4687_v32, %v8620_v0  ;;  %v7041_v34 = vpop.f32.mrb[127].mxu0 }
 0xb6c   : > { %v4845_v35 = vpop.f32.mrb[116].mxu1  ;;  %v4899_v36 = vpop.f32.mrb[128].mxu0 }
 0xb6d   : > { %v4852_v37 = vadd.f32 %v4845_v35, %v4691_v30  ;;  %v7066_v38 = vpop.f32.mrb[117].mxu1  ;;  %v7072_v39 = vpop.f32.mrb[129].mxu0 }
 0xb6e   : > { %v4848_v40 = vpop.f32.mrb[118].mxu1  ;;  %v4902_v5 = vpop.f32.mrb[130].mxu0 }
 0xb6f   : > { %v4853_v41 = vadd.f32 %v4848_v40, %v4692_v33  ;;  %v4906_v42 = vpack.c.bf16 %v4902_v5, %v4899_v36  ;;  %v7067_v43 = vpop.f32.mrb[119].mxu1  ;;  %v7073_v44 = vpop.f32.mrb[131].mxu0 }
 0xb71   : > { %7091 = vmatmul.mubr.bf16.vlgmr.msra.gmra.mrb[132].mxu0 %v4906_v42 }
 0xb74   : > { %v5060_v45 = vpop.f32.mrb[120].mxu1 }
 0xb75   : > { %v7098_v46 = vpop.f32.mrb[121].mxu1 }
 0xb76   : > { %v5063_v47 = vpop.f32.mrb[122].mxu1 }
 0xb77   : > { %v5067_v19 = vpack.c.bf16 %v5063_v47, %v5060_v45  ;;  %v7099_v48 = vpop.f32.mrb[123].mxu1 }
 0xb79   : > { %7117 = vmatmul.mubr.bf16.vlgmr.msra.gmra.mrb[124].mxu1 %v5067_v19 }
 0xc44   : > { %v5006_v49 = vpop.f32.mrb[132].mxu0 }
 0xc45   : > { %v5013_v50 = vadd.f32 %v5006_v49, %v4852_v37  ;;  %v7092_v26 = vpop.f32.mrb[133].mxu0 }
 0xc46   : > { %v5009_v51 = vpop.f32.mrb[134].mxu0 }
 0xc47   : > { %v5014_v52 = vadd.f32 %v5009_v51, %v4853_v41  ;;  %v7093_v53 = vpop.f32.mrb[135].mxu0 }
 0xc4c   : > { %v5167_v54 = vpop.f32.mrb[124].mxu1 }
 0xc4d   : > { %v5174_v56 = vadd.f32 %v5167_v54, %v5013_v50  ;;  %v7118_v57 = vpop.f32.mrb[125].mxu1 }
 0xc4e   : > { %v5170_v58 = vpop.f32.mrb[126].mxu1 }
 0xc4f   : > { %v5183_v60 = vadd.f32 %v5964_v55, %v5174_v56  ;;  %v5175_v61 = vadd.f32 %v5170_v58, %v5014_v52  ;;  %v7119_v62 = vpop.f32.mrb[127].mxu1 }
 0xc51   : > { %v5185_v63 = vsub.f32 0.0, %v5183_v60  ;;  %v5184_v0 = vadd.f32 %v5964_v55, %v5175_v61 }
 0xc53   : > { %v5187_v1 = vmul.f32 1.442695, %v5185_v63  ;;  %v5186_v2 = vsub.f32 0.0, %v5184_v0 }
 0xc55   : > { %7359 = vpow2.f32 %v5187_v1  ;;  %v5189_v3 = vmul.f32 1.442695, %v5186_v2 }
 0xc57   : > { %7361 = vpow2.f32 %v5189_v3 }
 0xc5f   : > { %v7360_v4 = vpop.eup %7359 }
 0xc60   : > { %v5191_v6 = vadd.f32 1.0, %v7360_v4 }
 0xc61   : > { %v7362_v7 = vpop.eup %7361 }
 0xc62   : > { %7363 = vrcp.f32 %v5191_v6  ;;  %v5192_v8 = vadd.f32 1.0, %v7362_v7 }
 0xc64   : > { %7365 = vrcp.f32 %v5192_v8 }
 0xc6c   : > { %v7364_v9 = vpop.eup %7363 }
 0xc6d   : > { %5195 = vst [vmem:[%s332_s18] sm:$0xff] %v7364_v9 }
 0xc6e   : > { %v7366_v10 = vpop.eup %7365 }
 0xc6f   : > { %5196 = vst [vmem:[%s332_s18 + $0x8] sm:$0x1] %v7366_v10 }
 0xc70 PF: > { %s19_s30 = sadd.s32 1, %s7373_s30  }
 0xc71   : > { %p16_p4 = scmp.ge.s32.totalorder %s19_s30, 4  }
 0xc73   :  { %18 = sbr.rel (!%p16_p4) target bundleno = 1 (0x1), region = 146 }

</bundles_post_ra>
